<compile_context>
chip_gen: v7x
topology: tpu7x:2x2x1
jax: 0.10.0
libtpu: 0.0.40
codegen_flags: <defaults>
</compile_context>

<pallas_src>
import functools

import numpy as np

import jax
import jax.numpy as jnp
from jax.experimental import pallas as pl
from jax.experimental.pallas import tpu as pltpu

BN_EPS = 1e-5
LANE = 128


def conv2d_size_out(size, kernel_size=3, stride=2):
    return (size - (kernel_size - 1) - 1) // stride + 1


def round_up(x, m):
    return ((x + m - 1) // m) * m


def pad_to(a, shape):
    return jnp.pad(a, [(0, s - d) for d, s in zip(a.shape, shape)])


# ----------------------------- Pallas kernel ------------------------------

def fused_conv_net_kernel(p1_ref, w1_ref, g2_ref, w2_ref, hsel_ref, wh_ref,
                          bnp_ref, o_ref, *, m1, m2):
    """Whole forward pass on VMEM-resident, 128-lane-padded tiles.

    p1_ref:   (M1p, 128)      im2col patches of the input, K=(ky,kx,cin) padded
    w1_ref:   (128, 128)      conv1 weight, (K, Cout) padded, f32
    g2_ref:   (9, M2p, M1p)   0/1 row-selection matrices (conv2 im2col), bf16
    w2_ref:   (9, 128, 128)   conv2 weight per (ky,kx): (Cin, Cout) padded, f32
    hsel_ref: (9, Np, M2p)    0/1 row-selection matrices (head gather), f32
    wh_ref:   (9, 128, 128)   head weight per spatial pos: (C, A) padded, f32
    bnp_ref:  (8, 128)        packed rows: g1, b1, g2, b2, head_bias
    o_ref:    (Np, 128)       lane-dense output (sliced to (N, A) outside)
    """
    f32 = jnp.float32
    bnp = bnp_ref[...]
    g1, b1 = bnp[0:1, :], bnp[1:2, :]
    g2v, b2v = bnp[2:3, :], bnp[3:4, :]
    head_b = bnp[4:5, :]

    # ---- block 1: Conv2d(3, mid_n, 3, 2) as one matmul + BN + ReLU ----
    # Conv bias omitted: exactly cancelled by the batch-mean subtraction.
    y = jnp.dot(p1_ref[...], w1_ref[...], preferred_element_type=f32)
    inv_m1 = 1.0 / m1                       # padded rows of y are exactly zero,
    mean1 = jnp.sum(y, axis=0, keepdims=True) * inv_m1       # so sums over the
    msq1 = jnp.sum(y * y, axis=0, keepdims=True) * inv_m1    # padded rows are
    var1 = jnp.maximum(msq1 - mean1 * mean1, 0.0)            # exact.
    scale1 = g1 * jax.lax.rsqrt(var1 + BN_EPS)
    shift1 = b1 - mean1 * scale1
    y1 = jnp.maximum(y * scale1 + shift1, 0.0)    # (M1p, 128); pad rows are
                                                  # garbage but never selected.

    # ---- block 2: Conv2d(mid_n, mid_n, 3, 2) as 9 gather+matmul pairs ----
    m2p = g2_ref.shape[1]
    acc = jnp.zeros((m2p, LANE), f32)
    for kk in range(g2_ref.shape[0]):
        sel = g2_ref[kk].astype(f32)              # 0/1 values: exact in bf16
        rows = jnp.dot(sel, y1, preferred_element_type=f32)          # (M2p,128)
        acc = acc + jnp.dot(rows, w2_ref[kk], preferred_element_type=f32)
    inv_m2 = 1.0 / m2
    mean2 = jnp.sum(acc, axis=0, keepdims=True) * inv_m2
    msq2 = jnp.sum(acc * acc, axis=0, keepdims=True) * inv_m2
    var2 = jnp.maximum(msq2 - mean2 * mean2, 0.0)
    scale2 = g2v * jax.lax.rsqrt(var2 + BN_EPS)
    shift2 = b2v - mean2 * scale2
    y2 = jnp.maximum(acc * scale2 + shift2, 0.0)  # (M2p, 128)

    # ---- head Linear: gather per spatial position + matmul, summed ----
    n_pad = o_ref.shape[0]
    out = jnp.zeros((n_pad, LANE), f32)
    for s in range(hsel_ref.shape[0]):
        rows = jnp.dot(hsel_ref[s], y2, preferred_element_type=f32)   # (Np,128)
        out = out + jnp.dot(rows, wh_ref[s], preferred_element_type=f32)
    o_ref[...] = (out + head_b).astype(o_ref.dtype)


# ------------------------------ JAX glue ----------------------------------

def im2col(x_nhwc, kh=3, kw=3, stride=2):
    """Patches (N*OH*OW, kh*kw*C) with K ordered (ky, kx, cin). Conv1 only —
    this is a tiny O(N*H*W*C) strided-slice reshape on the (2,16,16,3) input."""
    n, h, w, c = x_nhwc.shape
    oh = conv2d_size_out(h, kh, stride)
    ow = conv2d_size_out(w, kw, stride)
    cols = []
    for ky in range(kh):
        for kx in range(kw):
            cols.append(
                x_nhwc[:, ky:ky + stride * oh:stride, kx:kx + stride * ow:stride, :]
            )
    patches = jnp.stack(cols, axis=3)  # (N, OH, OW, kh*kw, C)
    return patches.reshape(n * oh * ow, kh * kw * c), oh, ow


def init_params(key, w, h, action_n, mid_n):
    """Deterministic synthetic parameters in PyTorch layouts."""
    k1, k2, k3, k4, k5, k6 = jax.random.split(key, 6)

    def uinit(k, shape, fan_in):
        bound = 1.0 / float(fan_in) ** 0.5
        return jax.random.uniform(k, shape, jnp.float32, -bound, bound)

    convw = conv2d_size_out(conv2d_size_out(w))
    convh = conv2d_size_out(conv2d_size_out(h))
    lin_in = convw * convh * mid_n

    return {
        "conv1_w": uinit(k1, (mid_n, 3, 3, 3), 3 * 3 * 3),
        "conv1_b": uinit(k2, (mid_n,), 3 * 3 * 3),       # cancelled by BN
        "bn1_gamma": jnp.ones((mid_n,), jnp.float32),
        "bn1_beta": jnp.zeros((mid_n,), jnp.float32),
        "conv2_w": uinit(k3, (mid_n, mid_n, 3, 3), mid_n * 3 * 3),
        "conv2_b": uinit(k4, (mid_n,), mid_n * 3 * 3),   # cancelled by BN
        "bn2_gamma": jnp.ones((mid_n,), jnp.float32),
        "bn2_beta": jnp.zeros((mid_n,), jnp.float32),
        "head_w": uinit(k5, (action_n, lin_in), lin_in),
        "head_b": uinit(k6, (action_n,), lin_in),
    }


def prepare_kernel_params(params, n, h, w):
    """One-time layout transforms: kernel-ready padded weights + selection mats."""
    mid_n = params["conv1_w"].shape[0]
    action_n = params["head_w"].shape[0]
    oh1, ow1 = conv2d_size_out(h), conv2d_size_out(w)
    oh2, ow2 = conv2d_size_out(oh1), conv2d_size_out(ow1)
    n_spatial = oh2 * ow2
    m1, m2 = n * oh1 * ow1, n * oh2 * ow2
    m1p, m2p = round_up(m1, LANE), round_up(m2, LANE)
    n_pad = round_up(n, 8)
    k1 = 3 * 3 * 3

    # conv1 weight (Cout, Cin, kh, kw) -> (K=(ky,kx,cin), Cout), zero-padded.
    w1 = jnp.transpose(params["conv1_w"], (2, 3, 1, 0)).reshape(k1, mid_n)
    w1p = pad_to(w1, (LANE, LANE))
    # conv2 weight -> (9, Cin, Cout), zero-padded per (ky,kx).
    w2 = jnp.transpose(params["conv2_w"], (2, 3, 1, 0)).reshape(9, mid_n, mid_n)
    w2p = pad_to(w2, (9, LANE, LANE))
    # head weight permuted into NHWC-gather order: wh[s, c, a] = head_w[a, c*S+s]
    wh = jnp.transpose(params["head_w"].reshape(action_n, mid_n, n_spatial),
                       (2, 1, 0))
    whp = pad_to(wh, (n_spatial, LANE, LANE))
    # packed per-channel BN affine params + head bias -> one (8, 128) operand.
    bnp = jnp.zeros((8, LANE), jnp.float32)
    bnp = bnp.at[0, :mid_n].set(params["bn1_gamma"])
    bnp = bnp.at[1, :mid_n].set(params["bn1_beta"])
    bnp = bnp.at[2, :mid_n].set(params["bn2_gamma"])
    bnp = bnp.at[3, :mid_n].set(params["bn2_beta"])
    bnp = bnp.at[4, :action_n].set(params["head_b"])

    # 0/1 selection matrices (static constants; conv2 im2col + head row gather).
    g2 = np.zeros((9, m2p, m1p), np.float32)
    for b in range(n):
        for oy in range(oh2):
            for ox in range(ow2):
                r2 = b * oh2 * ow2 + oy * ow2 + ox
                for ky in range(3):
                    for kx in range(3):
                        r1 = b * oh1 * ow1 + (2 * oy + ky) * ow1 + (2 * ox + kx)
                        g2[ky * 3 + kx, r2, r1] = 1.0
    hsel = np.zeros((n_spatial, n_pad, m2p), np.float32)
    for b in range(n):
        for s in range(n_spatial):
            hsel[s, b, b * n_spatial + s] = 1.0

    return dict(
        # 0/1 matrix in bf16: exact values, half the HBM/VMEM bytes of the
        # largest constant operand.  Learned weights stay f32 for fidelity.
        w1=w1p, g2=jnp.asarray(g2, dtype=jnp.bfloat16), w2=w2p,
        hsel=jnp.asarray(hsel), wh=whp, bnp=bnp,
        dims=dict(n=n, oh1=oh1, ow1=ow1, oh2=oh2, ow2=ow2, m1=m1, m2=m2,
                  m1p=m1p, m2p=m2p, n_pad=n_pad, mid_n=mid_n,
                  action_n=action_n, n_spatial=n_spatial),
    )


def conv_forward(kp, x_nchw):
    """Forward pass matching Conv.forward(x) with x in NCHW (one fused kernel)."""
    d = kp["dims"]
    x = jnp.transpose(x_nchw, (0, 2, 3, 1)).astype(jnp.float32)  # NHWC
    p1, _, _ = im2col(x)                       # (N*OH1*OW1, 27) on the tiny input
    p1 = pad_to(p1, (d["m1p"], LANE))

    m1p, m2p, n_pad, ns = d["m1p"], d["m2p"], d["n_pad"], d["n_spatial"]
    flops = (2 * m1p * LANE * LANE
             + 9 * 2 * (m2p * m1p * LANE + m2p * LANE * LANE)
             + ns * 2 * (n_pad * m2p * LANE + n_pad * LANE * LANE))
    const_bytes = sum(int(a.size) * a.dtype.itemsize
                      for a in (kp["w1"], kp["g2"], kp["w2"],
                                kp["hsel"], kp["wh"], kp["bnp"]))
    bytes_accessed = const_bytes + int(p1.size) * 4 + n_pad * LANE * 4

    kernel = functools.partial(fused_conv_net_kernel,
                               m1=float(d["m1"]), m2=float(d["m2"]))
    vmem = [pl.BlockSpec(memory_space=pltpu.MemorySpace.VMEM) for _ in range(7)]
    out = pl.pallas_call(
        kernel,
        out_shape=jax.ShapeDtypeStruct((n_pad, LANE), jnp.float32),
        in_specs=vmem,
        out_specs=pl.BlockSpec(memory_space=pltpu.MemorySpace.VMEM),
        cost_estimate=pl.CostEstimate(flops=int(flops),
                                      transcendentals=2 * LANE,
                                      bytes_accessed=int(bytes_accessed)),
    )(p1, kp["w1"], kp["g2"], kp["w2"], kp["hsel"], kp["wh"], kp["bnp"])
    return out[:d["n"], :d["action_n"]]


# ---------------------------- pure-JAX reference ---------------------------

def reference_forward(params, x_nchw):
    """XLA reference of Conv.forward (training-mode BatchNorm, NCHW flatten)."""
    def conv(x, w, b):
        y = jax.lax.conv_general_dilated(
            x, w, window_strides=(2, 2), padding="VALID",
            dimension_numbers=("NCHW", "OIHW", "NCHW"))
        return y + b.reshape(1, -1, 1, 1)

    def bn_relu(y, gamma, beta):
        mean = jnp.mean(y, axis=(0, 2, 3), keepdims=True)
        var = jnp.mean(jnp.square(y - mean), axis=(0, 2, 3), keepdims=True)
        yhat = (y - mean) * jax.lax.rsqrt(var + BN_EPS)
        return jnp.maximum(
            yhat * gamma.reshape(1, -1, 1, 1) + beta.reshape(1, -1, 1, 1), 0.0)

    x = x_nchw.astype(jnp.float32)
    y = bn_relu(conv(x, params["conv1_w"], params["conv1_b"]),
                params["bn1_gamma"], params["bn1_beta"])
    y = bn_relu(conv(y, params["conv2_w"], params["conv2_b"]),
                params["bn2_gamma"], params["bn2_beta"])
    flat = y.reshape(y.shape[0], -1)                      # NCHW flatten order
    return flat @ params["head_w"].T + params["head_b"]


# -------------------------------- main -------------------------------------

if __name__ == "__main__":
    # batch=2, C=3 (fixed by the module), 16x16 spatial, mid_n=16, action_n=4.
    N, C, H, W = 2, 3, 16, 16
    mid_n, action_n = 16, 4

    key = jax.random.PRNGKey(0)
    kx, kp_ = jax.random.split(key)
    x = jax.random.normal(kx, (N, C, H, W), dtype=jnp.float32)  # NCHW
    params = init_params(kp_, W, H, action_n, mid_n)
    kparams = prepare_kernel_params(params, N, H, W)

    fwd = jax.jit(functools.partial(conv_forward, kparams))
    out = jax.block_until_ready(fwd(x))

    assert out.shape == (N, action_n), out.shape
    assert out.dtype == jnp.float32
    assert bool(jnp.all(jnp.isfinite(out)))

    # Correctness check against the pure-JAX/XLA reference (loose tolerance:
    # both paths run the MXU at default matmul precision).
    ref = jax.block_until_ready(
        jax.jit(functools.partial(reference_forward, params))(x))
    max_err = float(jnp.max(jnp.abs(out - ref)))
    assert max_err < 5e-2, f"kernel/reference mismatch: max abs err {max_err}"

    print("KERNEL_OK")
</pallas_src>

<mosaic_0001>
module attributes {stable_mosaic.version = 11 : i64} {
  func.func @fused_conv_net_kernel(%arg0: memref<128x128xf32, #tpu.memory_space<vmem>>, %arg1: memref<128x128xf32, #tpu.memory_space<vmem>>, %arg2: memref<9x128x128xbf16, #tpu.memory_space<vmem>>, %arg3: memref<9x128x128xf32, #tpu.memory_space<vmem>>, %arg4: memref<9x8x128xf32, #tpu.memory_space<vmem>>, %arg5: memref<9x128x128xf32, #tpu.memory_space<vmem>>, %arg6: memref<8x128xf32, #tpu.memory_space<vmem>>, %arg7: memref<8x128xf32, #tpu.memory_space<vmem>>) attributes {dimension_semantics = [], scalar_prefetch = 0 : i64, scratch_operands = 0 : i64, tpu.core_type = #tpu.core_type<tc>} {
    %c0 = arith.constant 0 : index
    %c0_0 = arith.constant 0 : index
    %0 = vector.load %arg6[%c0, %c0_0] : memref<8x128xf32, #tpu.memory_space<vmem>>, vector<8x128xf32>
    %1 = vector.extract_strided_slice %0 {offsets = [0, 0], sizes = [1, 128], strides = [1, 1]} : vector<8x128xf32> to vector<1x128xf32>
    %2 = vector.extract_strided_slice %0 {offsets = [1, 0], sizes = [1, 128], strides = [1, 1]} : vector<8x128xf32> to vector<1x128xf32>
    %3 = vector.extract_strided_slice %0 {offsets = [2, 0], sizes = [1, 128], strides = [1, 1]} : vector<8x128xf32> to vector<1x128xf32>
    %4 = vector.extract_strided_slice %0 {offsets = [3, 0], sizes = [1, 128], strides = [1, 1]} : vector<8x128xf32> to vector<1x128xf32>
    %5 = vector.extract_strided_slice %0 {offsets = [4, 0], sizes = [1, 128], strides = [1, 1]} : vector<8x128xf32> to vector<1x128xf32>
    %c0_1 = arith.constant 0 : index
    %c0_2 = arith.constant 0 : index
    %6 = vector.load %arg0[%c0_1, %c0_2] : memref<128x128xf32, #tpu.memory_space<vmem>>, vector<128x128xf32>
    %c0_3 = arith.constant 0 : index
    %c0_4 = arith.constant 0 : index
    %7 = vector.load %arg1[%c0_3, %c0_4] : memref<128x128xf32, #tpu.memory_space<vmem>>, vector<128x128xf32>
    %cst = arith.constant dense<0.000000e+00> : vector<128x128xf32>
    %8 = tpu.matmul %6, %7, %cst {dimension_numbers = #tpu.dot_dimension_numbers<[1], [0], [0], [1], [0, 0, 1, 1], [], []>} : vector<128x128xf32>, vector<128x128xf32>, vector<128x128xf32> -> vector<128x128xf32>
    %cst_5 = arith.constant dense<0.000000e+00> : vector<128xf32>
    %9 = vector.multi_reduction <add>, %8, %cst_5 [0] : vector<128x128xf32> to vector<128xf32>
    %10 = vector.shape_cast %9 : vector<128xf32> to vector<1x128xf32>
    %cst_6 = arith.constant 0.0102040814 : f32
    %11 = vector.broadcast %cst_6 : f32 to vector<1x128xf32>
    %12 = arith.mulf %10, %11 : vector<1x128xf32>
    %13 = arith.mulf %8, %8 : vector<128x128xf32>
    %cst_7 = arith.constant dense<0.000000e+00> : vector<128xf32>
    %14 = vector.multi_reduction <add>, %13, %cst_7 [0] : vector<128x128xf32> to vector<128xf32>
    %15 = vector.shape_cast %14 : vector<128xf32> to vector<1x128xf32>
    %cst_8 = arith.constant 0.0102040814 : f32
    %16 = vector.broadcast %cst_8 : f32 to vector<1x128xf32>
    %17 = arith.mulf %15, %16 : vector<1x128xf32>
    %18 = arith.mulf %12, %12 : vector<1x128xf32>
    %19 = arith.subf %17, %18 : vector<1x128xf32>
    %cst_9 = arith.constant 0.000000e+00 : f32
    %20 = vector.broadcast %cst_9 : f32 to vector<1x128xf32>
    %21 = arith.maximumf %19, %20 : vector<1x128xf32>
    %cst_10 = arith.constant 9.99999974E-6 : f32
    %22 = vector.broadcast %cst_10 : f32 to vector<1x128xf32>
    %23 = arith.addf %21, %22 : vector<1x128xf32>
    %24 = math.rsqrt %23 : vector<1x128xf32>
    %25 = arith.mulf %1, %24 : vector<1x128xf32>
    %26 = arith.mulf %12, %25 : vector<1x128xf32>
    %27 = arith.subf %2, %26 : vector<1x128xf32>
    %28 = vector.broadcast %25 : vector<1x128xf32> to vector<128x128xf32>
    %29 = arith.mulf %8, %28 : vector<128x128xf32>
    %30 = vector.broadcast %27 : vector<1x128xf32> to vector<128x128xf32>
    %31 = arith.addf %29, %30 : vector<128x128xf32>
    %cst_11 = arith.constant 0.000000e+00 : f32
    %32 = vector.broadcast %cst_11 : f32 to vector<128x128xf32>
    %33 = arith.maximumf %31, %32 : vector<128x128xf32>
    %cst_12 = arith.constant 0.000000e+00 : f32
    %34 = vector.broadcast %cst_12 : f32 to vector<128x128xf32>
    %c0_13 = arith.constant 0 : index
    %c0_14 = arith.constant 0 : index
    %c0_15 = arith.constant 0 : index
    %35 = vector.load %arg2[%c0_13, %c0_14, %c0_15] : memref<9x128x128xbf16, #tpu.memory_space<vmem>>, vector<1x128x128xbf16>
    %36 = vector.shape_cast %35 : vector<1x128x128xbf16> to vector<128x128xbf16>
    %37 = arith.extf %36 : vector<128x128xbf16> to vector<128x128xf32>
    %cst_16 = arith.constant dense<0.000000e+00> : vector<128x128xf32>
    %38 = tpu.matmul %37, %33, %cst_16 {dimension_numbers = #tpu.dot_dimension_numbers<[1], [0], [0], [1], [0, 0, 1, 1], [], []>} : vector<128x128xf32>, vector<128x128xf32>, vector<128x128xf32> -> vector<128x128xf32>
    %c0_17 = arith.constant 0 : index
    %c0_18 = arith.constant 0 : index
    %c0_19 = arith.constant 0 : index
    %39 = vector.load %arg3[%c0_17, %c0_18, %c0_19] : memref<9x128x128xf32, #tpu.memory_space<vmem>>, vector<1x128x128xf32>
    %40 = vector.shape_cast %39 : vector<1x128x128xf32> to vector<128x128xf32>
    %cst_20 = arith.constant dense<0.000000e+00> : vector<128x128xf32>
    %41 = tpu.matmul %38, %40, %cst_20 {dimension_numbers = #tpu.dot_dimension_numbers<[1], [0], [0], [1], [0, 0, 1, 1], [], []>} : vector<128x128xf32>, vector<128x128xf32>, vector<128x128xf32> -> vector<128x128xf32>
    %42 = arith.addf %34, %41 : vector<128x128xf32>
    %c1 = arith.constant 1 : index
    %c0_21 = arith.constant 0 : index
    %c0_22 = arith.constant 0 : index
    %43 = vector.load %arg2[%c1, %c0_21, %c0_22] : memref<9x128x128xbf16, #tpu.memory_space<vmem>>, vector<1x128x128xbf16>
    %44 = vector.shape_cast %43 : vector<1x128x128xbf16> to vector<128x128xbf16>
    %45 = arith.extf %44 : vector<128x128xbf16> to vector<128x128xf32>
    %cst_23 = arith.constant dense<0.000000e+00> : vector<128x128xf32>
    %46 = tpu.matmul %45, %33, %cst_23 {dimension_numbers = #tpu.dot_dimension_numbers<[1], [0], [0], [1], [0, 0, 1, 1], [], []>} : vector<128x128xf32>, vector<128x128xf32>, vector<128x128xf32> -> vector<128x128xf32>
    %c1_24 = arith.constant 1 : index
    %c0_25 = arith.constant 0 : index
    %c0_26 = arith.constant 0 : index
    %47 = vector.load %arg3[%c1_24, %c0_25, %c0_26] : memref<9x128x128xf32, #tpu.memory_space<vmem>>, vector<1x128x128xf32>
    %48 = vector.shape_cast %47 : vector<1x128x128xf32> to vector<128x128xf32>
    %cst_27 = arith.constant dense<0.000000e+00> : vector<128x128xf32>
    %49 = tpu.matmul %46, %48, %cst_27 {dimension_numbers = #tpu.dot_dimension_numbers<[1], [0], [0], [1], [0, 0, 1, 1], [], []>} : vector<128x128xf32>, vector<128x128xf32>, vector<128x128xf32> -> vector<128x128xf32>
    %50 = arith.addf %42, %49 : vector<128x128xf32>
    %c2 = arith.constant 2 : index
    %c0_28 = arith.constant 0 : index
    %c0_29 = arith.constant 0 : index
    %51 = vector.load %arg2[%c2, %c0_28, %c0_29] : memref<9x128x128xbf16, #tpu.memory_space<vmem>>, vector<1x128x128xbf16>
    %52 = vector.shape_cast %51 : vector<1x128x128xbf16> to vector<128x128xbf16>
    %53 = arith.extf %52 : vector<128x128xbf16> to vector<128x128xf32>
    %cst_30 = arith.constant dense<0.000000e+00> : vector<128x128xf32>
    %54 = tpu.matmul %53, %33, %cst_30 {dimension_numbers = #tpu.dot_dimension_numbers<[1], [0], [0], [1], [0, 0, 1, 1], [], []>} : vector<128x128xf32>, vector<128x128xf32>, vector<128x128xf32> -> vector<128x128xf32>
    %c2_31 = arith.constant 2 : index
    %c0_32 = arith.constant 0 : index
    %c0_33 = arith.constant 0 : index
    %55 = vector.load %arg3[%c2_31, %c0_32, %c0_33] : memref<9x128x128xf32, #tpu.memory_space<vmem>>, vector<1x128x128xf32>
    %56 = vector.shape_cast %55 : vector<1x128x128xf32> to vector<128x128xf32>
    %cst_34 = arith.constant dense<0.000000e+00> : vector<128x128xf32>
    %57 = tpu.matmul %54, %56, %cst_34 {dimension_numbers = #tpu.dot_dimension_numbers<[1], [0], [0], [1], [0, 0, 1, 1], [], []>} : vector<128x128xf32>, vector<128x128xf32>, vector<128x128xf32> -> vector<128x128xf32>
    %58 = arith.addf %50, %57 : vector<128x128xf32>
    %c3 = arith.constant 3 : index
    %c0_35 = arith.constant 0 : index
    %c0_36 = arith.constant 0 : index
    %59 = vector.load %arg2[%c3, %c0_35, %c0_36] : memref<9x128x128xbf16, #tpu.memory_space<vmem>>, vector<1x128x128xbf16>
    %60 = vector.shape_cast %59 : vector<1x128x128xbf16> to vector<128x128xbf16>
    %61 = arith.extf %60 : vector<128x128xbf16> to vector<128x128xf32>
    %cst_37 = arith.constant dense<0.000000e+00> : vector<128x128xf32>
    %62 = tpu.matmul %61, %33, %cst_37 {dimension_numbers = #tpu.dot_dimension_numbers<[1], [0], [0], [1], [0, 0, 1, 1], [], []>} : vector<128x128xf32>, vector<128x128xf32>, vector<128x128xf32> -> vector<128x128xf32>
    %c3_38 = arith.constant 3 : index
    %c0_39 = arith.constant 0 : index
    %c0_40 = arith.constant 0 : index
    %63 = vector.load %arg3[%c3_38, %c0_39, %c0_40] : memref<9x128x128xf32, #tpu.memory_space<vmem>>, vector<1x128x128xf32>
    %64 = vector.shape_cast %63 : vector<1x128x128xf32> to vector<128x128xf32>
    %cst_41 = arith.constant dense<0.000000e+00> : vector<128x128xf32>
    %65 = tpu.matmul %62, %64, %cst_41 {dimension_numbers = #tpu.dot_dimension_numbers<[1], [0], [0], [1], [0, 0, 1, 1], [], []>} : vector<128x128xf32>, vector<128x128xf32>, vector<128x128xf32> -> vector<128x128xf32>
    %66 = arith.addf %58, %65 : vector<128x128xf32>
    %c4 = arith.constant 4 : index
    %c0_42 = arith.constant 0 : index
    %c0_43 = arith.constant 0 : index
    %67 = vector.load %arg2[%c4, %c0_42, %c0_43] : memref<9x128x128xbf16, #tpu.memory_space<vmem>>, vector<1x128x128xbf16>
    %68 = vector.shape_cast %67 : vector<1x128x128xbf16> to vector<128x128xbf16>
    %69 = arith.extf %68 : vector<128x128xbf16> to vector<128x128xf32>
    %cst_44 = arith.constant dense<0.000000e+00> : vector<128x128xf32>
    %70 = tpu.matmul %69, %33, %cst_44 {dimension_numbers = #tpu.dot_dimension_numbers<[1], [0], [0], [1], [0, 0, 1, 1], [], []>} : vector<128x128xf32>, vector<128x128xf32>, vector<128x128xf32> -> vector<128x128xf32>
    %c4_45 = arith.constant 4 : index
    %c0_46 = arith.constant 0 : index
    %c0_47 = arith.constant 0 : index
    %71 = vector.load %arg3[%c4_45, %c0_46, %c0_47] : memref<9x128x128xf32, #tpu.memory_space<vmem>>, vector<1x128x128xf32>
    %72 = vector.shape_cast %71 : vector<1x128x128xf32> to vector<128x128xf32>
    %cst_48 = arith.constant dense<0.000000e+00> : vector<128x128xf32>
    %73 = tpu.matmul %70, %72, %cst_48 {dimension_numbers = #tpu.dot_dimension_numbers<[1], [0], [0], [1], [0, 0, 1, 1], [], []>} : vector<128x128xf32>, vector<128x128xf32>, vector<128x128xf32> -> vector<128x128xf32>
    %74 = arith.addf %66, %73 : vector<128x128xf32>
    %c5 = arith.constant 5 : index
    %c0_49 = arith.constant 0 : index
    %c0_50 = arith.constant 0 : index
    %75 = vector.load %arg2[%c5, %c0_49, %c0_50] : memref<9x128x128xbf16, #tpu.memory_space<vmem>>, vector<1x128x128xbf16>
    %76 = vector.shape_cast %75 : vector<1x128x128xbf16> to vector<128x128xbf16>
    %77 = arith.extf %76 : vector<128x128xbf16> to vector<128x128xf32>
    %cst_51 = arith.constant dense<0.000000e+00> : vector<128x128xf32>
    %78 = tpu.matmul %77, %33, %cst_51 {dimension_numbers = #tpu.dot_dimension_numbers<[1], [0], [0], [1], [0, 0, 1, 1], [], []>} : vector<128x128xf32>, vector<128x128xf32>, vector<128x128xf32> -> vector<128x128xf32>
    %c5_52 = arith.constant 5 : index
    %c0_53 = arith.constant 0 : index
    %c0_54 = arith.constant 0 : index
    %79 = vector.load %arg3[%c5_52, %c0_53, %c0_54] : memref<9x128x128xf32, #tpu.memory_space<vmem>>, vector<1x128x128xf32>
    %80 = vector.shape_cast %79 : vector<1x128x128xf32> to vector<128x128xf32>
    %cst_55 = arith.constant dense<0.000000e+00> : vector<128x128xf32>
    %81 = tpu.matmul %78, %80, %cst_55 {dimension_numbers = #tpu.dot_dimension_numbers<[1], [0], [0], [1], [0, 0, 1, 1], [], []>} : vector<128x128xf32>, vector<128x128xf32>, vector<128x128xf32> -> vector<128x128xf32>
    %82 = arith.addf %74, %81 : vector<128x128xf32>
    %c6 = arith.constant 6 : index
    %c0_56 = arith.constant 0 : index
    %c0_57 = arith.constant 0 : index
    %83 = vector.load %arg2[%c6, %c0_56, %c0_57] : memref<9x128x128xbf16, #tpu.memory_space<vmem>>, vector<1x128x128xbf16>
    %84 = vector.shape_cast %83 : vector<1x128x128xbf16> to vector<128x128xbf16>
    %85 = arith.extf %84 : vector<128x128xbf16> to vector<128x128xf32>
    %cst_58 = arith.constant dense<0.000000e+00> : vector<128x128xf32>
    %86 = tpu.matmul %85, %33, %cst_58 {dimension_numbers = #tpu.dot_dimension_numbers<[1], [0], [0], [1], [0, 0, 1, 1], [], []>} : vector<128x128xf32>, vector<128x128xf32>, vector<128x128xf32> -> vector<128x128xf32>
    %c6_59 = arith.constant 6 : index
    %c0_60 = arith.constant 0 : index
    %c0_61 = arith.constant 0 : index
    %87 = vector.load %arg3[%c6_59, %c0_60, %c0_61] : memref<9x128x128xf32, #tpu.memory_space<vmem>>, vector<1x128x128xf32>
    %88 = vector.shape_cast %87 : vector<1x128x128xf32> to vector<128x128xf32>
    %cst_62 = arith.constant dense<0.000000e+00> : vector<128x128xf32>
    %89 = tpu.matmul %86, %88, %cst_62 {dimension_numbers = #tpu.dot_dimension_numbers<[1], [0], [0], [1], [0, 0, 1, 1], [], []>} : vector<128x128xf32>, vector<128x128xf32>, vector<128x128xf32> -> vector<128x128xf32>
    %90 = arith.addf %82, %89 : vector<128x128xf32>
    %c7 = arith.constant 7 : index
    %c0_63 = arith.constant 0 : index
    %c0_64 = arith.constant 0 : index
    %91 = vector.load %arg2[%c7, %c0_63, %c0_64] : memref<9x128x128xbf16, #tpu.memory_space<vmem>>, vector<1x128x128xbf16>
    %92 = vector.shape_cast %91 : vector<1x128x128xbf16> to vector<128x128xbf16>
    %93 = arith.extf %92 : vector<128x128xbf16> to vector<128x128xf32>
    %cst_65 = arith.constant dense<0.000000e+00> : vector<128x128xf32>
    %94 = tpu.matmul %93, %33, %cst_65 {dimension_numbers = #tpu.dot_dimension_numbers<[1], [0], [0], [1], [0, 0, 1, 1], [], []>} : vector<128x128xf32>, vector<128x128xf32>, vector<128x128xf32> -> vector<128x128xf32>
    %c7_66 = arith.constant 7 : index
    %c0_67 = arith.constant 0 : index
    %c0_68 = arith.constant 0 : index
    %95 = vector.load %arg3[%c7_66, %c0_67, %c0_68] : memref<9x128x128xf32, #tpu.memory_space<vmem>>, vector<1x128x128xf32>
    %96 = vector.shape_cast %95 : vector<1x128x128xf32> to vector<128x128xf32>
    %cst_69 = arith.constant dense<0.000000e+00> : vector<128x128xf32>
    %97 = tpu.matmul %94, %96, %cst_69 {dimension_numbers = #tpu.dot_dimension_numbers<[1], [0], [0], [1], [0, 0, 1, 1], [], []>} : vector<128x128xf32>, vector<128x128xf32>, vector<128x128xf32> -> vector<128x128xf32>
    %98 = arith.addf %90, %97 : vector<128x128xf32>
    %c8 = arith.constant 8 : index
    %c0_70 = arith.constant 0 : index
    %c0_71 = arith.constant 0 : index
    %99 = vector.load %arg2[%c8, %c0_70, %c0_71] : memref<9x128x128xbf16, #tpu.memory_space<vmem>>, vector<1x128x128xbf16>
    %100 = vector.shape_cast %99 : vector<1x128x128xbf16> to vector<128x128xbf16>
    %101 = arith.extf %100 : vector<128x128xbf16> to vector<128x128xf32>
    %cst_72 = arith.constant dense<0.000000e+00> : vector<128x128xf32>
    %102 = tpu.matmul %101, %33, %cst_72 {dimension_numbers = #tpu.dot_dimension_numbers<[1], [0], [0], [1], [0, 0, 1, 1], [], []>} : vector<128x128xf32>, vector<128x128xf32>, vector<128x128xf32> -> vector<128x128xf32>
    %c8_73 = arith.constant 8 : index
    %c0_74 = arith.constant 0 : index
    %c0_75 = arith.constant 0 : index
    %103 = vector.load %arg3[%c8_73, %c0_74, %c0_75] : memref<9x128x128xf32, #tpu.memory_space<vmem>>, vector<1x128x128xf32>
    %104 = vector.shape_cast %103 : vector<1x128x128xf32> to vector<128x128xf32>
    %cst_76 = arith.constant dense<0.000000e+00> : vector<128x128xf32>
    %105 = tpu.matmul %102, %104, %cst_76 {dimension_numbers = #tpu.dot_dimension_numbers<[1], [0], [0], [1], [0, 0, 1, 1], [], []>} : vector<128x128xf32>, vector<128x128xf32>, vector<128x128xf32> -> vector<128x128xf32>
    %106 = arith.addf %98, %105 : vector<128x128xf32>
    %cst_77 = arith.constant dense<0.000000e+00> : vector<128xf32>
    %107 = vector.multi_reduction <add>, %106, %cst_77 [0] : vector<128x128xf32> to vector<128xf32>
    %108 = vector.shape_cast %107 : vector<128xf32> to vector<1x128xf32>
    %cst_78 = arith.constant 0.055555556 : f32
    %109 = vector.broadcast %cst_78 : f32 to vector<1x128xf32>
    %110 = arith.mulf %108, %109 : vector<1x128xf32>
    %111 = arith.mulf %106, %106 : vector<128x128xf32>
    %cst_79 = arith.constant dense<0.000000e+00> : vector<128xf32>
    %112 = vector.multi_reduction <add>, %111, %cst_79 [0] : vector<128x128xf32> to vector<128xf32>
    %113 = vector.shape_cast %112 : vector<128xf32> to vector<1x128xf32>
    %cst_80 = arith.constant 0.055555556 : f32
    %114 = vector.broadcast %cst_80 : f32 to vector<1x128xf32>
    %115 = arith.mulf %113, %114 : vector<1x128xf32>
    %116 = arith.mulf %110, %110 : vector<1x128xf32>
    %117 = arith.subf %115, %116 : vector<1x128xf32>
    %cst_81 = arith.constant 0.000000e+00 : f32
    %118 = vector.broadcast %cst_81 : f32 to vector<1x128xf32>
    %119 = arith.maximumf %117, %118 : vector<1x128xf32>
    %cst_82 = arith.constant 9.99999974E-6 : f32
    %120 = vector.broadcast %cst_82 : f32 to vector<1x128xf32>
    %121 = arith.addf %119, %120 : vector<1x128xf32>
    %122 = math.rsqrt %121 : vector<1x128xf32>
    %123 = arith.mulf %3, %122 : vector<1x128xf32>
    %124 = arith.mulf %110, %123 : vector<1x128xf32>
    %125 = arith.subf %4, %124 : vector<1x128xf32>
    %126 = vector.broadcast %123 : vector<1x128xf32> to vector<128x128xf32>
    %127 = arith.mulf %106, %126 : vector<128x128xf32>
    %128 = vector.broadcast %125 : vector<1x128xf32> to vector<128x128xf32>
    %129 = arith.addf %127, %128 : vector<128x128xf32>
    %cst_83 = arith.constant 0.000000e+00 : f32
    %130 = vector.broadcast %cst_83 : f32 to vector<128x128xf32>
    %131 = arith.maximumf %129, %130 : vector<128x128xf32>
    %cst_84 = arith.constant 0.000000e+00 : f32
    %132 = vector.broadcast %cst_84 : f32 to vector<8x128xf32>
    %c0_85 = arith.constant 0 : index
    %c0_86 = arith.constant 0 : index
    %c0_87 = arith.constant 0 : index
    %133 = vector.load %arg4[%c0_85, %c0_86, %c0_87] : memref<9x8x128xf32, #tpu.memory_space<vmem>>, vector<1x8x128xf32>
    %134 = vector.shape_cast %133 : vector<1x8x128xf32> to vector<8x128xf32>
    %cst_88 = arith.constant dense<0.000000e+00> : vector<8x128xf32>
    %135 = tpu.matmul %134, %131, %cst_88 {dimension_numbers = #tpu.dot_dimension_numbers<[1], [0], [0], [1], [0, 0, 1, 1], [], []>} : vector<8x128xf32>, vector<128x128xf32>, vector<8x128xf32> -> vector<8x128xf32>
    %c0_89 = arith.constant 0 : index
    %c0_90 = arith.constant 0 : index
    %c0_91 = arith.constant 0 : index
    %136 = vector.load %arg5[%c0_89, %c0_90, %c0_91] : memref<9x128x128xf32, #tpu.memory_space<vmem>>, vector<1x128x128xf32>
    %137 = vector.shape_cast %136 : vector<1x128x128xf32> to vector<128x128xf32>
    %cst_92 = arith.constant dense<0.000000e+00> : vector<8x128xf32>
    %138 = tpu.matmul %135, %137, %cst_92 {dimension_numbers = #tpu.dot_dimension_numbers<[1], [0], [0], [1], [0, 0, 1, 1], [], []>} : vector<8x128xf32>, vector<128x128xf32>, vector<8x128xf32> -> vector<8x128xf32>
    %139 = arith.addf %132, %138 : vector<8x128xf32>
    %c1_93 = arith.constant 1 : index
    %c0_94 = arith.constant 0 : index
    %c0_95 = arith.constant 0 : index
    %140 = vector.load %arg4[%c1_93, %c0_94, %c0_95] : memref<9x8x128xf32, #tpu.memory_space<vmem>>, vector<1x8x128xf32>
    %141 = vector.shape_cast %140 : vector<1x8x128xf32> to vector<8x128xf32>
    %cst_96 = arith.constant dense<0.000000e+00> : vector<8x128xf32>
    %142 = tpu.matmul %141, %131, %cst_96 {dimension_numbers = #tpu.dot_dimension_numbers<[1], [0], [0], [1], [0, 0, 1, 1], [], []>} : vector<8x128xf32>, vector<128x128xf32>, vector<8x128xf32> -> vector<8x128xf32>
    %c1_97 = arith.constant 1 : index
    %c0_98 = arith.constant 0 : index
    %c0_99 = arith.constant 0 : index
    %143 = vector.load %arg5[%c1_97, %c0_98, %c0_99] : memref<9x128x128xf32, #tpu.memory_space<vmem>>, vector<1x128x128xf32>
    %144 = vector.shape_cast %143 : vector<1x128x128xf32> to vector<128x128xf32>
    %cst_100 = arith.constant dense<0.000000e+00> : vector<8x128xf32>
    %145 = tpu.matmul %142, %144, %cst_100 {dimension_numbers = #tpu.dot_dimension_numbers<[1], [0], [0], [1], [0, 0, 1, 1], [], []>} : vector<8x128xf32>, vector<128x128xf32>, vector<8x128xf32> -> vector<8x128xf32>
    %146 = arith.addf %139, %145 : vector<8x128xf32>
    %c2_101 = arith.constant 2 : index
    %c0_102 = arith.constant 0 : index
    %c0_103 = arith.constant 0 : index
    %147 = vector.load %arg4[%c2_101, %c0_102, %c0_103] : memref<9x8x128xf32, #tpu.memory_space<vmem>>, vector<1x8x128xf32>
    %148 = vector.shape_cast %147 : vector<1x8x128xf32> to vector<8x128xf32>
    %cst_104 = arith.constant dense<0.000000e+00> : vector<8x128xf32>
    %149 = tpu.matmul %148, %131, %cst_104 {dimension_numbers = #tpu.dot_dimension_numbers<[1], [0], [0], [1], [0, 0, 1, 1], [], []>} : vector<8x128xf32>, vector<128x128xf32>, vector<8x128xf32> -> vector<8x128xf32>
    %c2_105 = arith.constant 2 : index
    %c0_106 = arith.constant 0 : index
    %c0_107 = arith.constant 0 : index
    %150 = vector.load %arg5[%c2_105, %c0_106, %c0_107] : memref<9x128x128xf32, #tpu.memory_space<vmem>>, vector<1x128x128xf32>
    %151 = vector.shape_cast %150 : vector<1x128x128xf32> to vector<128x128xf32>
    %cst_108 = arith.constant dense<0.000000e+00> : vector<8x128xf32>
    %152 = tpu.matmul %149, %151, %cst_108 {dimension_numbers = #tpu.dot_dimension_numbers<[1], [0], [0], [1], [0, 0, 1, 1], [], []>} : vector<8x128xf32>, vector<128x128xf32>, vector<8x128xf32> -> vector<8x128xf32>
    %153 = arith.addf %146, %152 : vector<8x128xf32>
    %c3_109 = arith.constant 3 : index
    %c0_110 = arith.constant 0 : index
    %c0_111 = arith.constant 0 : index
    %154 = vector.load %arg4[%c3_109, %c0_110, %c0_111] : memref<9x8x128xf32, #tpu.memory_space<vmem>>, vector<1x8x128xf32>
    %155 = vector.shape_cast %154 : vector<1x8x128xf32> to vector<8x128xf32>
    %cst_112 = arith.constant dense<0.000000e+00> : vector<8x128xf32>
    %156 = tpu.matmul %155, %131, %cst_112 {dimension_numbers = #tpu.dot_dimension_numbers<[1], [0], [0], [1], [0, 0, 1, 1], [], []>} : vector<8x128xf32>, vector<128x128xf32>, vector<8x128xf32> -> vector<8x128xf32>
    %c3_113 = arith.constant 3 : index
    %c0_114 = arith.constant 0 : index
    %c0_115 = arith.constant 0 : index
    %157 = vector.load %arg5[%c3_113, %c0_114, %c0_115] : memref<9x128x128xf32, #tpu.memory_space<vmem>>, vector<1x128x128xf32>
    %158 = vector.shape_cast %157 : vector<1x128x128xf32> to vector<128x128xf32>
    %cst_116 = arith.constant dense<0.000000e+00> : vector<8x128xf32>
    %159 = tpu.matmul %156, %158, %cst_116 {dimension_numbers = #tpu.dot_dimension_numbers<[1], [0], [0], [1], [0, 0, 1, 1], [], []>} : vector<8x128xf32>, vector<128x128xf32>, vector<8x128xf32> -> vector<8x128xf32>
    %160 = arith.addf %153, %159 : vector<8x128xf32>
    %c4_117 = arith.constant 4 : index
    %c0_118 = arith.constant 0 : index
    %c0_119 = arith.constant 0 : index
    %161 = vector.load %arg4[%c4_117, %c0_118, %c0_119] : memref<9x8x128xf32, #tpu.memory_space<vmem>>, vector<1x8x128xf32>
    %162 = vector.shape_cast %161 : vector<1x8x128xf32> to vector<8x128xf32>
    %cst_120 = arith.constant dense<0.000000e+00> : vector<8x128xf32>
    %163 = tpu.matmul %162, %131, %cst_120 {dimension_numbers = #tpu.dot_dimension_numbers<[1], [0], [0], [1], [0, 0, 1, 1], [], []>} : vector<8x128xf32>, vector<128x128xf32>, vector<8x128xf32> -> vector<8x128xf32>
    %c4_121 = arith.constant 4 : index
    %c0_122 = arith.constant 0 : index
    %c0_123 = arith.constant 0 : index
    %164 = vector.load %arg5[%c4_121, %c0_122, %c0_123] : memref<9x128x128xf32, #tpu.memory_space<vmem>>, vector<1x128x128xf32>
    %165 = vector.shape_cast %164 : vector<1x128x128xf32> to vector<128x128xf32>
    %cst_124 = arith.constant dense<0.000000e+00> : vector<8x128xf32>
    %166 = tpu.matmul %163, %165, %cst_124 {dimension_numbers = #tpu.dot_dimension_numbers<[1], [0], [0], [1], [0, 0, 1, 1], [], []>} : vector<8x128xf32>, vector<128x128xf32>, vector<8x128xf32> -> vector<8x128xf32>
    %167 = arith.addf %160, %166 : vector<8x128xf32>
    %c5_125 = arith.constant 5 : index
    %c0_126 = arith.constant 0 : index
    %c0_127 = arith.constant 0 : index
    %168 = vector.load %arg4[%c5_125, %c0_126, %c0_127] : memref<9x8x128xf32, #tpu.memory_space<vmem>>, vector<1x8x128xf32>
    %169 = vector.shape_cast %168 : vector<1x8x128xf32> to vector<8x128xf32>
    %cst_128 = arith.constant dense<0.000000e+00> : vector<8x128xf32>
    %170 = tpu.matmul %169, %131, %cst_128 {dimension_numbers = #tpu.dot_dimension_numbers<[1], [0], [0], [1], [0, 0, 1, 1], [], []>} : vector<8x128xf32>, vector<128x128xf32>, vector<8x128xf32> -> vector<8x128xf32>
    %c5_129 = arith.constant 5 : index
    %c0_130 = arith.constant 0 : index
    %c0_131 = arith.constant 0 : index
    %171 = vector.load %arg5[%c5_129, %c0_130, %c0_131] : memref<9x128x128xf32, #tpu.memory_space<vmem>>, vector<1x128x128xf32>
    %172 = vector.shape_cast %171 : vector<1x128x128xf32> to vector<128x128xf32>
    %cst_132 = arith.constant dense<0.000000e+00> : vector<8x128xf32>
    %173 = tpu.matmul %170, %172, %cst_132 {dimension_numbers = #tpu.dot_dimension_numbers<[1], [0], [0], [1], [0, 0, 1, 1], [], []>} : vector<8x128xf32>, vector<128x128xf32>, vector<8x128xf32> -> vector<8x128xf32>
    %174 = arith.addf %167, %173 : vector<8x128xf32>
    %c6_133 = arith.constant 6 : index
    %c0_134 = arith.constant 0 : index
    %c0_135 = arith.constant 0 : index
    %175 = vector.load %arg4[%c6_133, %c0_134, %c0_135] : memref<9x8x128xf32, #tpu.memory_space<vmem>>, vector<1x8x128xf32>
    %176 = vector.shape_cast %175 : vector<1x8x128xf32> to vector<8x128xf32>
    %cst_136 = arith.constant dense<0.000000e+00> : vector<8x128xf32>
    %177 = tpu.matmul %176, %131, %cst_136 {dimension_numbers = #tpu.dot_dimension_numbers<[1], [0], [0], [1], [0, 0, 1, 1], [], []>} : vector<8x128xf32>, vector<128x128xf32>, vector<8x128xf32> -> vector<8x128xf32>
    %c6_137 = arith.constant 6 : index
    %c0_138 = arith.constant 0 : index
    %c0_139 = arith.constant 0 : index
    %178 = vector.load %arg5[%c6_137, %c0_138, %c0_139] : memref<9x128x128xf32, #tpu.memory_space<vmem>>, vector<1x128x128xf32>
    %179 = vector.shape_cast %178 : vector<1x128x128xf32> to vector<128x128xf32>
    %cst_140 = arith.constant dense<0.000000e+00> : vector<8x128xf32>
    %180 = tpu.matmul %177, %179, %cst_140 {dimension_numbers = #tpu.dot_dimension_numbers<[1], [0], [0], [1], [0, 0, 1, 1], [], []>} : vector<8x128xf32>, vector<128x128xf32>, vector<8x128xf32> -> vector<8x128xf32>
    %181 = arith.addf %174, %180 : vector<8x128xf32>
    %c7_141 = arith.constant 7 : index
    %c0_142 = arith.constant 0 : index
    %c0_143 = arith.constant 0 : index
    %182 = vector.load %arg4[%c7_141, %c0_142, %c0_143] : memref<9x8x128xf32, #tpu.memory_space<vmem>>, vector<1x8x128xf32>
    %183 = vector.shape_cast %182 : vector<1x8x128xf32> to vector<8x128xf32>
    %cst_144 = arith.constant dense<0.000000e+00> : vector<8x128xf32>
    %184 = tpu.matmul %183, %131, %cst_144 {dimension_numbers = #tpu.dot_dimension_numbers<[1], [0], [0], [1], [0, 0, 1, 1], [], []>} : vector<8x128xf32>, vector<128x128xf32>, vector<8x128xf32> -> vector<8x128xf32>
    %c7_145 = arith.constant 7 : index
    %c0_146 = arith.constant 0 : index
    %c0_147 = arith.constant 0 : index
    %185 = vector.load %arg5[%c7_145, %c0_146, %c0_147] : memref<9x128x128xf32, #tpu.memory_space<vmem>>, vector<1x128x128xf32>
    %186 = vector.shape_cast %185 : vector<1x128x128xf32> to vector<128x128xf32>
    %cst_148 = arith.constant dense<0.000000e+00> : vector<8x128xf32>
    %187 = tpu.matmul %184, %186, %cst_148 {dimension_numbers = #tpu.dot_dimension_numbers<[1], [0], [0], [1], [0, 0, 1, 1], [], []>} : vector<8x128xf32>, vector<128x128xf32>, vector<8x128xf32> -> vector<8x128xf32>
    %188 = arith.addf %181, %187 : vector<8x128xf32>
    %c8_149 = arith.constant 8 : index
    %c0_150 = arith.constant 0 : index
    %c0_151 = arith.constant 0 : index
    %189 = vector.load %arg4[%c8_149, %c0_150, %c0_151] : memref<9x8x128xf32, #tpu.memory_space<vmem>>, vector<1x8x128xf32>
    %190 = vector.shape_cast %189 : vector<1x8x128xf32> to vector<8x128xf32>
    %cst_152 = arith.constant dense<0.000000e+00> : vector<8x128xf32>
    %191 = tpu.matmul %190, %131, %cst_152 {dimension_numbers = #tpu.dot_dimension_numbers<[1], [0], [0], [1], [0, 0, 1, 1], [], []>} : vector<8x128xf32>, vector<128x128xf32>, vector<8x128xf32> -> vector<8x128xf32>
    %c8_153 = arith.constant 8 : index
    %c0_154 = arith.constant 0 : index
    %c0_155 = arith.constant 0 : index
    %192 = vector.load %arg5[%c8_153, %c0_154, %c0_155] : memref<9x128x128xf32, #tpu.memory_space<vmem>>, vector<1x128x128xf32>
    %193 = vector.shape_cast %192 : vector<1x128x128xf32> to vector<128x128xf32>
    %cst_156 = arith.constant dense<0.000000e+00> : vector<8x128xf32>
    %194 = tpu.matmul %191, %193, %cst_156 {dimension_numbers = #tpu.dot_dimension_numbers<[1], [0], [0], [1], [0, 0, 1, 1], [], []>} : vector<8x128xf32>, vector<128x128xf32>, vector<8x128xf32> -> vector<8x128xf32>
    %195 = arith.addf %188, %194 : vector<8x128xf32>
    %196 = vector.broadcast %5 : vector<1x128xf32> to vector<8x128xf32>
    %197 = arith.addf %195, %196 : vector<8x128xf32>
    %c0_157 = arith.constant 0 : index
    %c0_158 = arith.constant 0 : index
    %198 = vector.load %arg7[%c0_157, %c0_158] : memref<8x128xf32, #tpu.memory_space<vmem>>, vector<8x128xf32>
    tpu.vector_store %arg7[%c0_157, %c0_158], %197 {strides = array<i32>} : memref<8x128xf32, #tpu.memory_space<vmem>>, vector<8x128xf32>,
    return
  }
}

</mosaic_0001>

<bundles_post_ra>
// kernel: conv_forward.1
= control target key start
LH: loop header
LB: loop body
LE: loop exit
PB: predicated region body
PF: predicated region fallthrough
CT: control target
= control target key end

     0   :  { %vm9611_vm0 = vmmov 0   ;;  %s11801_s1 = inlined_call_operand.vmem [shape: f32[128,128], index: 1, kind: input, shape index: {}]   ;;  %s11802_s0 = inlined_call_operand.vmem [shape: f32[128,128], index: 0, kind: input, shape index: {}]   ;;  %s11803_s2 = inlined_call_operand.vmem [shape: bf16[9,128,128], index: 2, kind: input, shape index: {}]   ;;  %s11804_s6 = inlined_call_operand.vmem [shape: f32[8,128], index: 6, kind: input, shape index: {}]   ;;  %s11805_s3 = inlined_call_operand.vmem [shape: f32[9,128,128], index: 3, kind: input, shape index: {}]   ;;  %s11806_s4 = inlined_call_operand.vmem [shape: f32[9,8,128], index: 4, kind: input, shape index: {}]   ;;  %s11807_s5 = inlined_call_operand.vmem [shape: f32[9,128,128], index: 5, kind: input, shape index: {}]   ;;  %s11808_s7 = inlined_call_operand.vmem [shape: f32[8,128], index: 7, kind: output, shape index: {}]  }
   0x1   :  { %v43_v0 = vld [vmem:[%s11801_s1] sm:$0xff]  ;;  %v44_v1 = vld [vmem:[%s11801_s1 + $0x8] sm:$0xff]  ;;  %v45_v2 = vld [vmem:[%s11801_s1 + $0x10] sm:$0xff] }
   0x2   :  { %v8433_v3 = vpack.c.bf16 %v44_v1, %v43_v0  ;;  %v46_v4 = vld [vmem:[%s11801_s1 + $0x18] sm:$0xff]  ;;  %v47_v6 = vld [vmem:[%s11801_s1 + $0x20] sm:$0xff]  ;;  %v48_v7 = vld [vmem:[%s11801_s1 + $0x28] sm:$0xff] }
   0x3   :  { %v8437_v5 = vpack.c.bf16 %v46_v4, %v45_v2  ;;  %v8441_v8 = vpack.c.bf16 %v48_v7, %v47_v6  ;;  %v27_v9 = vld [vmem:[%s11802_s0] sm:$0xff]  ;;  %v49_v10 = vld [vmem:[%s11801_s1 + $0x30] sm:$0xff]  ;;  %v50_v11 = vld [vmem:[%s11801_s1 + $0x38] sm:$0xff] }
   0x4   :  { %8434 = vmatprep.subr.bf16.mxu0 %v8433_v3  ;;  %6771 = vmatprep.mubr.f32.mxu0 %v27_v9  ;;  %v8445_v12 = vpack.c.bf16 %v50_v11, %v49_v10  ;;  %v51_v13 = vld [vmem:[%s11801_s1 + $0x40] sm:$0xff]  ;;  %v52_v14 = vld [vmem:[%s11801_s1 + $0x48] sm:$0xff]  ;;  %v53_v16 = vld [vmem:[%s11801_s1 + $0x50] sm:$0xff] }
   0x5   :  { %8436 = vmatpush3.bf16.msra.mxu0 %v8433_v3  ;;  %v8449_v15 = vpack.c.bf16 %v52_v14, %v51_v13  ;;  %v54_v17 = vld [vmem:[%s11801_s1 + $0x58] sm:$0xff]  ;;  %v55_v19 = vld [vmem:[%s11801_s1 + $0x60] sm:$0xff]  ;;  %v56_v20 = vld [vmem:[%s11801_s1 + $0x68] sm:$0xff] }
   0x6   :  { %8438 = vmatprep.subr.bf16.mxu0 %v8437_v5  ;;  %v8453_v18 = vpack.c.bf16 %v54_v17, %v53_v16  ;;  %v8457_v21 = vpack.c.bf16 %v56_v20, %v55_v19  ;;  %v57_v22 = vld [vmem:[%s11801_s1 + $0x70] sm:$0xff]  ;;  %v58_v23 = vld [vmem:[%s11801_s1 + $0x78] sm:$0xff]  ;;  %v28_v25 = vld [vmem:[%s11802_s0 + $0x8] sm:$0xff] }
   0x7   :  { %v8461_v24 = vpack.c.bf16 %v58_v23, %v57_v22  ;;  %v29_v26 = vld [vmem:[%s11802_s0 + $0x10] sm:$0xff]  ;;  %v30_v27 = vld [vmem:[%s11802_s0 + $0x18] sm:$0xff]  ;;  %v31_v28 = vld [vmem:[%s11802_s0 + $0x20] sm:$0xff] }
   0x8   :  { %v32_v29 = vld [vmem:[%s11802_s0 + $0x28] sm:$0xff]  ;;  %v33_v30 = vld [vmem:[%s11802_s0 + $0x30] sm:$0xff]  ;;  %v34_v31 = vld [vmem:[%s11802_s0 + $0x38] sm:$0xff] }
   0x9   :  { %8440 = vmatpush3.bf16.msra.mxu0 %v8437_v5  ;;  %v35_v32 = vld [vmem:[%s11802_s0 + $0x40] sm:$0xff]  ;;  %v36_v33 = vld [vmem:[%s11802_s0 + $0x48] sm:$0xff]  ;;  %v37_v34 = vld [vmem:[%s11802_s0 + $0x50] sm:$0xff] }
   0xa   :  { %8442 = vmatprep.subr.bf16.mxu0 %v8441_v8  ;;  %v38_v35 = vld [vmem:[%s11802_s0 + $0x58] sm:$0xff]  ;;  %v39_v36 = vld [vmem:[%s11802_s0 + $0x60] sm:$0xff]  ;;  %v40_v37 = vld [vmem:[%s11802_s0 + $0x68] sm:$0xff] }
   0xb   :  { %v41_v38 = vld [vmem:[%s11802_s0 + $0x70] sm:$0xff]  ;;  %v42_v39 = vld [vmem:[%s11802_s0 + $0x78] sm:$0xff]  ;;  %v9752_v40 = vld [vmem:[%s11803_s2 + $0x40] sm:$0xff]  }
   0xc   :  { %v5500_v41 = vunpack.c.l.bf16 %v9752_v40 }
   0xd   :  { %8444 = vmatpush3.bf16.msra.mxu0 %v8441_v8 }
   0xe   :  { %8446 = vmatprep.subr.bf16.mxu0 %v8445_v12 }
  0x11   :  { %8448 = vmatpush3.bf16.msra.mxu0 %v8445_v12  ;;  %v9805_v12 = vld [vmem:[%s11803_s2] sm:$0xff]  }
  0x12   :  { %8450 = vmatprep.subr.bf16.mxu0 %v8449_v15  ;;  %v5468_v17 = vunpack.c.l.bf16 %v9805_v12 }
  0x14   :  { %6827 = vmatprep.mubr.f32.mxu1 %v5468_v17 }
  0x15   :  { %8452 = vmatpush3.bf16.msra.mxu0 %v8449_v15 }
  0x16   :  { %8454 = vmatprep.subr.bf16.mxu0 %v8453_v18 }
  0x19   :  { %8456 = vmatpush3.bf16.msra.mxu0 %v8453_v18 }
  0x1a   :  { %8458 = vmatprep.subr.bf16.mxu0 %v8457_v21 }
  0x1d   :  { %8460 = vmatpush3.bf16.msra.mxu0 %v8457_v21 }
  0x1e   :  { %8462 = vmatprep.subr.bf16.mxu0 %v8461_v24 }
  0x21   :  { %8464 = vmatpush3.bf16.msra.mxu0 %v8461_v24 }
  0x24   :  { %6772 = vmatmul.mubr.f32.vlgmr.msra.gmra.mrb[0].mxu0 %v28_v25 }
  0x25   :  { %6774 = vmatprep.mubr.f32.mxu0 %v29_v26 }
  0x28   :  { %6775 = vmatmul.mubr.f32.gmra.mrb[2].mxu0 %v30_v27 }
  0x29   :  { %6777 = vmatprep.mubr.f32.mxu0 %v31_v28 }
  0x2c   :  { %6778 = vmatmul.mubr.f32.gmra.mrb[4].mxu0 %v32_v29 }
  0x2d   :  { %6780 = vmatprep.mubr.f32.mxu0 %v33_v30 }
  0x30   :  { %6781 = vmatmul.mubr.f32.gmra.mrb[6].mxu0 %v34_v31 }
  0x31   :  { %6783 = vmatprep.mubr.f32.mxu0 %v35_v32 }
  0x34   :  { %6784 = vmatmul.mubr.f32.gmra.mrb[8].mxu0 %v36_v33 }
  0x35   :  { %6786 = vmatprep.mubr.f32.mxu0 %v37_v34 }
  0x38   :  { %6787 = vmatmul.mubr.f32.gmra.mrb[10].mxu0 %v38_v35 }
  0x39   :  { %6789 = vmatprep.mubr.f32.mxu0 %v39_v36 }
  0x3c   :  { %6790 = vmatmul.mubr.f32.gmra.mrb[12].mxu0 %v40_v37 }
  0x3d   :  { %6792 = vmatprep.mubr.f32.mxu0 %v41_v38 }
  0x40   :  { %6793 = vmatmul.mubr.f32.gmra.mrb[14].mxu0 %v42_v39 }
  0x41   :  { %6883 = vmatprep.mubr.f32.mxu0 %v5500_v41 }
  0xf7   :  { %v9755_v42 = vpop.f32.mrb[0].mxu0 }
  0xf8   :  { %v227_v43 = vmul.f32 %v9755_v42, %v9755_v42  ;;  %v9759_v44 = vpop.f32.mrb[1].mxu0 }
  0xf9   :  { %v204_v45 = vadd.f32 %v9755_v42, %v9759_v44  ;;  %v226_v46 = vmul.f32 %v9759_v44, %v9759_v44 }
  0xfb   :  { %v242_v47 = vadd.f32 %v227_v43, %v226_v46  ;;  %v9765_v48 = vpop.f32.mrb[2].mxu0 }
  0xfc   :  { %v9767_v49 = vpop.f32.mrb[3].mxu0  ;;  %v229_v52 = vmul.f32 %v9765_v48, %v9765_v48 }
  0xfd   :  { %v205_v50 = vadd.f32 %v204_v45, %v9767_v49  ;;  %v228_v51 = vmul.f32 %v9767_v49, %v9767_v49 }
  0xff   :  { %v243_v53 = vadd.f32 %v242_v47, %v228_v51  ;;  %v9774_v54 = vpop.f32.mrb[4].mxu0  ;;  %v206_v55 = vadd.f32 %v9765_v48, %v205_v50 }
 0x100   :  { %v9777_v56 = vpop.f32.mrb[5].mxu0  ;;  %v231_v60 = vmul.f32 %v9774_v54, %v9774_v54 }
 0x101   :  { %v207_v57 = vadd.f32 %v206_v55, %v9777_v56  ;;  %v230_v58 = vmul.f32 %v9777_v56, %v9777_v56  ;;  %v244_v59 = vadd.f32 %v243_v53, %v229_v52 }
 0x103   :  { %v245_v61 = vadd.f32 %v244_v59, %v230_v58  ;;  %v9784_v62 = vpop.f32.mrb[6].mxu0  ;;  %v208_v63 = vadd.f32 %v9774_v54, %v207_v57 }
 0x104   :  { %v9787_v0 = vpop.f32.mrb[7].mxu0  ;;  %v233_v4 = vmul.f32 %v9784_v62, %v9784_v62 }
 0x105   :  { %v209_v1 = vadd.f32 %v208_v63, %v9787_v0  ;;  %v232_v2 = vmul.f32 %v9787_v0, %v9787_v0  ;;  %v246_v3 = vadd.f32 %v245_v61, %v231_v60 }
 0x107   :  { %v247_v5 = vadd.f32 %v246_v3, %v232_v2  ;;  %v9794_v6 = vpop.f32.mrb[8].mxu0  ;;  %v210_v7 = vadd.f32 %v9784_v62, %v209_v1 }
 0x108   :  { %v9797_v8 = vpop.f32.mrb[9].mxu0  ;;  %v235_v13 = vmul.f32 %v9794_v6, %v9794_v6 }
 0x109   :  { %v211_v9 = vadd.f32 %v210_v7, %v9797_v8  ;;  %v234_v10 = vmul.f32 %v9797_v8, %v9797_v8  ;;  %v248_v11 = vadd.f32 %v247_v5, %v233_v4  ;;  %v275_v5 = vlaneseq }
 0x10b   :  { %v249_v14 = vadd.f32 %v248_v11, %v234_v10  ;;  %v9809_v15 = vpop.f32.mrb[10].mxu0  ;;  %v212_v16 = vadd.f32 %v9794_v6, %v211_v9  ;;  %v9821_v7 = vshrl.u32 %v275_v5, 7  ;;  %v26_v9 = vld [vmem:[%s11804_s6] sm:$0xff] }
 0x10c   :  { %v9813_v18 = vpop.f32.mrb[11].mxu0  ;;  %v237_v22 = vmul.f32 %v9809_v15, %v9809_v15 }
 0x10d   :  { %v213_v19 = vadd.f32 %v212_v16, %v9813_v18  ;;  %v236_v20 = vmul.f32 %v9813_v18, %v9813_v18  ;;  %v250_v21 = vadd.f32 %v249_v14, %v235_v13  ;;  %v277_v10 = vsub.s32 0, %v9821_v7 }
 0x10e   :  { %v297_v17 = vsub.s32 1, %v9821_v7 }
 0x10f   :  { %v251_v23 = vadd.f32 %v250_v21, %v236_v20  ;;  %v6791_v24 = vpop.f32.mrb[12].mxu0  ;;  %v214_v25 = vadd.f32 %v9809_v15, %v213_v19 }
 0x110   :  { %v185_v26 = vpop.f32.mrb[13].mxu0  ;;  %v239_v30 = vmul.f32 %v6791_v24, %v6791_v24 }
 0x111   :  { %v215_v27 = vadd.f32 %v214_v25, %v185_v26  ;;  %v238_v28 = vmul.f32 %v185_v26, %v185_v26  ;;  %v252_v29 = vadd.f32 %v251_v23, %v237_v22 }
 0x113   :  { %v253_v31 = vadd.f32 %v252_v29, %v238_v28  ;;  %v6794_v32 = vpop.f32.mrb[14].mxu0  ;;  %v216_v33 = vadd.f32 %v6791_v24, %v215_v27 }
 0x114   :  { %v195_v34 = vpop.f32.mrb[15].mxu0  ;;  %v241_v38 = vmul.f32 %v6794_v32, %v6794_v32 }
 0x115   :  { %v217_v35 = vadd.f32 %v216_v33, %v195_v34  ;;  %v240_v36 = vmul.f32 %v195_v34, %v195_v34  ;;  %v254_v37 = vadd.f32 %v253_v31, %v239_v30 }
 0x117   :  { %v218_v39 = vadd.f32 %v6794_v32, %v217_v35  ;;  %v255_v41 = vadd.f32 %v254_v37, %v240_v36 }
 0x119   :  { %v219_v43 = vrot.slane %v218_v39, 4  ;;  %v256_v45 = vadd.f32 %v255_v41, %v241_v38 }
 0x11b   :  { %v220_v46 = vadd.f32 %v219_v43, %v218_v39  ;;  %v257_v47 = vrot.slane %v256_v45, 4 }
 0x11d   :  { %v221_v50 = vrot.slane %v220_v46, 2  ;;  %v258_v51 = vadd.f32 %v257_v47, %v256_v45 }
 0x11f   :  { %v222_v52 = vadd.f32 %v221_v50, %v220_v46  ;;  %v259_v53 = vrot.slane %v258_v51, 2 }
 0x121   :  { %v223_v55 = vrot.slane %v222_v52, 1  ;;  %v260_v57 = vadd.f32 %v259_v53, %v258_v51 }
 0x123   :  { %v224_v58 = vadd.f32 %v223_v55, %v222_v52  ;;  %v261_v59 = vrot.slane %v260_v57, 1 }
 0x125   :  { %v225_v60 = vmul.f32 0.010204081, %v224_v58  ;;  %v262_v61 = vadd.f32 %v261_v59, %v260_v57 }
 0x127   :  { %v263_v63 = vmul.f32 0.010204081, %v262_v61  ;;  %v264_v1 = vmul.f32 %v225_v60, %v225_v60 }
 0x129   :  { %v265_v2 = vsub.f32 %v263_v63, %v264_v1 }
 0x12b   :  { %v266_v3 = vmax.f32 %v265_v2, 0.0 }
 0x12d   :  { %v267_v4 = vadd.f32 1e-05, %v266_v3 }
 0x12f   :  { %9604 = vrsqrt.f32 %v267_v4 }
 0x139   :  { %v9605_v11 = vpop.eup %9604 }
 0x13a   :  { %v269_v13 = vmul.f32 %v9605_v11, %v26_v9 }
 0x13c   :  { %v270_v14 = vmul.f32 %v269_v13, %v225_v60  ;;  %v278_v16 = vrot.slane %v269_v13, %v277_v10 }
 0x13e   :  { %v272_v19 = vrot.slane %v270_v14, 7  ;;  %v279_v20 = vmul.f32 %v278_v16, %v9759_v44  ;;  %v280_v21 = vmul.f32 %v9755_v42, %v278_v16  ;;  %v281_v22 = vmul.f32 %v278_v16, %v9767_v49 }
 0x13f   :  { %v282_v23 = vmul.f32 %v9765_v48, %v278_v16  ;;  %v283_v25 = vmul.f32 %v278_v16, %v9777_v56  ;;  %v284_v27 = vmul.f32 %v9774_v54, %v278_v16  ;;  %v285_v28 = vmul.f32 %v278_v16, %v9787_v0 }
 0x140   :  { %v274_v29 = vsub.f32 %v26_v9, %v272_v19  ;;  %v286_v30 = vmul.f32 %v9784_v62, %v278_v16  ;;  %v287_v31 = vmul.f32 %v278_v16, %v9797_v8  ;;  %v288_v33 = vmul.f32 %v9794_v6, %v278_v16 }
 0x141   :  { %v289_v44 = vmul.f32 %v278_v16, %v9813_v18  ;;  %v290_v42 = vmul.f32 %v9809_v15, %v278_v16  ;;  %v291_v49 = vmul.f32 %v278_v16, %v185_v26  ;;  %v292_v35 = vmul.f32 %v6791_v24, %v278_v16 }
 0x142   :  { %v293_v48 = vmul.f32 %v278_v16, %v195_v34  ;;  %v294_v36 = vmul.f32 %v6794_v32, %v278_v16  ;;  %v298_v56 = vrot.slane %v274_v29, %v297_v17  ;;  %v5762_v16 = vld [vmem:[%s11803_s2 + $0x48] sm:$0xff]   ;;  %v5501_v19 = vunpack.c.h.bf16 %v9752_v40 }
 0x143   :  { %v5754_v17 = vld [vmem:[%s11803_s2 + $0x8] sm:$0xff]   ;;  %v5505_v40 = vunpack.c.h.bf16 %v5762_v16 }
 0x144   :  { %v299_v37 = vadd.f32 %v298_v56, %v279_v20  ;;  %v300_v54 = vadd.f32 %v298_v56, %v280_v21  ;;  %v301_v38 = vadd.f32 %v298_v56, %v281_v22  ;;  %v302_v0 = vadd.f32 %v298_v56, %v282_v23  ;;  %v5763_v22 = vld [vmem:[%s11803_s2 + $0x50] sm:$0xff]  }
 0x145   :  { %v303_v39 = vadd.f32 %v298_v56, %v283_v25  ;;  %v304_v41 = vadd.f32 %v298_v56, %v284_v27  ;;  %v305_v62 = vadd.f32 %v298_v56, %v285_v28  ;;  %v306_v43 = vadd.f32 %v298_v56, %v286_v30  ;;  %v5755_v25 = vld [vmem:[%s11803_s2 + $0x10] sm:$0xff]   ;;  %v5764_v28 = vld [vmem:[%s11803_s2 + $0x58] sm:$0xff]  }
 0x146   :  { %v307_v8 = vadd.f32 %v298_v56, %v287_v31  ;;  %v308_v45 = vadd.f32 %v298_v56, %v288_v33  ;;  %v309_v6 = vadd.f32 %v298_v56, %v289_v44  ;;  %v310_v46 = vadd.f32 %v298_v56, %v290_v42  ;;  %v5756_v30 = vld [vmem:[%s11803_s2 + $0x18] sm:$0xff]   ;;  %v5765_v42 = vld [vmem:[%s11803_s2 + $0x60] sm:$0xff]  }
 0x147   :  { %v311_v18 = vadd.f32 %v298_v56, %v291_v49  ;;  %v312_v47 = vadd.f32 %v298_v56, %v292_v35  ;;  %v313_v15 = vadd.f32 %v298_v56, %v293_v48  ;;  %v314_v26 = vadd.f32 %v298_v56, %v294_v36  ;;  %v5757_v35 = vld [vmem:[%s11803_s2 + $0x20] sm:$0xff]  }
 0x148   :  { %v315_v24 = vmax.f32 %v299_v37, 0.0  ;;  %v316_v34 = vmax.f32 %v300_v54, 0.0  ;;  %v317_v32 = vmax.f32 %v301_v38, 0.0  ;;  %v318_v50 = vmax.f32 %v302_v0, 0.0  ;;  %v5766_v37 = vld [vmem:[%s11803_s2 + $0x68] sm:$0xff]  }
 0x149   :  { %v319_v51 = vmax.f32 %v303_v39, 0.0  ;;  %v320_v52 = vmax.f32 %v304_v41, 0.0  ;;  %v321_v53 = vmax.f32 %v305_v62, 0.0  ;;  %v322_v55 = vmax.f32 %v306_v43, 0.0  ;;  %v5758_v38 = vld [vmem:[%s11803_s2 + $0x28] sm:$0xff]   ;;  %v5767_v62 = vld [vmem:[%s11803_s2 + $0x70] sm:$0xff]  }
 0x14a   :  { %v323_v57 = vmax.f32 %v307_v8, 0.0  ;;  %v324_v58 = vmax.f32 %v308_v45, 0.0  ;;  %v325_v59 = vmax.f32 %v309_v6, 0.0  ;;  %v326_v60 = vmax.f32 %v310_v46, 0.0  ;;  %v5759_v8 = vld [vmem:[%s11803_s2 + $0x30] sm:$0xff]  }
 0x14b   :  { %v327_v61 = vmax.f32 %v311_v18, 0.0  ;;  %v328_v63 = vmax.f32 %v312_v47, 0.0  ;;  %v329_v1 = vmax.f32 %v313_v15, 0.0  ;;  %v330_v2 = vmax.f32 %v314_v26, 0.0  ;;  %v5768_v18 = vld [vmem:[%s11803_s2 + $0x78] sm:$0xff]  }
 0x14c   :  { %v9840_v3 = vpack.c.bf16 %v316_v34, %v315_v24  ;;  %v9842_v4 = vpack.c.bf16 %v318_v50, %v317_v32  ;;  %v9844_v5 = vpack.c.bf16 %v320_v52, %v319_v51  ;;  %v9846_v9 = vpack.c.bf16 %v322_v55, %v321_v53  ;;  %v5760_v15 = vld [vmem:[%s11803_s2 + $0x38] sm:$0xff]   ;;  %v5769_v32 = vld [vmem:[%s11803_s2 + $0x80] sm:$0xff]   ;;  %v5770_v55 = vld [vmem:[%s11803_s2 + $0x88] sm:$0xff]  }
 0x14d   :  { %v9848_v10 = vpack.c.bf16 %v324_v58, %v323_v57  ;;  %v9850_v11 = vpack.c.bf16 %v326_v60, %v325_v59  ;;  %v9852_v13 = vpack.c.bf16 %v328_v63, %v327_v61  ;;  %v9854_v14 = vpack.c.bf16 %v330_v2, %v329_v1  ;;  %v5771_v59 = vld [vmem:[%s11803_s2 + $0x90] sm:$0xff]   ;;  %v5772_v63 = vld [vmem:[%s11803_s2 + $0x98] sm:$0xff]  }
 0x14e   :  { %8466 = vmatprep.subr.bf16.mxu1 %v9840_v3  ;;  %8498 = vmatprep.subr.bf16.mxu0 %v9840_v3  ;;  %v5469_v20 = vunpack.c.h.bf16 %v9805_v12  ;;  %v5504_v21 = vunpack.c.l.bf16 %v5762_v16  ;;  %v5472_v23 = vunpack.c.l.bf16 %v5754_v17  ;;  %v5473_v12 = vunpack.c.h.bf16 %v5754_v17  ;;  %v5773_v16 = vld [vmem:[%s11803_s2 + $0xa0] sm:$0xff]  }
 0x14f   :  { %8468 = vmatpush3.bf16.msra.mxu1 %v9840_v3  ;;  %8500 = vmatpush3.bf16.msra.mxu0 %v9840_v3  ;;  %v5508_v27 = vunpack.c.l.bf16 %v5763_v22  ;;  %v5476_v29 = vunpack.c.l.bf16 %v5755_v25  ;;  %v5509_v31 = vunpack.c.h.bf16 %v5763_v22  ;;  %v5477_v33 = vunpack.c.h.bf16 %v5755_v25 }
 0x150   :  { %8470 = vmatprep.subr.bf16.mxu1 %v9842_v4  ;;  %8502 = vmatprep.subr.bf16.mxu0 %v9842_v4  ;;  %v5512_v44 = vunpack.c.l.bf16 %v5764_v28  ;;  %v5480_v49 = vunpack.c.l.bf16 %v5756_v30  ;;  %v5513_v48 = vunpack.c.h.bf16 %v5764_v28  ;;  %v5481_v36 = vunpack.c.h.bf16 %v5756_v30  ;;  %v5090_v28 = vld [vmem:[%s11805_s3 + $0x80] sm:$0xff] }
 0x151   :  { %v5516_v56 = vunpack.c.l.bf16 %v5765_v42  ;;  %v5484_v54 = vunpack.c.l.bf16 %v5757_v35  ;;  %v5517_v0 = vunpack.c.h.bf16 %v5765_v42  ;;  %v5485_v39 = vunpack.c.h.bf16 %v5757_v35  ;;  %v5092_v42 = vld [vmem:[%s11805_s3 + $0x90] sm:$0xff] }
 0x152   :  { %v5520_v41 = vunpack.c.l.bf16 %v5766_v37  ;;  %v5488_v43 = vunpack.c.l.bf16 %v5758_v38  ;;  %v5521_v45 = vunpack.c.h.bf16 %v5766_v37  ;;  %v5489_v6 = vunpack.c.h.bf16 %v5758_v38  ;;  %v5094_v37 = vld [vmem:[%s11805_s3 + $0xa0] sm:$0xff] }
 0x153   :  { %8472 = vmatpush3.bf16.msra.mxu1 %v9842_v4  ;;  %8504 = vmatpush3.bf16.msra.mxu0 %v9842_v4  ;;  %v5524_v46 = vunpack.c.l.bf16 %v5767_v62  ;;  %v5492_v47 = vunpack.c.l.bf16 %v5759_v8  ;;  %v5525_v26 = vunpack.c.h.bf16 %v5767_v62  ;;  %v5493_v24 = vunpack.c.h.bf16 %v5759_v8  ;;  %v5096_v62 = vld [vmem:[%s11805_s3 + $0xb0] sm:$0xff] }
 0x154   :  { %8474 = vmatprep.subr.bf16.mxu1 %v9844_v5  ;;  %8506 = vmatprep.subr.bf16.mxu0 %v9844_v5  ;;  %v5528_v34 = vunpack.c.l.bf16 %v5768_v18  ;;  %v5496_v50 = vunpack.c.l.bf16 %v5760_v15  ;;  %v5529_v51 = vunpack.c.h.bf16 %v5768_v18  ;;  %v5497_v52 = vunpack.c.h.bf16 %v5760_v15  ;;  %v5098_v18 = vld [vmem:[%s11805_s3 + $0xc0] sm:$0xff] }
 0x155   :  { %v5532_v53 = vunpack.c.l.bf16 %v5769_v32  ;;  %v5533_v57 = vunpack.c.h.bf16 %v5769_v32  ;;  %v5536_v58 = vunpack.c.l.bf16 %v5770_v55  ;;  %v5537_v60 = vunpack.c.h.bf16 %v5770_v55  ;;  %v5100_v32 = vld [vmem:[%s11805_s3 + $0xd0] sm:$0xff] }
 0x156   :  { %v5540_v61 = vunpack.c.l.bf16 %v5771_v59  ;;  %v5541_v1 = vunpack.c.h.bf16 %v5771_v59  ;;  %v5544_v2 = vunpack.c.l.bf16 %v5772_v63  ;;  %v5545_v17 = vunpack.c.h.bf16 %v5772_v63 }
 0x157   :  { %8476 = vmatpush3.bf16.msra.mxu1 %v9844_v5  ;;  %8508 = vmatpush3.bf16.msra.mxu0 %v9844_v5 }
 0x158   :  { %8478 = vmatprep.subr.bf16.mxu1 %v9846_v9  ;;  %8510 = vmatprep.subr.bf16.mxu0 %v9846_v9 }
 0x15b   :  { %8480 = vmatpush3.bf16.msra.mxu1 %v9846_v9  ;;  %8512 = vmatpush3.bf16.msra.mxu0 %v9846_v9 }
 0x15c   :  { %8482 = vmatprep.subr.bf16.mxu1 %v9848_v10  ;;  %8514 = vmatprep.subr.bf16.mxu0 %v9848_v10 }
 0x15f   :  { %8484 = vmatpush3.bf16.msra.mxu1 %v9848_v10  ;;  %8516 = vmatpush3.bf16.msra.mxu0 %v9848_v10 }
 0x160   :  { %8486 = vmatprep.subr.bf16.mxu1 %v9850_v11  ;;  %8518 = vmatprep.subr.bf16.mxu0 %v9850_v11 }
 0x163   :  { %8488 = vmatpush3.bf16.msra.mxu1 %v9850_v11  ;;  %8520 = vmatpush3.bf16.msra.mxu0 %v9850_v11 }
 0x164   :  { %8490 = vmatprep.subr.bf16.mxu1 %v9852_v13  ;;  %8522 = vmatprep.subr.bf16.mxu0 %v9852_v13 }
 0x167   :  { %8492 = vmatpush3.bf16.msra.mxu1 %v9852_v13  ;;  %8524 = vmatpush3.bf16.msra.mxu0 %v9852_v13 }
 0x168   :  { %8494 = vmatprep.subr.bf16.mxu1 %v9854_v14  ;;  %8526 = vmatprep.subr.bf16.mxu0 %v9854_v14 }
 0x16b   :  { %8496 = vmatpush3.bf16.msra.mxu1 %v9854_v14  ;;  %8528 = vmatpush3.bf16.msra.mxu0 %v9854_v14 }
 0x16c   :  { %8594 = vmatprep.subr.bf16.mxu0 %v9840_v3 }
 0x16e   :  { %6884 = vmatmul.mubr.f32.vlgmr.msra.gmra.mrb[16].mxu0 %v5501_v19  ;;  %6828 = vmatmul.mubr.f32.vlgmr.msra.gmra.mrb[0].mxu1 %v5469_v20  ;;  %v5548_v19 = vunpack.c.l.bf16 %v5773_v16  ;;  %v5774_v20 = vld [vmem:[%s11803_s2 + $0xa8] sm:$0xff]  }
 0x16f   :  { %8596 = vmatpush3.bf16.msra.mxu0 %v9840_v3  ;;  %6886 = vmatprep.mubr.f32.mxu0 %v5504_v21  ;;  %v5549_v21 = vunpack.c.h.bf16 %v5773_v16  ;;  %v5552_v22 = vunpack.c.l.bf16 %v5774_v20  ;;  %v5553_v25 = vunpack.c.h.bf16 %v5774_v20 }
 0x170   :  { %8598 = vmatprep.subr.bf16.mxu0 %v9842_v4  ;;  %6830 = vmatprep.mubr.f32.mxu1 %v5472_v23  ;;  %v5775_v23 = vld [vmem:[%s11803_s2 + $0xb0] sm:$0xff]  }
 0x172   :  { %6887 = vmatmul.mubr.f32.gmra.mrb[18].mxu0 %v5505_v40  ;;  %6831 = vmatmul.mubr.f32.gmra.mrb[2].mxu1 %v5473_v12  ;;  %v5556_v40 = vunpack.c.l.bf16 %v5775_v23  ;;  %v5776_v12 = vld [vmem:[%s11803_s2 + $0xb8] sm:$0xff]  }
 0x173   :  { %8600 = vmatpush3.bf16.msra.mxu0 %v9842_v4  ;;  %6889 = vmatprep.mubr.f32.mxu0 %v5508_v27  ;;  %v5557_v27 = vunpack.c.h.bf16 %v5775_v23  ;;  %v5560_v30 = vunpack.c.l.bf16 %v5776_v12 }
 0x174   :  { %8602 = vmatprep.subr.bf16.mxu0 %v9844_v5  ;;  %6833 = vmatprep.mubr.f32.mxu1 %v5476_v29  ;;  %v5091_v29 = vld [vmem:[%s11805_s3 + $0x88] sm:$0xff] }
 0x176   :  { %6890 = vmatmul.mubr.f32.gmra.mrb[20].mxu0 %v5509_v31  ;;  %6834 = vmatmul.mubr.f32.gmra.mrb[4].mxu1 %v5477_v33  ;;  %v8529_v31 = vpack.c.bf16 %v5091_v29, %v5090_v28  ;;  %v5777_v33 = vld [vmem:[%s11803_s2 + $0xc0] sm:$0xff]   ;;  %v5786_v28 = vld [vmem:[%s11803_s2 + $0x108] sm:$0xff]  }
 0x177   :  { %8604 = vmatpush3.bf16.msra.mxu0 %v9844_v5  ;;  %6892 = vmatprep.mubr.f32.mxu0 %v5512_v44  ;;  %v5561_v44 = vunpack.c.h.bf16 %v5776_v12  ;;  %v5564_v35 = vunpack.c.l.bf16 %v5777_v33 }
 0x178   :  { %8606 = vmatprep.subr.bf16.mxu0 %v9846_v9  ;;  %6836 = vmatprep.mubr.f32.mxu1 %v5480_v49  ;;  %v5093_v49 = vld [vmem:[%s11805_s3 + $0x98] sm:$0xff] }
 0x179   :  { %8530 = vmatprep.subr.bf16.mxu1 %v8529_v31 }
 0x17a   :  { %6893 = vmatmul.mubr.f32.gmra.mrb[22].mxu0 %v5513_v48  ;;  %6837 = vmatmul.mubr.f32.gmra.mrb[6].mxu1 %v5481_v36  ;;  %v8533_v48 = vpack.c.bf16 %v5093_v49, %v5092_v42  ;;  %v5778_v36 = vld [vmem:[%s11803_s2 + $0xc8] sm:$0xff]   ;;  %v5788_v42 = vld [vmem:[%s11803_s2 + $0x118] sm:$0xff]  }
 0x17b   :  { %8608 = vmatpush3.bf16.msra.mxu0 %v9846_v9  ;;  %6895 = vmatprep.mubr.f32.mxu0 %v5516_v56  ;;  %v5565_v56 = vunpack.c.h.bf16 %v5777_v33  ;;  %v5568_v38 = vunpack.c.l.bf16 %v5778_v36  ;;  %v5601_v33 = vunpack.c.h.bf16 %v5786_v28 }
 0x17c   :  { %8610 = vmatprep.subr.bf16.mxu0 %v9848_v10  ;;  %6839 = vmatprep.mubr.f32.mxu1 %v5484_v54  ;;  %v5095_v54 = vld [vmem:[%s11805_s3 + $0xa8] sm:$0xff] }
 0x17d   :  { %8532 = vmatpush3.bf16.msra.mxu1 %v8529_v31  ;;  %v5787_v31 = vld [vmem:[%s11803_s2 + $0x110] sm:$0xff]  }
 0x17e   :  { %6896 = vmatmul.mubr.f32.gmra.mrb[24].mxu0 %v5517_v0  ;;  %6840 = vmatmul.mubr.f32.gmra.mrb[8].mxu1 %v5485_v39  ;;  %v8537_v0 = vpack.c.bf16 %v5095_v54, %v5094_v37  ;;  %v5779_v39 = vld [vmem:[%s11803_s2 + $0xd0] sm:$0xff]   ;;  %v5605_v49 = vunpack.c.h.bf16 %v5787_v31  ;;  %v5790_v37 = vld [vmem:[%s11803_s2 + $0x128] sm:$0xff]  }
 0x17f   :  { %8612 = vmatpush3.bf16.msra.mxu0 %v9848_v10  ;;  %6898 = vmatprep.mubr.f32.mxu0 %v5520_v41  ;;  %v5569_v41 = vunpack.c.h.bf16 %v5778_v36  ;;  %v5572_v8 = vunpack.c.l.bf16 %v5779_v39  ;;  %v5609_v36 = vunpack.c.h.bf16 %v5788_v42 }
 0x180   :  { %8614 = vmatprep.subr.bf16.mxu0 %v9850_v11  ;;  %6842 = vmatprep.mubr.f32.mxu1 %v5488_v43  ;;  %v5097_v43 = vld [vmem:[%s11805_s3 + $0xb8] sm:$0xff] }
 0x181   :  { %8534 = vmatprep.subr.bf16.mxu1 %v8533_v48 }
 0x182   :  { %6899 = vmatmul.mubr.f32.gmra.mrb[26].mxu0 %v5521_v45  ;;  %6843 = vmatmul.mubr.f32.gmra.mrb[10].mxu1 %v5489_v6  ;;  %v8541_v45 = vpack.c.bf16 %v5097_v43, %v5096_v62  ;;  %v5780_v6 = vld [vmem:[%s11803_s2 + $0xd8] sm:$0xff]  }
 0x183   :  { %8616 = vmatpush3.bf16.msra.mxu0 %v9850_v11  ;;  %6901 = vmatprep.mubr.f32.mxu0 %v5524_v46  ;;  %v5573_v46 = vunpack.c.h.bf16 %v5779_v39  ;;  %v5576_v15 = vunpack.c.l.bf16 %v5780_v6  ;;  %v5617_v39 = vunpack.c.h.bf16 %v5790_v37  ;;  %v5792_v62 = vld [vmem:[%s11803_s2 + $0x138] sm:$0xff]  }
 0x184   :  { %8618 = vmatprep.subr.bf16.mxu0 %v9852_v13  ;;  %6845 = vmatprep.mubr.f32.mxu1 %v5492_v47  ;;  %v5099_v47 = vld [vmem:[%s11805_s3 + $0xc8] sm:$0xff] }
 0x185   :  { %8536 = vmatpush3.bf16.msra.mxu1 %v8533_v48  ;;  %v5789_v48 = vld [vmem:[%s11803_s2 + $0x120] sm:$0xff]  }
 0x186   :  { %6902 = vmatmul.mubr.f32.gmra.mrb[28].mxu0 %v5525_v26  ;;  %6846 = vmatmul.mubr.f32.gmra.mrb[12].mxu1 %v5493_v24  ;;  %v8545_v26 = vpack.c.bf16 %v5099_v47, %v5098_v18  ;;  %v5781_v24 = vld [vmem:[%s11803_s2 + $0xe0] sm:$0xff]   ;;  %v5613_v54 = vunpack.c.h.bf16 %v5789_v48  ;;  %v5794_v18 = vld [vmem:[%s11803_s2 + $0x148] sm:$0xff]  }
 0x187   :  { %8620 = vmatpush3.bf16.msra.mxu0 %v9852_v13  ;;  %6904 = vmatprep.mubr.f32.mxu0 %v5528_v34  ;;  %v5577_v34 = vunpack.c.h.bf16 %v5780_v6  ;;  %v5581_v55 = vunpack.c.h.bf16 %v5781_v24  ;;  %v5625_v6 = vunpack.c.h.bf16 %v5792_v62 }
 0x188   :  { %8622 = vmatprep.subr.bf16.mxu0 %v9854_v14  ;;  %6848 = vmatprep.mubr.f32.mxu1 %v5496_v50  ;;  %v5101_v50 = vld [vmem:[%s11805_s3 + $0xd8] sm:$0xff] }
 0x189   :  { %8538 = vmatprep.subr.bf16.mxu1 %v8537_v0 }
 0x18a   :  { %6905 = vmatmul.mubr.f32.gmra.mrb[30].mxu0 %v5529_v51  ;;  %6849 = vmatmul.mubr.f32.gmra.mrb[14].mxu1 %v5497_v52  ;;  %v5580_v51 = vunpack.c.l.bf16 %v5781_v24  ;;  %v8549_v52 = vpack.c.bf16 %v5101_v50, %v5100_v32  ;;  %v5633_v24 = vunpack.c.h.bf16 %v5794_v18  ;;  %v5796_v32 = vld [vmem:[%s11803_s2 + $0x158] sm:$0xff]  }
 0x18b   :  { %8624 = vmatpush3.bf16.msra.mxu0 %v9854_v14  ;;  %7051 = vmatprep.mubr.f32.mxu0 %v5532_v53  ;;  %v5782_v53 = vld [vmem:[%s11803_s2 + $0xe8] sm:$0xff]  }
 0x18c   :  { %8658 = vmatprep.subr.bf16.mxu0 %v9840_v3  ;;  %8540 = vmatpush3.bf16.msra.mxu1 %v8537_v0  ;;  %v5584_v59 = vunpack.c.l.bf16 %v5782_v53  ;;  %v5585_v63 = vunpack.c.h.bf16 %v5782_v53  ;;  %v5791_v0 = vld [vmem:[%s11803_s2 + $0x130] sm:$0xff]   ;;  %v5641_v53 = vunpack.c.h.bf16 %v5796_v32 }
 0x18d   :  { %8542 = vmatprep.subr.bf16.mxu1 %v8541_v45  ;;  %v5621_v43 = vunpack.c.h.bf16 %v5791_v0 }
 0x18e   :  { %7052 = vmatmul.mubr.f32.vlgmr.msra.gmra.mrb[32].mxu0 %v5533_v57  ;;  %v5102_v57 = vld [vmem:[%s11805_s3 + $0xe0] sm:$0xff] }
 0x18f   :  { %8660 = vmatpush3.bf16.msra.mxu0 %v9840_v3  ;;  %7054 = vmatprep.mubr.f32.mxu0 %v5536_v58  ;;  %v5103_v58 = vld [vmem:[%s11805_s3 + $0xe8] sm:$0xff] }
 0x190   :  { %8662 = vmatprep.subr.bf16.mxu0 %v9842_v4  ;;  %8544 = vmatpush3.bf16.msra.mxu1 %v8541_v45  ;;  %v5793_v45 = vld [vmem:[%s11803_s2 + $0x140] sm:$0xff]  }
 0x191   :  { %8546 = vmatprep.subr.bf16.mxu1 %v8545_v26  ;;  %v5629_v47 = vunpack.c.h.bf16 %v5793_v45 }
 0x192   :  { %7055 = vmatmul.mubr.f32.gmra.mrb[34].mxu0 %v5537_v60  ;;  %v8553_v60 = vpack.c.bf16 %v5103_v58, %v5102_v57  ;;  %v5798_v57 = vld [vmem:[%s11803_s2 + $0x168] sm:$0xff]  }
 0x193   :  { %8664 = vmatpush3.bf16.msra.mxu0 %v9842_v4  ;;  %7057 = vmatprep.mubr.f32.mxu0 %v5540_v61  ;;  %v5783_v61 = vld [vmem:[%s11803_s2 + $0xf0] sm:$0xff]  }
 0x194   :  { %8666 = vmatprep.subr.bf16.mxu0 %v9844_v5  ;;  %8548 = vmatpush3.bf16.msra.mxu1 %v8545_v26  ;;  %v5588_v16 = vunpack.c.l.bf16 %v5783_v61  ;;  %v5589_v20 = vunpack.c.h.bf16 %v5783_v61  ;;  %v5795_v26 = vld [vmem:[%s11803_s2 + $0x150] sm:$0xff]   ;;  %v5649_v61 = vunpack.c.h.bf16 %v5798_v57 }
 0x195   :  { %8550 = vmatprep.subr.bf16.mxu1 %v8549_v52  ;;  %v5637_v50 = vunpack.c.h.bf16 %v5795_v26 }
 0x196   :  { %7058 = vmatmul.mubr.f32.gmra.mrb[36].mxu0 %v5541_v1  ;;  %v5104_v1 = vld [vmem:[%s11805_s3 + $0xf0] sm:$0xff] }
 0x197   :  { %8668 = vmatpush3.bf16.msra.mxu0 %v9844_v5  ;;  %7060 = vmatprep.mubr.f32.mxu0 %v5544_v2  ;;  %v5105_v2 = vld [vmem:[%s11805_s3 + $0xf8] sm:$0xff] }
 0x198   :  { %8670 = vmatprep.subr.bf16.mxu0 %v9846_v9  ;;  %8552 = vmatpush3.bf16.msra.mxu1 %v8549_v52  ;;  %v5797_v52 = vld [vmem:[%s11803_s2 + $0x160] sm:$0xff]  }
 0x199   :  { %8554 = vmatprep.subr.bf16.mxu1 %v8553_v60  ;;  %v5645_v58 = vunpack.c.h.bf16 %v5797_v52 }
 0x19a   :  { %7061 = vmatmul.mubr.f32.gmra.mrb[38].mxu0 %v5545_v17  ;;  %v8557_v17 = vpack.c.bf16 %v5105_v2, %v5104_v1  ;;  %v5800_v1 = vld [vmem:[%s11803_s2 + $0x178] sm:$0xff]  }
 0x19b   :  { %8672 = vmatpush3.bf16.msra.mxu0 %v9846_v9  ;;  %7063 = vmatprep.mubr.f32.mxu0 %v5548_v19  ;;  %v5784_v19 = vld [vmem:[%s11803_s2 + $0xf8] sm:$0xff]  }
 0x19c   :  { %8674 = vmatprep.subr.bf16.mxu0 %v9848_v10  ;;  %8556 = vmatpush3.bf16.msra.mxu1 %v8553_v60  ;;  %v5592_v23 = vunpack.c.l.bf16 %v5784_v19  ;;  %v5593_v12 = vunpack.c.h.bf16 %v5784_v19  ;;  %v5799_v60 = vld [vmem:[%s11803_s2 + $0x170] sm:$0xff]   ;;  %v5657_v19 = vunpack.c.h.bf16 %v5800_v1 }
 0x19d   :  { %8558 = vmatprep.subr.bf16.mxu1 %v8557_v17  ;;  %v5653_v2 = vunpack.c.h.bf16 %v5799_v60 }
 0x19e   :  { %7064 = vmatmul.mubr.f32.gmra.mrb[40].mxu0 %v5549_v21  ;;  %v508_v21 = vld [vmem:[%s11805_s3] sm:$0xff] }
 0x19f   :  { %8676 = vmatpush3.bf16.msra.mxu0 %v9848_v10  ;;  %7066 = vmatprep.mubr.f32.mxu0 %v5552_v22  ;;  %v509_v22 = vld [vmem:[%s11805_s3 + $0x8] sm:$0xff] }
 0x1a0   :  { %8678 = vmatprep.subr.bf16.mxu0 %v9850_v11  ;;  %8560 = vmatpush3.bf16.msra.mxu1 %v8557_v17  ;;  %v5801_v17 = vld [vmem:[%s11803_s2 + $0x180] sm:$0xff]  }
 0x1a2   :  { %7067 = vmatmul.mubr.f32.gmra.mrb[42].mxu0 %v5553_v25  ;;  %v10078_v25 = vpack.c.bf16 %v509_v22, %v508_v21  ;;  %v5802_v21 = vld [vmem:[%s11803_s2 + $0x188] sm:$0xff]   ;;  %v5661_v22 = vunpack.c.h.bf16 %v5801_v17 }
 0x1a3   :  { %8680 = vmatpush3.bf16.msra.mxu0 %v9850_v11  ;;  %7069 = vmatprep.mubr.f32.mxu0 %v5556_v40  ;;  %v5785_v40 = vld [vmem:[%s11803_s2 + $0x100] sm:$0xff]  }
 0x1a4   :  { %8682 = vmatprep.subr.bf16.mxu0 %v9852_v13  ;;  %8562 = vmatprep.subr.bf16.mxu1 %v10078_v25  ;;  %v5597_v29 = vunpack.c.h.bf16 %v5785_v40 }
 0x1a6   :  { %7070 = vmatmul.mubr.f32.gmra.mrb[44].mxu0 %v5557_v27  ;;  %v5596_v27 = vunpack.c.l.bf16 %v5785_v40  ;;  %v5803_v40 = vld [vmem:[%s11803_s2 + $0x190] sm:$0xff]  }
 0x1a7   :  { %8684 = vmatpush3.bf16.msra.mxu0 %v9852_v13  ;;  %7072 = vmatprep.mubr.f32.mxu0 %v5560_v30  ;;  %v5600_v30 = vunpack.c.l.bf16 %v5786_v28  ;;  %v5804_v28 = vld [vmem:[%s11803_s2 + $0x198] sm:$0xff]  }
 0x1a8   :  { %8686 = vmatprep.subr.bf16.mxu0 %v9854_v14 }
 0x1aa   :  { %7073 = vmatmul.mubr.f32.gmra.mrb[46].mxu0 %v5561_v44  ;;  %v5604_v44 = vunpack.c.l.bf16 %v5787_v31  ;;  %v5805_v31 = vld [vmem:[%s11803_s2 + $0x1a0] sm:$0xff]  }
 0x1ab   :  { %8688 = vmatpush3.bf16.msra.mxu0 %v9854_v14  ;;  %7163 = vmatprep.mubr.f32.mxu0 %v5564_v35  ;;  %v5608_v35 = vunpack.c.l.bf16 %v5788_v42  ;;  %v5806_v42 = vld [vmem:[%s11803_s2 + $0x1a8] sm:$0xff]  }
 0x1ac   :  { %8722 = vmatprep.subr.bf16.mxu0 %v9840_v3 }
 0x1ae   :  { %7164 = vmatmul.mubr.f32.vlgmr.msra.gmra.mrb[48].mxu0 %v5565_v56  ;;  %v5612_v56 = vunpack.c.l.bf16 %v5789_v48  ;;  %v5807_v48 = vld [vmem:[%s11803_s2 + $0x1b0] sm:$0xff]  }
 0x1af   :  { %8724 = vmatpush3.bf16.msra.mxu0 %v9840_v3  ;;  %7166 = vmatprep.mubr.f32.mxu0 %v5568_v38  ;;  %v5616_v38 = vunpack.c.l.bf16 %v5790_v37  ;;  %v5808_v37 = vld [vmem:[%s11803_s2 + $0x1b8] sm:$0xff]  }
 0x1b0   :  { %8726 = vmatprep.subr.bf16.mxu0 %v9842_v4 }
 0x1b2   :  { %7167 = vmatmul.mubr.f32.gmra.mrb[50].mxu0 %v5569_v41  ;;  %v5620_v41 = vunpack.c.l.bf16 %v5791_v0  ;;  %v5809_v0 = vld [vmem:[%s11803_s2 + $0x1c0] sm:$0xff]  }
 0x1b3   :  { %8728 = vmatpush3.bf16.msra.mxu0 %v9842_v4  ;;  %7169 = vmatprep.mubr.f32.mxu0 %v5572_v8  ;;  %v5624_v8 = vunpack.c.l.bf16 %v5792_v62  ;;  %v5810_v62 = vld [vmem:[%s11803_s2 + $0x1c8] sm:$0xff]  }
 0x1b4   :  { %8730 = vmatprep.subr.bf16.mxu0 %v9844_v5 }
 0x1b6   :  { %7170 = vmatmul.mubr.f32.gmra.mrb[52].mxu0 %v5573_v46  ;;  %v5628_v46 = vunpack.c.l.bf16 %v5793_v45  ;;  %v5811_v45 = vld [vmem:[%s11803_s2 + $0x1d0] sm:$0xff]  }
 0x1b7   :  { %8732 = vmatpush3.bf16.msra.mxu0 %v9844_v5  ;;  %7172 = vmatprep.mubr.f32.mxu0 %v5576_v15  ;;  %v5632_v15 = vunpack.c.l.bf16 %v5794_v18  ;;  %v5812_v18 = vld [vmem:[%s11803_s2 + $0x1d8] sm:$0xff]  }
 0x1b8   :  { %8734 = vmatprep.subr.bf16.mxu0 %v9846_v9 }
 0x1ba   :  { %7173 = vmatmul.mubr.f32.gmra.mrb[54].mxu0 %v5577_v34  ;;  %v5636_v34 = vunpack.c.l.bf16 %v5795_v26  ;;  %v5705_v26 = vunpack.c.h.bf16 %v5812_v18 }
 0x1bb   :  { %8736 = vmatpush3.bf16.msra.mxu0 %v9846_v9  ;;  %7175 = vmatprep.mubr.f32.mxu0 %v5580_v51  ;;  %v5640_v51 = vunpack.c.l.bf16 %v5796_v32 }
 0x1bc   :  { %8738 = vmatprep.subr.bf16.mxu0 %v9848_v10 }
 0x1be   :  { %7176 = vmatmul.mubr.f32.gmra.mrb[56].mxu0 %v5581_v55  ;;  %v5644_v55 = vunpack.c.l.bf16 %v5797_v52 }
 0x1bf   :  { %8740 = vmatpush3.bf16.msra.mxu0 %v9848_v10  ;;  %7178 = vmatprep.mubr.f32.mxu0 %v5584_v59  ;;  %v5648_v59 = vunpack.c.l.bf16 %v5798_v57 }
 0x1c0   :  { %8742 = vmatprep.subr.bf16.mxu0 %v9850_v11 }
 0x1c2   :  { %7179 = vmatmul.mubr.f32.gmra.mrb[58].mxu0 %v5585_v63  ;;  %v5652_v63 = vunpack.c.l.bf16 %v5799_v60  ;;  %v5816_v60 = vld [vmem:[%s11803_s2 + $0x1f8] sm:$0xff]  }
 0x1c3   :  { %8744 = vmatpush3.bf16.msra.mxu0 %v9850_v11  ;;  %7181 = vmatprep.mubr.f32.mxu0 %v5588_v16  ;;  %v5656_v16 = vunpack.c.l.bf16 %v5800_v1 }
 0x1c4   :  { %8746 = vmatprep.subr.bf16.mxu0 %v9852_v13 }
 0x1c6   :  { %7182 = vmatmul.mubr.f32.gmra.mrb[60].mxu0 %v5589_v20  ;;  %v5660_v20 = vunpack.c.l.bf16 %v5801_v17 }
 0x1c7   :  { %8748 = vmatpush3.bf16.msra.mxu0 %v9852_v13  ;;  %7184 = vmatprep.mubr.f32.mxu0 %v5592_v23  ;;  %v5664_v23 = vunpack.c.l.bf16 %v5802_v21 }
 0x1c8   :  { %8750 = vmatprep.subr.bf16.mxu0 %v9854_v14 }
 0x1ca   :  { %7185 = vmatmul.mubr.f32.gmra.mrb[62].mxu0 %v5593_v12  ;;  %v5665_v12 = vunpack.c.h.bf16 %v5802_v21  ;;  %v5721_v21 = vunpack.c.h.bf16 %v5816_v60 }
 0x1cb   :  { %8752 = vmatpush3.bf16.msra.mxu0 %v9854_v14  ;;  %7275 = vmatprep.mubr.f32.mxu0 %v5596_v27  ;;  %v5668_v27 = vunpack.c.l.bf16 %v5803_v40 }
 0x1cc   :  { %8786 = vmatprep.subr.bf16.mxu0 %v9840_v3 }
 0x1ce   :  { %7276 = vmatmul.mubr.f32.vlgmr.msra.gmra.mrb[64].mxu0 %v5597_v29  ;;  %v5669_v29 = vunpack.c.h.bf16 %v5803_v40  ;;  %v5818_v40 = vld [vmem:[%s11803_s2 + $0x208] sm:$0xff]  }
 0x1cf   :  { %8788 = vmatpush3.bf16.msra.mxu0 %v9840_v3  ;;  %7278 = vmatprep.mubr.f32.mxu0 %v5600_v30  ;;  %v5672_v30 = vunpack.c.l.bf16 %v5804_v28 }
 0x1d0   :  { %8790 = vmatprep.subr.bf16.mxu0 %v9842_v4 }
 0x1d2   :  { %7279 = vmatmul.mubr.f32.gmra.mrb[66].mxu0 %v5601_v33  ;;  %v5673_v33 = vunpack.c.h.bf16 %v5804_v28 }
 0x1d3   :  { %8792 = vmatpush3.bf16.msra.mxu0 %v9842_v4  ;;  %7281 = vmatprep.mubr.f32.mxu0 %v5604_v44  ;;  %v5676_v44 = vunpack.c.l.bf16 %v5805_v31 }
 0x1d4   :  { %8794 = vmatprep.subr.bf16.mxu0 %v9844_v5 }
 0x1d6   :  { %7282 = vmatmul.mubr.f32.gmra.mrb[68].mxu0 %v5605_v49  ;;  %v5677_v49 = vunpack.c.h.bf16 %v5805_v31  ;;  %v516_v31 = vld [vmem:[%s11805_s3 + $0x40] sm:$0xff] }
 0x1d7   :  { %8796 = vmatpush3.bf16.msra.mxu0 %v9844_v5  ;;  %7284 = vmatprep.mubr.f32.mxu0 %v5608_v35  ;;  %v5680_v35 = vunpack.c.l.bf16 %v5806_v42 }
 0x1d8   :  { %8798 = vmatprep.subr.bf16.mxu0 %v9846_v9 }
 0x1da   :  { %7285 = vmatmul.mubr.f32.gmra.mrb[70].mxu0 %v5609_v36  ;;  %v5681_v36 = vunpack.c.h.bf16 %v5806_v42  ;;  %v5819_v42 = vld [vmem:[%s11803_s2 + $0x210] sm:$0xff]  }
 0x1db   :  { %8800 = vmatpush3.bf16.msra.mxu0 %v9846_v9  ;;  %7287 = vmatprep.mubr.f32.mxu0 %v5612_v56  ;;  %v5684_v56 = vunpack.c.l.bf16 %v5807_v48 }
 0x1dc   :  { %8802 = vmatprep.subr.bf16.mxu0 %v9848_v10 }
 0x1de   :  { %7288 = vmatmul.mubr.f32.gmra.mrb[72].mxu0 %v5613_v54  ;;  %v5685_v54 = vunpack.c.h.bf16 %v5807_v48 }
 0x1df   :  { %8804 = vmatpush3.bf16.msra.mxu0 %v9848_v10  ;;  %7290 = vmatprep.mubr.f32.mxu0 %v5616_v38  ;;  %v5688_v38 = vunpack.c.l.bf16 %v5808_v37 }
 0x1e0   :  { %8806 = vmatprep.subr.bf16.mxu0 %v9850_v11 }
 0x1e2   :  { %7291 = vmatmul.mubr.f32.gmra.mrb[74].mxu0 %v5617_v39  ;;  %v5689_v39 = vunpack.c.h.bf16 %v5808_v37  ;;  %v518_v37 = vld [vmem:[%s11805_s3 + $0x50] sm:$0xff] }
 0x1e3   :  { %8808 = vmatpush3.bf16.msra.mxu0 %v9850_v11  ;;  %7293 = vmatprep.mubr.f32.mxu0 %v5620_v41  ;;  %v5692_v41 = vunpack.c.l.bf16 %v5809_v0 }
 0x1e4   :  { %8810 = vmatprep.subr.bf16.mxu0 %v9852_v13 }
 0x1e6   :  { %7294 = vmatmul.mubr.f32.gmra.mrb[76].mxu0 %v5621_v43  ;;  %v5693_v43 = vunpack.c.h.bf16 %v5809_v0  ;;  %v5820_v0 = vld [vmem:[%s11803_s2 + $0x218] sm:$0xff]  }
 0x1e7   :  { %8812 = vmatpush3.bf16.msra.mxu0 %v9852_v13  ;;  %7296 = vmatprep.mubr.f32.mxu0 %v5624_v8  ;;  %v5696_v8 = vunpack.c.l.bf16 %v5810_v62 }
 0x1e8   :  { %8814 = vmatprep.subr.bf16.mxu0 %v9854_v14 }
 0x1ea   :  { %7297 = vmatmul.mubr.f32.gmra.mrb[78].mxu0 %v5625_v6  ;;  %v5697_v6 = vunpack.c.h.bf16 %v5810_v62 }
 0x1eb   :  { %8816 = vmatpush3.bf16.msra.mxu0 %v9854_v14  ;;  %7387 = vmatprep.mubr.f32.mxu0 %v5628_v46  ;;  %v5700_v46 = vunpack.c.l.bf16 %v5811_v45 }
 0x1ec   :  { %8850 = vmatprep.subr.bf16.mxu0 %v9840_v3 }
 0x1ee   :  { %7388 = vmatmul.mubr.f32.vlgmr.msra.gmra.mrb[80].mxu0 %v5629_v47  ;;  %v5701_v47 = vunpack.c.h.bf16 %v5811_v45  ;;  %v5733_v45 = vunpack.c.h.bf16 %v5819_v42 }
 0x1ef   :  { %8852 = vmatpush3.bf16.msra.mxu0 %v9840_v3  ;;  %7390 = vmatprep.mubr.f32.mxu0 %v5632_v15  ;;  %v5704_v15 = vunpack.c.l.bf16 %v5812_v18  ;;  %v5736_v18 = vunpack.c.l.bf16 %v5820_v0 }
 0x1f0   :  { %8854 = vmatprep.subr.bf16.mxu0 %v9842_v4 }
 0x1f2   :  { %7391 = vmatmul.mubr.f32.gmra.mrb[82].mxu0 %v5633_v24 }
 0x1f3   :  { %8856 = vmatpush3.bf16.msra.mxu0 %v9842_v4  ;;  %7393 = vmatprep.mubr.f32.mxu0 %v5636_v34 }
 0x1f4   :  { %8858 = vmatprep.subr.bf16.mxu0 %v9844_v5 }
 0x1f6   :  { %7394 = vmatmul.mubr.f32.gmra.mrb[84].mxu0 %v5637_v50 }
 0x1f7   :  { %8860 = vmatpush3.bf16.msra.mxu0 %v9844_v5  ;;  %7396 = vmatprep.mubr.f32.mxu0 %v5640_v51  ;;  %v510_v51 = vld [vmem:[%s11805_s3 + $0x10] sm:$0xff] }
 0x1f8   :  { %8862 = vmatprep.subr.bf16.mxu0 %v9846_v9 }
 0x1fa   :  { %7397 = vmatmul.mubr.f32.gmra.mrb[86].mxu0 %v5641_v53 }
 0x1fb   :  { %8864 = vmatpush3.bf16.msra.mxu0 %v9846_v9  ;;  %7399 = vmatprep.mubr.f32.mxu0 %v5644_v55 }
 0x1fc   :  { %8866 = vmatprep.subr.bf16.mxu0 %v9848_v10 }
 0x1fe   :  { %7400 = vmatmul.mubr.f32.gmra.mrb[88].mxu0 %v5645_v58 }
 0x1ff   :  { %8868 = vmatpush3.bf16.msra.mxu0 %v9848_v10  ;;  %7402 = vmatprep.mubr.f32.mxu0 %v5648_v59 }
 0x200   :  { %8870 = vmatprep.subr.bf16.mxu0 %v9850_v11 }
 0x202   :  { %7403 = vmatmul.mubr.f32.gmra.mrb[90].mxu0 %v5649_v61  ;;  %v512_v61 = vld [vmem:[%s11805_s3 + $0x20] sm:$0xff] }
 0x203   :  { %8872 = vmatpush3.bf16.msra.mxu0 %v9850_v11  ;;  %7405 = vmatprep.mubr.f32.mxu0 %v5652_v63  ;;  %v513_v63 = vld [vmem:[%s11805_s3 + $0x28] sm:$0xff] }
 0x204   :  { %8874 = vmatprep.subr.bf16.mxu0 %v9852_v13 }
 0x206   :  { %7406 = vmatmul.mubr.f32.gmra.mrb[92].mxu0 %v5653_v2 }
 0x207   :  { %8876 = vmatpush3.bf16.msra.mxu0 %v9852_v13  ;;  %7408 = vmatprep.mubr.f32.mxu0 %v5656_v16  ;;  %v5720_v16 = vunpack.c.l.bf16 %v5816_v60  ;;  %v5122_v60 = vld [vmem:[%s11805_s3 + $0x100] sm:$0xff] }
 0x208   :  { %8878 = vmatprep.subr.bf16.mxu0 %v9854_v14 }
 0x20a   :  { %7409 = vmatmul.mubr.f32.gmra.mrb[94].mxu0 %v5657_v19  ;;  %v8569_v19 = vpack.c.bf16 %v513_v63, %v512_v61  ;;  %v5123_v61 = vld [vmem:[%s11805_s3 + $0x108] sm:$0xff] }
 0x20b   :  { %8880 = vmatpush3.bf16.msra.mxu0 %v9854_v14  ;;  %7499 = vmatprep.mubr.f32.mxu0 %v5660_v20 }
 0x20c   :  { %8914 = vmatprep.subr.bf16.mxu0 %v9840_v3 }
 0x20e   :  { %7500 = vmatmul.mubr.f32.vlgmr.msra.gmra.mrb[96].mxu0 %v5661_v22  ;;  %v515_v22 = vld [vmem:[%s11805_s3 + $0x38] sm:$0xff] }
 0x20f   :  { %8916 = vmatpush3.bf16.msra.mxu0 %v9840_v3  ;;  %7502 = vmatprep.mubr.f32.mxu0 %v5664_v23 }
 0x210   :  { %8918 = vmatprep.subr.bf16.mxu0 %v9842_v4 }
 0x212   :  { %7503 = vmatmul.mubr.f32.gmra.mrb[98].mxu0 %v5665_v12 }
 0x213   :  { %8920 = vmatpush3.bf16.msra.mxu0 %v9842_v4  ;;  %7505 = vmatprep.mubr.f32.mxu0 %v5668_v27 }
 0x214   :  { %8922 = vmatprep.subr.bf16.mxu0 %v9844_v5 }
 0x216   :  { %7506 = vmatmul.mubr.f32.gmra.mrb[100].mxu0 %v5669_v29 }
 0x217   :  { %8924 = vmatpush3.bf16.msra.mxu0 %v9844_v5  ;;  %7508 = vmatprep.mubr.f32.mxu0 %v5672_v30 }
 0x218   :  { %8926 = vmatprep.subr.bf16.mxu0 %v9846_v9 }
 0x21a   :  { %7509 = vmatmul.mubr.f32.gmra.mrb[102].mxu0 %v5673_v33  ;;  %v517_v33 = vld [vmem:[%s11805_s3 + $0x48] sm:$0xff] }
 0x21b   :  { %8928 = vmatpush3.bf16.msra.mxu0 %v9846_v9  ;;  %7511 = vmatprep.mubr.f32.mxu0 %v5676_v44  ;;  %v5728_v44 = vunpack.c.l.bf16 %v5818_v40  ;;  %v8577_v48 = vpack.c.bf16 %v517_v33, %v516_v31  ;;  %v5126_v33 = vld [vmem:[%s11805_s3 + $0x120] sm:$0xff] }
 0x21c   :  { %8930 = vmatprep.subr.bf16.mxu0 %v9848_v10 }
 0x21e   :  { %7512 = vmatmul.mubr.f32.gmra.mrb[104].mxu0 %v5677_v49 }
 0x21f   :  { %8932 = vmatpush3.bf16.msra.mxu0 %v9848_v10  ;;  %7514 = vmatprep.mubr.f32.mxu0 %v5680_v35 }
 0x220   :  { %8934 = vmatprep.subr.bf16.mxu0 %v9850_v11 }
 0x222   :  { %7515 = vmatmul.mubr.f32.gmra.mrb[106].mxu0 %v5681_v36 }
 0x223   :  { %8936 = vmatpush3.bf16.msra.mxu0 %v9850_v11  ;;  %7517 = vmatprep.mubr.f32.mxu0 %v5684_v56  ;;  %v5729_v56 = vunpack.c.h.bf16 %v5818_v40 }
 0x224   :  { %8938 = vmatprep.subr.bf16.mxu0 %v9852_v13 }
 0x226   :  { %7518 = vmatmul.mubr.f32.gmra.mrb[108].mxu0 %v5685_v54  ;;  %v519_v54 = vld [vmem:[%s11805_s3 + $0x58] sm:$0xff] }
 0x227   :  { %8940 = vmatpush3.bf16.msra.mxu0 %v9852_v13  ;;  %7520 = vmatprep.mubr.f32.mxu0 %v5688_v38  ;;  %v5732_v38 = vunpack.c.l.bf16 %v5819_v42 }
 0x228   :  { %8942 = vmatprep.subr.bf16.mxu0 %v9854_v14 }
 0x22a   :  { %7521 = vmatmul.mubr.f32.gmra.mrb[110].mxu0 %v5689_v39 }
 0x22b   :  { %8944 = vmatpush3.bf16.msra.mxu0 %v9854_v14  ;;  %7611 = vmatprep.mubr.f32.mxu0 %v5692_v41 }
 0x22c   :  { %8978 = vmatprep.subr.bf16.mxu0 %v9840_v3 }
 0x22e   :  { %7612 = vmatmul.mubr.f32.vlgmr.msra.gmra.mrb[112].mxu0 %v5693_v43  ;;  %v8581_v43 = vpack.c.bf16 %v519_v54, %v518_v37  ;;  %v5129_v37 = vld [vmem:[%s11805_s3 + $0x138] sm:$0xff] }
 0x22f   :  { %8980 = vmatpush3.bf16.msra.mxu0 %v9840_v3  ;;  %7614 = vmatprep.mubr.f32.mxu0 %v5696_v8  ;;  %v5813_v3 = vld [vmem:[%s11803_s2 + $0x1e0] sm:$0xff]  }
 0x230   :  { %8982 = vmatprep.subr.bf16.mxu0 %v9842_v4  ;;  %v5708_v24 = vunpack.c.l.bf16 %v5813_v3  ;;  %v5709_v34 = vunpack.c.h.bf16 %v5813_v3 }
 0x232   :  { %7615 = vmatmul.mubr.f32.gmra.mrb[114].mxu0 %v5697_v6  ;;  %v520_v6 = vld [vmem:[%s11805_s3 + $0x60] sm:$0xff] }
 0x233   :  { %8984 = vmatpush3.bf16.msra.mxu0 %v9842_v4  ;;  %7617 = vmatprep.mubr.f32.mxu0 %v5700_v46  ;;  %v5814_v4 = vld [vmem:[%s11803_s2 + $0x1e8] sm:$0xff]  }
 0x234   :  { %8986 = vmatprep.subr.bf16.mxu0 %v9844_v5  ;;  %v5712_v32 = vunpack.c.l.bf16 %v5814_v4  ;;  %v5713_v50 = vunpack.c.h.bf16 %v5814_v4  ;;  %v521_v46 = vld [vmem:[%s11805_s3 + $0x68] sm:$0xff] }
 0x236   :  { %7618 = vmatmul.mubr.f32.gmra.mrb[116].mxu0 %v5701_v47  ;;  %v5821_v47 = vld [vmem:[%s11803_s2 + $0x220] sm:$0xff]  }
 0x237   :  { %8988 = vmatpush3.bf16.msra.mxu0 %v9844_v5  ;;  %7620 = vmatprep.mubr.f32.mxu0 %v5704_v15  ;;  %v5815_v5 = vld [vmem:[%s11803_s2 + $0x1f0] sm:$0xff]  }
 0x238   :  { %8990 = vmatprep.subr.bf16.mxu0 %v9846_v9  ;;  %v5716_v55 = vunpack.c.l.bf16 %v5815_v5 }
 0x23a   :  { %7621 = vmatmul.mubr.f32.gmra.mrb[118].mxu0 %v5705_v26 }
 0x23b   :  { %8992 = vmatpush3.bf16.msra.mxu0 %v9846_v9  ;;  %7623 = vmatprep.mubr.f32.mxu0 %v5708_v24  ;;  %v511_v9 = vld [vmem:[%s11805_s3 + $0x18] sm:$0xff]  ;;  %v8585_v24 = vpack.c.bf16 %v521_v46, %v520_v6  ;;  %v5134_v6 = vld [vmem:[%s11805_s3 + $0x160] sm:$0xff]  ;;  %v5135_v46 = vld [vmem:[%s11805_s3 + $0x168] sm:$0xff] }
 0x23c   :  { %8994 = vmatprep.subr.bf16.mxu0 %v9848_v10  ;;  %v8565_v58 = vpack.c.bf16 %v511_v9, %v510_v51  ;;  %v5822_v51 = vld [vmem:[%s11803_s2 + $0x228] sm:$0xff]  }
 0x23d   :  { %v5744_v63 = vunpack.c.l.bf16 %v5822_v51 }
 0x23e   :  { %7624 = vmatmul.mubr.f32.gmra.mrb[120].mxu0 %v5709_v34  ;;  %v5737_v34 = vunpack.c.h.bf16 %v5820_v0  ;;  %v5131_v0 = vld [vmem:[%s11805_s3 + $0x148] sm:$0xff] }
 0x23f   :  { %8996 = vmatpush3.bf16.msra.mxu0 %v9848_v10  ;;  %7626 = vmatprep.mubr.f32.mxu0 %v5712_v32  ;;  %v5717_v10 = vunpack.c.h.bf16 %v5815_v5  ;;  %v522_v32 = vld [vmem:[%s11805_s3 + $0x70] sm:$0xff]  ;;  %v5740_v5 = vunpack.c.l.bf16 %v5821_v47 }
 0x240   :  { %8998 = vmatprep.subr.bf16.mxu0 %v9850_v11 }
 0x241   :  { %v6885_v52 = vpop.f32.mrb[16].mxu0  ;;  %v10243_v53 = vpop.f32.mrb[0].mxu1 }
 0x242   :  { %v623_v57 = vpop.f32.mrb[17].mxu0  ;;  %v10245_v59 = vpop.f32.mrb[1].mxu1  ;;  %7627 = vmatmul.mubr.f32.gmra.mrb[122].mxu0 %v5713_v50  ;;  %v523_v50 = vld [vmem:[%s11805_s3 + $0x78] sm:$0xff] }
 0x243   :  { %6939 = vmatprep.mubr.f32.mxu1 %v623_v57  ;;  %9000 = vmatpush3.bf16.msra.mxu0 %v9850_v11  ;;  %v5817_v11 = vld [vmem:[%s11803_s2 + $0x200] sm:$0xff]   ;;  %v8589_v57 = vpack.c.bf16 %v523_v50, %v522_v32 }
 0x244   :  { %6940 = vmatmul.mubr.f32.vlgmr.msra.gmra.mrb[16].mxu1 %v6885_v52  ;;  %9002 = vmatprep.subr.bf16.mxu0 %v9852_v13  ;;  %v5724_v23 = vunpack.c.l.bf16 %v5817_v11  ;;  %v5725_v30 = vunpack.c.h.bf16 %v5817_v11 }
 0x245   :  { %v6888_v1 = vpop.f32.mrb[18].mxu0  ;;  %8564 = vmatpush3.bf16.msra.mxu1 %v10078_v25  ;;  %v10259_v2 = vpop.f32.mrb[2].mxu1  ;;  %7629 = vmatprep.mubr.f32.mxu0 %v5716_v55  ;;  %v514_v25 = vld [vmem:[%s11805_s3 + $0x30] sm:$0xff] }
 0x246   :  { %v633_v17 = vpop.f32.mrb[19].mxu0  ;;  %8566 = vmatprep.subr.bf16.mxu1 %v8565_v58  ;;  %v10264_v20 = vpop.f32.mrb[3].mxu1  ;;  %7630 = vmatmul.mubr.f32.gmra.mrb[124].mxu0 %v5717_v10  ;;  %v8573_v28 = vpack.c.bf16 %v515_v22, %v514_v25  ;;  %v5741_v10 = vunpack.c.h.bf16 %v5821_v47  ;;  %v5745_v25 = vunpack.c.h.bf16 %v5822_v51  ;;  %v5124_v22 = vld [vmem:[%s11805_s3 + $0x110] sm:$0xff]  ;;  %v5157_v51 = vld [vmem:[%s11805_s3 + $0x198] sm:$0xff] }
 0x247   :  { %6942 = vmatprep.mubr.f32.mxu1 %v633_v17  ;;  %9004 = vmatpush3.bf16.msra.mxu0 %v9852_v13  ;;  %v5136_v47 = vld [vmem:[%s11805_s3 + $0x170] sm:$0xff] }
 0x248   :  { %6943 = vmatmul.mubr.f32.gmra.mrb[18].mxu1 %v6888_v1  ;;  %9006 = vmatprep.subr.bf16.mxu0 %v9854_v14  ;;  %v5823_v1 = vld [vmem:[%s11803_s2 + $0x230] sm:$0xff]  }
 0x249   :  { %v6891_v12 = vpop.f32.mrb[20].mxu0  ;;  %8568 = vmatpush3.bf16.msra.mxu1 %v8565_v58  ;;  %v10277_v27 = vpop.f32.mrb[4].mxu1  ;;  %7632 = vmatprep.mubr.f32.mxu0 %v5720_v16  ;;  %v5748_v40 = vunpack.c.l.bf16 %v5823_v1  ;;  %v5749_v31 = vunpack.c.h.bf16 %v5823_v1  ;;  %v5161_v1 = vld [vmem:[%s11805_s3 + $0x1b8] sm:$0xff] }
 0x24a   :  { %v643_v13 = vpop.f32.mrb[21].mxu0  ;;  %8570 = vmatprep.subr.bf16.mxu1 %v8569_v19  ;;  %v10279_v29 = vpop.f32.mrb[5].mxu1  ;;  %7633 = vmatmul.mubr.f32.gmra.mrb[126].mxu0 %v5721_v21 }
 0x24b   :  { %6945 = vmatprep.mubr.f32.mxu1 %v643_v13  ;;  %9008 = vmatpush3.bf16.msra.mxu0 %v9854_v14 }
 0x24c   :  { %6946 = vmatmul.mubr.f32.gmra.mrb[20].mxu1 %v6891_v12  ;;  %7723 = vmatprep.mubr.f32.mxu0 %v5724_v23  ;;  %v5125_v23 = vld [vmem:[%s11805_s3 + $0x118] sm:$0xff] }
 0x24d   :  { %v6894_v49 = vpop.f32.mrb[22].mxu0  ;;  %8572 = vmatpush3.bf16.msra.mxu1 %v8569_v19  ;;  %v10291_v35 = vpop.f32.mrb[6].mxu1  ;;  %v8625_v19 = vpack.c.bf16 %v5123_v61, %v5122_v60  ;;  %v5824_v12 = vld [vmem:[%s11803_s2 + $0x238] sm:$0xff]  }
 0x24e   :  { %v653_v14 = vpop.f32.mrb[23].mxu0  ;;  %8574 = vmatprep.subr.bf16.mxu1 %v8573_v28  ;;  %v10293_v36 = vpop.f32.mrb[7].mxu1  ;;  %7724 = vmatmul.mubr.f32.vlgmr.msra.gmra.mrb[128].mxu0 %v5725_v30  ;;  %v5752_v42 = vunpack.c.l.bf16 %v5824_v12 }
 0x24f   :  { %6948 = vmatprep.mubr.f32.mxu1 %v653_v14  ;;  %7726 = vmatprep.mubr.f32.mxu0 %v5728_v44  ;;  %v5127_v44 = vld [vmem:[%s11805_s3 + $0x128] sm:$0xff] }
 0x250   :  { %6949 = vmatmul.mubr.f32.gmra.mrb[22].mxu1 %v6894_v49  ;;  %v8633_v49 = vpack.c.bf16 %v5127_v44, %v5126_v33  ;;  %v5167_v33 = vld [vmem:[%s11805_s3 + $0x1e8] sm:$0xff] }
 0x251   :  { %v6897_v39 = vpop.f32.mrb[24].mxu0  ;;  %8576 = vmatpush3.bf16.msra.mxu1 %v8573_v28  ;;  %v10304_v41 = vpop.f32.mrb[8].mxu1  ;;  %v8629_v28 = vpack.c.bf16 %v5125_v23, %v5124_v22 }
 0x252   :  { %v663_v62 = vpop.f32.mrb[25].mxu0  ;;  %8578 = vmatprep.subr.bf16.mxu1 %v8577_v48  ;;  %v10306_v8 = vpop.f32.mrb[9].mxu1  ;;  %7727 = vmatmul.mubr.f32.gmra.mrb[130].mxu0 %v5729_v56  ;;  %v5128_v56 = vld [vmem:[%s11805_s3 + $0x130] sm:$0xff] }
 0x253   :  { %6951 = vmatprep.mubr.f32.mxu1 %v663_v62  ;;  %7729 = vmatprep.mubr.f32.mxu0 %v5732_v38  ;;  %v5130_v38 = vld [vmem:[%s11805_s3 + $0x140] sm:$0xff]  ;;  %v5132_v62 = vld [vmem:[%s11805_s3 + $0x150] sm:$0xff] }
 0x254   :  { %6952 = vmatmul.mubr.f32.gmra.mrb[24].mxu1 %v6897_v39 }
 0x255   :  { %v6900_v15 = vpop.f32.mrb[26].mxu0  ;;  %8580 = vmatpush3.bf16.msra.mxu1 %v8577_v48  ;;  %v10317_v3 = vpop.f32.mrb[10].mxu1  ;;  %v5753_v48 = vunpack.c.h.bf16 %v5824_v12  ;;  %v5165_v12 = vld [vmem:[%s11805_s3 + $0x1d8] sm:$0xff] }
 0x256   :  { %v673_v26 = vpop.f32.mrb[27].mxu0  ;;  %8582 = vmatprep.subr.bf16.mxu1 %v8581_v43  ;;  %v10319_v4 = vpop.f32.mrb[11].mxu1  ;;  %7730 = vmatmul.mubr.f32.gmra.mrb[132].mxu0 %v5733_v45 }
 0x257   :  { %6954 = vmatprep.mubr.f32.mxu1 %v673_v26  ;;  %7732 = vmatprep.mubr.f32.mxu0 %v5736_v18 }
 0x258   :  { %6955 = vmatmul.mubr.f32.gmra.mrb[26].mxu1 %v6900_v15  ;;  %v5137_v15 = vld [vmem:[%s11805_s3 + $0x178] sm:$0xff] }
 0x259   :  { %v6903_v9 = vpop.f32.mrb[28].mxu0  ;;  %8584 = vmatpush3.bf16.msra.mxu1 %v8581_v43  ;;  %v10330_v52 = vpop.f32.mrb[12].mxu1  ;;  %v5133_v43 = vld [vmem:[%s11805_s3 + $0x158] sm:$0xff]  ;;  %v8653_v26 = vpack.c.bf16 %v5137_v15, %v5136_v47 }
 0x25a   :  { %v683_v55 = vpop.f32.mrb[29].mxu0  ;;  %8586 = vmatprep.subr.bf16.mxu1 %v8585_v24  ;;  %v10332_v58 = vpop.f32.mrb[13].mxu1  ;;  %7733 = vmatmul.mubr.f32.gmra.mrb[134].mxu0 %v5737_v34  ;;  %v5155_v34 = vld [vmem:[%s11805_s3 + $0x188] sm:$0xff] }
 0x25b   :  { %6957 = vmatprep.mubr.f32.mxu1 %v683_v55  ;;  %7735 = vmatprep.mubr.f32.mxu0 %v5740_v5  ;;  %v5156_v5 = vld [vmem:[%s11805_s3 + $0x190] sm:$0xff] }
 0x25c   :  { %6958 = vmatmul.mubr.f32.gmra.mrb[28].mxu1 %v6903_v9 }
 0x25d   :  { %v6906_v16 = vpop.f32.mrb[30].mxu0  ;;  %8588 = vmatpush3.bf16.msra.mxu1 %v8585_v24  ;;  %v10343_v11 = vpop.f32.mrb[14].mxu1 }
 0x25e   :  { %v693_v17 = vpop.f32.mrb[31].mxu0  ;;  %8590 = vmatprep.subr.bf16.mxu1 %v8589_v57  ;;  %v10345_v21 = vpop.f32.mrb[15].mxu1  ;;  %7736 = vmatmul.mubr.f32.gmra.mrb[136].mxu0 %v5741_v10 }
 0x25f   :  { %6960 = vmatprep.mubr.f32.mxu1 %v693_v17  ;;  %7738 = vmatprep.mubr.f32.mxu0 %v5744_v63  ;;  %v5160_v63 = vld [vmem:[%s11805_s3 + $0x1b0] sm:$0xff] }
 0x260   :  { %6961 = vmatmul.mubr.f32.gmra.mrb[30].mxu1 %v6906_v16 }
 0x261   :  { %8592 = vmatpush3.bf16.msra.mxu1 %v8589_v57  ;;  %6995 = vmatprep.mubr.f32.mxu1 %v10245_v59  ;;  %v10357_v13 = vpop.f32.mrb[32].mxu0  ;;  %v5158_v57 = vld [vmem:[%s11805_s3 + $0x1a0] sm:$0xff] }
 0x262   :  { %8626 = vmatprep.subr.bf16.mxu1 %v8625_v19  ;;  %v10359_v30 = vpop.f32.mrb[33].mxu0  ;;  %7739 = vmatmul.mubr.f32.gmra.mrb[138].mxu0 %v5745_v25 }
 0x263   :  { %7741 = vmatprep.mubr.f32.mxu0 %v5748_v40  ;;  %v5164_v40 = vld [vmem:[%s11805_s3 + $0x1d0] sm:$0xff] }
 0x264   :  { %6996 = vmatmul.mubr.f32.vlgmr.msra.gmra.mrb[16].mxu1 %v10243_v53 }
 0x265   :  { %8628 = vmatpush3.bf16.msra.mxu1 %v8625_v19  ;;  %6998 = vmatprep.mubr.f32.mxu1 %v10264_v20  ;;  %v10369_v59 = vpop.f32.mrb[34].mxu0  ;;  %v8637_v20 = vpack.c.bf16 %v5129_v37, %v5128_v56  ;;  %v5162_v19 = vld [vmem:[%s11805_s3 + $0x1c0] sm:$0xff] }
 0x266   :  { %8630 = vmatprep.subr.bf16.mxu1 %v8629_v28  ;;  %v10371_v14 = vpop.f32.mrb[35].mxu0  ;;  %7742 = vmatmul.mubr.f32.gmra.mrb[140].mxu0 %v5749_v31  ;;  %v5166_v31 = vld [vmem:[%s11805_s3 + $0x1e0] sm:$0xff] }
 0x267   :  { %7744 = vmatprep.mubr.f32.mxu0 %v5752_v42  ;;  %v8713_v42 = vpack.c.bf16 %v5167_v33, %v5166_v31 }
 0x268   :  { %6999 = vmatmul.mubr.f32.gmra.mrb[18].mxu1 %v10259_v2 }
 0x269   :  { %8632 = vmatpush3.bf16.msra.mxu1 %v8629_v28  ;;  %7001 = vmatprep.mubr.f32.mxu1 %v10279_v29  ;;  %v10381_v53 = vpop.f32.mrb[36].mxu0  ;;  %v8641_v29 = vpack.c.bf16 %v5131_v0, %v5130_v38  ;;  %v8709_v28 = vpack.c.bf16 %v5165_v12, %v5164_v40 }
 0x26a   :  { %8634 = vmatprep.subr.bf16.mxu1 %v8633_v49  ;;  %v10383_v54 = vpop.f32.mrb[37].mxu0  ;;  %7745 = vmatmul.mubr.f32.gmra.mrb[142].mxu0 %v5753_v48 }
 0x26c   :  { %7002 = vmatmul.mubr.f32.gmra.mrb[20].mxu1 %v10277_v27 }
 0x26d   :  { %8636 = vmatpush3.bf16.msra.mxu1 %v8633_v49  ;;  %7004 = vmatprep.mubr.f32.mxu1 %v10293_v36  ;;  %v10393_v2 = vpop.f32.mrb[38].mxu0  ;;  %v8645_v36 = vpack.c.bf16 %v5133_v43, %v5132_v62  ;;  %v5168_v49 = vld [vmem:[%s11805_s3 + $0x1f0] sm:$0xff] }
 0x26e   :  { %8638 = vmatprep.subr.bf16.mxu1 %v8637_v20  ;;  %v10395_v39 = vpop.f32.mrb[39].mxu0 }
 0x270   :  { %7005 = vmatmul.mubr.f32.gmra.mrb[22].mxu1 %v10291_v35 }
 0x271   :  { %8640 = vmatpush3.bf16.msra.mxu1 %v8637_v20  ;;  %7007 = vmatprep.mubr.f32.mxu1 %v10306_v8  ;;  %v10405_v27 = vpop.f32.mrb[40].mxu0  ;;  %v8649_v8 = vpack.c.bf16 %v5135_v46, %v5134_v6  ;;  %v5187_v20 = vld [vmem:[%s11805_s3 + $0x208] sm:$0xff] }
 0x272   :  { %8642 = vmatprep.subr.bf16.mxu1 %v8641_v29  ;;  %v10407_v45 = vpop.f32.mrb[41].mxu0 }
 0x274   :  { %7008 = vmatmul.mubr.f32.gmra.mrb[24].mxu1 %v10304_v41 }
 0x275   :  { %8644 = vmatpush3.bf16.msra.mxu1 %v8641_v29  ;;  %7010 = vmatprep.mubr.f32.mxu1 %v10319_v4  ;;  %v10417_v35 = vpop.f32.mrb[42].mxu0  ;;  %v5154_v4 = vld [vmem:[%s11805_s3 + $0x180] sm:$0xff]  ;;  %v5189_v29 = vld [vmem:[%s11805_s3 + $0x218] sm:$0xff] }
 0x276   :  { %8646 = vmatprep.subr.bf16.mxu1 %v8645_v36  ;;  %v10419_v18 = vpop.f32.mrb[43].mxu0  ;;  %v8689_v32 = vpack.c.bf16 %v5155_v34, %v5154_v4 }
 0x278   :  { %7011 = vmatmul.mubr.f32.gmra.mrb[26].mxu1 %v10317_v3 }
 0x279   :  { %8648 = vmatpush3.bf16.msra.mxu1 %v8645_v36  ;;  %7013 = vmatprep.mubr.f32.mxu1 %v10332_v58  ;;  %v10429_v41 = vpop.f32.mrb[44].mxu0  ;;  %v5159_v58 = vld [vmem:[%s11805_s3 + $0x1a8] sm:$0xff] }
 0x27a   :  { %8650 = vmatprep.subr.bf16.mxu1 %v8649_v8  ;;  %v10431_v24 = vpop.f32.mrb[45].mxu0  ;;  %v8697_v60 = vpack.c.bf16 %v5159_v58, %v5158_v57  ;;  %v5191_v36 = vld [vmem:[%s11805_s3 + $0x228] sm:$0xff] }
 0x27c   :  { %7014 = vmatmul.mubr.f32.gmra.mrb[28].mxu1 %v10330_v52  ;;  %v8693_v52 = vpack.c.bf16 %v5157_v51, %v5156_v5 }
 0x27d   :  { %8652 = vmatpush3.bf16.msra.mxu1 %v8649_v8  ;;  %7016 = vmatprep.mubr.f32.mxu1 %v10345_v21  ;;  %v10441_v3 = vpop.f32.mrb[46].mxu0  ;;  %v5163_v21 = vld [vmem:[%s11805_s3 + $0x1c8] sm:$0xff]  ;;  %v5193_v8 = vld [vmem:[%s11805_s3 + $0x238] sm:$0xff] }
 0x27e   :  { %8654 = vmatprep.subr.bf16.mxu1 %v8653_v26  ;;  %v10443_v50 = vpop.f32.mrb[47].mxu0  ;;  %v8705_v22 = vpack.c.bf16 %v5163_v21, %v5162_v19 }
 0x280   :  { %7017 = vmatmul.mubr.f32.gmra.mrb[30].mxu1 %v10343_v11  ;;  %v8701_v11 = vpack.c.bf16 %v5161_v1, %v5160_v63 }
 0x281   :  { %8656 = vmatpush3.bf16.msra.mxu1 %v8653_v26  ;;  %7107 = vmatprep.mubr.f32.mxu1 %v10359_v30  ;;  %v10453_v9 = vpop.f32.mrb[48].mxu0  ;;  %v5195_v26 = vld [vmem:[%s11805_s3 + $0x248] sm:$0xff] }
 0x282   :  { %8690 = vmatprep.subr.bf16.mxu1 %v8689_v32  ;;  %v10455_v55 = vpop.f32.mrb[49].mxu0 }
 0x284   :  { %7108 = vmatmul.mubr.f32.vlgmr.msra.gmra.mrb[16].mxu1 %v10357_v13 }
 0x285   :  { %8692 = vmatpush3.bf16.msra.mxu1 %v8689_v32  ;;  %7110 = vmatprep.mubr.f32.mxu1 %v10371_v14  ;;  %v10465_v10 = vpop.f32.mrb[50].mxu0  ;;  %v5169_v14 = vld [vmem:[%s11805_s3 + $0x1f8] sm:$0xff] }
 0x286   :  { %8694 = vmatprep.subr.bf16.mxu1 %v8693_v52  ;;  %v10467_v61 = vpop.f32.mrb[51].mxu0  ;;  %v8717_v56 = vpack.c.bf16 %v5169_v14, %v5168_v49  ;;  %v5197_v32 = vld [vmem:[%s11805_s3 + $0x258] sm:$0xff] }
 0x288   :  { %7111 = vmatmul.mubr.f32.gmra.mrb[18].mxu1 %v10369_v59 }
 0x289   :  { %8696 = vmatpush3.bf16.msra.mxu1 %v8693_v52  ;;  %7113 = vmatprep.mubr.f32.mxu1 %v10383_v54  ;;  %v10477_v16 = vpop.f32.mrb[52].mxu0  ;;  %v5199_v52 = vld [vmem:[%s11805_s3 + $0x268] sm:$0xff] }
 0x28a   :  { %8698 = vmatprep.subr.bf16.mxu1 %v8697_v60  ;;  %v10479_v17 = vpop.f32.mrb[53].mxu0 }
 0x28c   :  { %7114 = vmatmul.mubr.f32.gmra.mrb[20].mxu1 %v10381_v53  ;;  %v5186_v53 = vld [vmem:[%s11805_s3 + $0x200] sm:$0xff] }
 0x28d   :  { %8700 = vmatpush3.bf16.msra.mxu1 %v8697_v60  ;;  %7116 = vmatprep.mubr.f32.mxu1 %v10395_v39  ;;  %v10489_v25 = vpop.f32.mrb[54].mxu0  ;;  %v8753_v38 = vpack.c.bf16 %v5187_v20, %v5186_v53  ;;  %v5201_v60 = vld [vmem:[%s11805_s3 + $0x278] sm:$0xff] }
 0x28e   :  { %8702 = vmatprep.subr.bf16.mxu1 %v8701_v11  ;;  %v10491_v23 = vpop.f32.mrb[55].mxu0 }
 0x290   :  { %7117 = vmatmul.mubr.f32.gmra.mrb[22].mxu1 %v10393_v2  ;;  %v5188_v2 = vld [vmem:[%s11805_s3 + $0x210] sm:$0xff] }
 0x291   :  { %8704 = vmatpush3.bf16.msra.mxu1 %v8701_v11  ;;  %7119 = vmatprep.mubr.f32.mxu1 %v10407_v45  ;;  %v10501_v13 = vpop.f32.mrb[56].mxu0  ;;  %v8757_v62 = vpack.c.bf16 %v5189_v29, %v5188_v2  ;;  %v5219_v11 = vld [vmem:[%s11805_s3 + $0x288] sm:$0xff] }
 0x292   :  { %8706 = vmatprep.subr.bf16.mxu1 %v8705_v22  ;;  %v10503_v30 = vpop.f32.mrb[57].mxu0 }
 0x294   :  { %7120 = vmatmul.mubr.f32.gmra.mrb[24].mxu1 %v10405_v27  ;;  %v5190_v27 = vld [vmem:[%s11805_s3 + $0x220] sm:$0xff] }
 0x295   :  { %8708 = vmatpush3.bf16.msra.mxu1 %v8705_v22  ;;  %7122 = vmatprep.mubr.f32.mxu1 %v10419_v18  ;;  %v10513_v44 = vpop.f32.mrb[58].mxu0  ;;  %v8761_v6 = vpack.c.bf16 %v5191_v36, %v5190_v27  ;;  %v5221_v22 = vld [vmem:[%s11805_s3 + $0x298] sm:$0xff] }
 0x296   :  { %8710 = vmatprep.subr.bf16.mxu1 %v8709_v28  ;;  %v10515_v59 = vpop.f32.mrb[59].mxu0 }
 0x298   :  { %7123 = vmatmul.mubr.f32.gmra.mrb[26].mxu1 %v10417_v35  ;;  %v5192_v35 = vld [vmem:[%s11805_s3 + $0x230] sm:$0xff] }
 0x299   :  { %8712 = vmatpush3.bf16.msra.mxu1 %v8709_v28  ;;  %7125 = vmatprep.mubr.f32.mxu1 %v10431_v24  ;;  %v10525_v48 = vpop.f32.mrb[60].mxu0  ;;  %v8765_v47 = vpack.c.bf16 %v5193_v8, %v5192_v35  ;;  %v5223_v28 = vld [vmem:[%s11805_s3 + $0x2a8] sm:$0xff] }
 0x29a   :  { %8714 = vmatprep.subr.bf16.mxu1 %v8713_v42  ;;  %v10527_v37 = vpop.f32.mrb[61].mxu0 }
 0x29c   :  { %7126 = vmatmul.mubr.f32.gmra.mrb[28].mxu1 %v10429_v41  ;;  %v5194_v41 = vld [vmem:[%s11805_s3 + $0x240] sm:$0xff] }
 0x29d   :  { %8716 = vmatpush3.bf16.msra.mxu1 %v8713_v42  ;;  %7128 = vmatprep.mubr.f32.mxu1 %v10443_v50  ;;  %v10537_v54 = vpop.f32.mrb[62].mxu0  ;;  %v8769_v4 = vpack.c.bf16 %v5195_v26, %v5194_v41  ;;  %v5225_v42 = vld [vmem:[%s11805_s3 + $0x2b8] sm:$0xff] }
 0x29e   :  { %8718 = vmatprep.subr.bf16.mxu1 %v8717_v56  ;;  %v10539_v0 = vpop.f32.mrb[63].mxu0 }
 0x2a0   :  { %7129 = vmatmul.mubr.f32.gmra.mrb[30].mxu1 %v10441_v3  ;;  %v5196_v3 = vld [vmem:[%s11805_s3 + $0x250] sm:$0xff] }
 0x2a1   :  { %8720 = vmatpush3.bf16.msra.mxu1 %v8717_v56  ;;  %7219 = vmatprep.mubr.f32.mxu1 %v10455_v55  ;;  %v10549_v39 = vpop.f32.mrb[64].mxu0  ;;  %v8773_v5 = vpack.c.bf16 %v5197_v32, %v5196_v3  ;;  %v5227_v56 = vld [vmem:[%s11805_s3 + $0x2c8] sm:$0xff] }
 0x2a2   :  { %8754 = vmatprep.subr.bf16.mxu1 %v8753_v38  ;;  %v10551_v43 = vpop.f32.mrb[65].mxu0 }
 0x2a4   :  { %7220 = vmatmul.mubr.f32.vlgmr.msra.gmra.mrb[16].mxu1 %v10453_v9  ;;  %v5198_v9 = vld [vmem:[%s11805_s3 + $0x260] sm:$0xff] }
 0x2a5   :  { %8756 = vmatpush3.bf16.msra.mxu1 %v8753_v38  ;;  %7222 = vmatprep.mubr.f32.mxu1 %v10467_v61  ;;  %v10561_v45 = vpop.f32.mrb[66].mxu0  ;;  %v8777_v57 = vpack.c.bf16 %v5199_v52, %v5198_v9  ;;  %v5229_v38 = vld [vmem:[%s11805_s3 + $0x2d8] sm:$0xff] }
 0x2a6   :  { %8758 = vmatprep.subr.bf16.mxu1 %v8757_v62  ;;  %v10563_v46 = vpop.f32.mrb[67].mxu0 }
 0x2a8   :  { %7223 = vmatmul.mubr.f32.gmra.mrb[18].mxu1 %v10465_v10  ;;  %v5200_v10 = vld [vmem:[%s11805_s3 + $0x270] sm:$0xff] }
 0x2a9   :  { %8760 = vmatpush3.bf16.msra.mxu1 %v8757_v62  ;;  %7225 = vmatprep.mubr.f32.mxu1 %v10479_v17  ;;  %v10573_v18 = vpop.f32.mrb[68].mxu0  ;;  %v8781_v63 = vpack.c.bf16 %v5201_v60, %v5200_v10  ;;  %v5231_v62 = vld [vmem:[%s11805_s3 + $0x2e8] sm:$0xff] }
 0x2aa   :  { %8762 = vmatprep.subr.bf16.mxu1 %v8761_v6  ;;  %v10575_v15 = vpop.f32.mrb[69].mxu0 }
 0x2ac   :  { %7226 = vmatmul.mubr.f32.gmra.mrb[20].mxu1 %v10477_v16  ;;  %v5218_v16 = vld [vmem:[%s11805_s3 + $0x280] sm:$0xff] }
 0x2ad   :  { %8764 = vmatpush3.bf16.msra.mxu1 %v8761_v6  ;;  %7228 = vmatprep.mubr.f32.mxu1 %v10491_v23  ;;  %v10585_v24 = vpop.f32.mrb[70].mxu0  ;;  %v8817_v19 = vpack.c.bf16 %v5219_v11, %v5218_v16  ;;  %v5233_v6 = vld [vmem:[%s11805_s3 + $0x2f8] sm:$0xff] }
 0x2ae   :  { %8766 = vmatprep.subr.bf16.mxu1 %v8765_v47  ;;  %v10587_v34 = vpop.f32.mrb[71].mxu0 }
 0x2b0   :  { %7229 = vmatmul.mubr.f32.gmra.mrb[22].mxu1 %v10489_v25  ;;  %v5220_v25 = vld [vmem:[%s11805_s3 + $0x290] sm:$0xff] }
 0x2b1   :  { %8768 = vmatpush3.bf16.msra.mxu1 %v8765_v47  ;;  %7231 = vmatprep.mubr.f32.mxu1 %v10503_v30  ;;  %v10597_v50 = vpop.f32.mrb[72].mxu0  ;;  %v8821_v40 = vpack.c.bf16 %v5221_v22, %v5220_v25  ;;  %v5251_v47 = vld [vmem:[%s11805_s3 + $0x308] sm:$0xff] }
 0x2b2   :  { %8770 = vmatprep.subr.bf16.mxu1 %v8769_v4  ;;  %v10599_v51 = vpop.f32.mrb[73].mxu0 }
 0x2b4   :  { %7232 = vmatmul.mubr.f32.gmra.mrb[24].mxu1 %v10501_v13  ;;  %v5222_v13 = vld [vmem:[%s11805_s3 + $0x2a0] sm:$0xff] }
 0x2b5   :  { %8772 = vmatpush3.bf16.msra.mxu1 %v8769_v4  ;;  %7234 = vmatprep.mubr.f32.mxu1 %v10515_v59  ;;  %v10609_v55 = vpop.f32.mrb[74].mxu0  ;;  %v8825_v31 = vpack.c.bf16 %v5223_v28, %v5222_v13  ;;  %v5253_v4 = vld [vmem:[%s11805_s3 + $0x318] sm:$0xff] }
 0x2b6   :  { %8774 = vmatprep.subr.bf16.mxu1 %v8773_v5  ;;  %v10611_v58 = vpop.f32.mrb[75].mxu0 }
 0x2b8   :  { %7235 = vmatmul.mubr.f32.gmra.mrb[26].mxu1 %v10513_v44  ;;  %v5224_v44 = vld [vmem:[%s11805_s3 + $0x2b0] sm:$0xff] }
 0x2b9   :  { %8776 = vmatpush3.bf16.msra.mxu1 %v8773_v5  ;;  %7237 = vmatprep.mubr.f32.mxu1 %v10527_v37  ;;  %v10621_v61 = vpop.f32.mrb[76].mxu0  ;;  %v8829_v49 = vpack.c.bf16 %v5225_v42, %v5224_v44  ;;  %v5255_v5 = vld [vmem:[%s11805_s3 + $0x328] sm:$0xff] }
 0x2ba   :  { %8778 = vmatprep.subr.bf16.mxu1 %v8777_v57  ;;  %v10623_v1 = vpop.f32.mrb[77].mxu0 }
 0x2bc   :  { %7238 = vmatmul.mubr.f32.gmra.mrb[28].mxu1 %v10525_v48  ;;  %v5226_v48 = vld [vmem:[%s11805_s3 + $0x2c0] sm:$0xff] }
 0x2bd   :  { %8780 = vmatpush3.bf16.msra.mxu1 %v8777_v57  ;;  %7240 = vmatprep.mubr.f32.mxu1 %v10539_v0  ;;  %v10633_v17 = vpop.f32.mrb[78].mxu0  ;;  %v8833_v53 = vpack.c.bf16 %v5227_v56, %v5226_v48  ;;  %v5257_v57 = vld [vmem:[%s11805_s3 + $0x338] sm:$0xff] }
 0x2be   :  { %8782 = vmatprep.subr.bf16.mxu1 %v8781_v63  ;;  %v10635_v21 = vpop.f32.mrb[79].mxu0 }
 0x2c0   :  { %7241 = vmatmul.mubr.f32.gmra.mrb[30].mxu1 %v10537_v54  ;;  %v5228_v54 = vld [vmem:[%s11805_s3 + $0x2d0] sm:$0xff] }
 0x2c1   :  { %8784 = vmatpush3.bf16.msra.mxu1 %v8781_v63  ;;  %7331 = vmatprep.mubr.f32.mxu1 %v10551_v43  ;;  %v10645_v23 = vpop.f32.mrb[80].mxu0  ;;  %v8837_v2 = vpack.c.bf16 %v5229_v38, %v5228_v54  ;;  %v5259_v63 = vld [vmem:[%s11805_s3 + $0x348] sm:$0xff] }
 0x2c2   :  { %8818 = vmatprep.subr.bf16.mxu1 %v8817_v19  ;;  %v10647_v12 = vpop.f32.mrb[81].mxu0 }
 0x2c4   :  { %7332 = vmatmul.mubr.f32.vlgmr.msra.gmra.mrb[16].mxu1 %v10549_v39  ;;  %v5230_v39 = vld [vmem:[%s11805_s3 + $0x2e0] sm:$0xff] }
 0x2c5   :  { %8820 = vmatpush3.bf16.msra.mxu1 %v8817_v19  ;;  %7334 = vmatprep.mubr.f32.mxu1 %v10563_v46  ;;  %v10657_v30 = vpop.f32.mrb[82].mxu0  ;;  %v8841_v27 = vpack.c.bf16 %v5231_v62, %v5230_v39  ;;  %v5261_v19 = vld [vmem:[%s11805_s3 + $0x358] sm:$0xff] }
 0x2c6   :  { %8822 = vmatprep.subr.bf16.mxu1 %v8821_v40  ;;  %v10659_v33 = vpop.f32.mrb[83].mxu0 }
 0x2c8   :  { %7335 = vmatmul.mubr.f32.gmra.mrb[18].mxu1 %v10561_v45  ;;  %v5232_v45 = vld [vmem:[%s11805_s3 + $0x2f0] sm:$0xff] }
 0x2c9   :  { %8824 = vmatpush3.bf16.msra.mxu1 %v8821_v40  ;;  %7337 = vmatprep.mubr.f32.mxu1 %v10575_v15  ;;  %v10669_v59 = vpop.f32.mrb[84].mxu0  ;;  %v8845_v35 = vpack.c.bf16 %v5233_v6, %v5232_v45  ;;  %v5263_v40 = vld [vmem:[%s11805_s3 + $0x368] sm:$0xff] }
 0x2ca   :  { %8826 = vmatprep.subr.bf16.mxu1 %v8825_v31  ;;  %v10671_v14 = vpop.f32.mrb[85].mxu0 }
 0x2cc   :  { %7338 = vmatmul.mubr.f32.gmra.mrb[20].mxu1 %v10573_v18  ;;  %v5250_v18 = vld [vmem:[%s11805_s3 + $0x300] sm:$0xff] }
 0x2cd   :  { %8828 = vmatpush3.bf16.msra.mxu1 %v8825_v31  ;;  %7340 = vmatprep.mubr.f32.mxu1 %v10587_v34  ;;  %v10681_v37 = vpop.f32.mrb[86].mxu0  ;;  %v8881_v41 = vpack.c.bf16 %v5251_v47, %v5250_v18  ;;  %v5265_v31 = vld [vmem:[%s11805_s3 + $0x378] sm:$0xff] }
 0x2ce   :  { %8830 = vmatprep.subr.bf16.mxu1 %v8829_v49  ;;  %v10683_v20 = vpop.f32.mrb[87].mxu0 }
 0x2d0   :  { %7341 = vmatmul.mubr.f32.gmra.mrb[22].mxu1 %v10585_v24  ;;  %v5252_v24 = vld [vmem:[%s11805_s3 + $0x310] sm:$0xff] }
 0x2d1   :  { %8832 = vmatpush3.bf16.msra.mxu1 %v8829_v49  ;;  %7343 = vmatprep.mubr.f32.mxu1 %v10599_v51  ;;  %v10693_v0 = vpop.f32.mrb[88].mxu0  ;;  %v8885_v3 = vpack.c.bf16 %v5253_v4, %v5252_v24  ;;  %v5283_v49 = vld [vmem:[%s11805_s3 + $0x388] sm:$0xff] }
 0x2d2   :  { %8834 = vmatprep.subr.bf16.mxu1 %v8833_v53  ;;  %v10695_v29 = vpop.f32.mrb[89].mxu0 }
 0x2d4   :  { %7344 = vmatmul.mubr.f32.gmra.mrb[24].mxu1 %v10597_v50  ;;  %v5254_v50 = vld [vmem:[%s11805_s3 + $0x320] sm:$0xff] }
 0x2d5   :  { %8836 = vmatpush3.bf16.msra.mxu1 %v8833_v53  ;;  %7346 = vmatprep.mubr.f32.mxu1 %v10611_v58  ;;  %v10705_v43 = vpop.f32.mrb[90].mxu0  ;;  %v8889_v9 = vpack.c.bf16 %v5255_v5, %v5254_v50  ;;  %v5285_v53 = vld [vmem:[%s11805_s3 + $0x398] sm:$0xff] }
 0x2d6   :  { %8838 = vmatprep.subr.bf16.mxu1 %v8837_v2  ;;  %v10707_v36 = vpop.f32.mrb[91].mxu0 }
 0x2d8   :  { %7347 = vmatmul.mubr.f32.gmra.mrb[26].mxu1 %v10609_v55  ;;  %v5256_v55 = vld [vmem:[%s11805_s3 + $0x330] sm:$0xff] }
 0x2d9   :  { %8840 = vmatpush3.bf16.msra.mxu1 %v8837_v2  ;;  %7349 = vmatprep.mubr.f32.mxu1 %v10623_v1  ;;  %v10717_v46 = vpop.f32.mrb[92].mxu0  ;;  %v8893_v10 = vpack.c.bf16 %v5257_v57, %v5256_v55  ;;  %v5287_v2 = vld [vmem:[%s11805_s3 + $0x3a8] sm:$0xff] }
 0x2da   :  { %8842 = vmatprep.subr.bf16.mxu1 %v8841_v27  ;;  %v10719_v8 = vpop.f32.mrb[93].mxu0 }
 0x2dc   :  { %7350 = vmatmul.mubr.f32.gmra.mrb[28].mxu1 %v10621_v61  ;;  %v5258_v61 = vld [vmem:[%s11805_s3 + $0x340] sm:$0xff] }
 0x2dd   :  { %8844 = vmatpush3.bf16.msra.mxu1 %v8841_v27  ;;  %7352 = vmatprep.mubr.f32.mxu1 %v10635_v21  ;;  %v10729_v15 = vpop.f32.mrb[94].mxu0  ;;  %v8897_v16 = vpack.c.bf16 %v5259_v63, %v5258_v61  ;;  %v5289_v27 = vld [vmem:[%s11805_s3 + $0x3b8] sm:$0xff] }
 0x2de   :  { %8846 = vmatprep.subr.bf16.mxu1 %v8845_v35  ;;  %v10731_v26 = vpop.f32.mrb[95].mxu0 }
 0x2e0   :  { %7353 = vmatmul.mubr.f32.gmra.mrb[30].mxu1 %v10633_v17  ;;  %v5260_v17 = vld [vmem:[%s11805_s3 + $0x350] sm:$0xff] }
 0x2e1   :  { %8848 = vmatpush3.bf16.msra.mxu1 %v8845_v35  ;;  %7443 = vmatprep.mubr.f32.mxu1 %v10647_v12  ;;  %v10741_v34 = vpop.f32.mrb[96].mxu0  ;;  %v8901_v25 = vpack.c.bf16 %v5261_v19, %v5260_v17  ;;  %v5291_v35 = vld [vmem:[%s11805_s3 + $0x3c8] sm:$0xff] }
 0x2e2   :  { %8882 = vmatprep.subr.bf16.mxu1 %v8881_v41  ;;  %v10743_v32 = vpop.f32.mrb[97].mxu0 }
 0x2e4   :  { %7444 = vmatmul.mubr.f32.vlgmr.msra.gmra.mrb[16].mxu1 %v10645_v23  ;;  %v5262_v23 = vld [vmem:[%s11805_s3 + $0x360] sm:$0xff] }
 0x2e5   :  { %8884 = vmatpush3.bf16.msra.mxu1 %v8881_v41  ;;  %7446 = vmatprep.mubr.f32.mxu1 %v10659_v33  ;;  %v10753_v51 = vpop.f32.mrb[98].mxu0  ;;  %v8905_v13 = vpack.c.bf16 %v5263_v40, %v5262_v23  ;;  %v5293_v41 = vld [vmem:[%s11805_s3 + $0x3d8] sm:$0xff] }
 0x2e6   :  { %8886 = vmatprep.subr.bf16.mxu1 %v8885_v3  ;;  %v10755_v52 = vpop.f32.mrb[99].mxu0 }
 0x2e8   :  { %7447 = vmatmul.mubr.f32.gmra.mrb[18].mxu1 %v10657_v30  ;;  %v5264_v30 = vld [vmem:[%s11805_s3 + $0x370] sm:$0xff] }
 0x2e9   :  { %8888 = vmatpush3.bf16.msra.mxu1 %v8885_v3  ;;  %7449 = vmatprep.mubr.f32.mxu1 %v10671_v14  ;;  %v10765_v58 = vpop.f32.mrb[100].mxu0  ;;  %v8909_v44 = vpack.c.bf16 %v5265_v31, %v5264_v30  ;;  %v5295_v3 = vld [vmem:[%s11805_s3 + $0x3e8] sm:$0xff] }
 0x2ea   :  { %8890 = vmatprep.subr.bf16.mxu1 %v8889_v9  ;;  %v10767_v60 = vpop.f32.mrb[101].mxu0 }
 0x2ec   :  { %7450 = vmatmul.mubr.f32.gmra.mrb[20].mxu1 %v10669_v59  ;;  %v5282_v59 = vld [vmem:[%s11805_s3 + $0x380] sm:$0xff] }
 0x2ed   :  { %8892 = vmatpush3.bf16.msra.mxu1 %v8889_v9  ;;  %7452 = vmatprep.mubr.f32.mxu1 %v10683_v20  ;;  %v10777_v1 = vpop.f32.mrb[102].mxu0  ;;  %v8945_v48 = vpack.c.bf16 %v5283_v49, %v5282_v59  ;;  %v5297_v9 = vld [vmem:[%s11805_s3 + $0x3f8] sm:$0xff] }
 0x2ee   :  { %8894 = vmatprep.subr.bf16.mxu1 %v8893_v10  ;;  %v10779_v11 = vpop.f32.mrb[103].mxu0 }
 0x2f0   :  { %7453 = vmatmul.mubr.f32.gmra.mrb[22].mxu1 %v10681_v37  ;;  %v5284_v37 = vld [vmem:[%s11805_s3 + $0x390] sm:$0xff] }
 0x2f1   :  { %8896 = vmatpush3.bf16.msra.mxu1 %v8893_v10  ;;  %7455 = vmatprep.mubr.f32.mxu1 %v10695_v29  ;;  %v10789_v21 = vpop.f32.mrb[104].mxu0  ;;  %v8949_v54 = vpack.c.bf16 %v5285_v53, %v5284_v37  ;;  %v5315_v10 = vld [vmem:[%s11805_s3 + $0x408] sm:$0xff] }
 0x2f2   :  { %8898 = vmatprep.subr.bf16.mxu1 %v8897_v16  ;;  %v10791_v22 = vpop.f32.mrb[105].mxu0 }
 0x2f4   :  { %7456 = vmatmul.mubr.f32.gmra.mrb[24].mxu1 %v10693_v0  ;;  %v5286_v0 = vld [vmem:[%s11805_s3 + $0x3a0] sm:$0xff] }
 0x2f5   :  { %8900 = vmatpush3.bf16.msra.mxu1 %v8897_v16  ;;  %7458 = vmatprep.mubr.f32.mxu1 %v10707_v36  ;;  %v10801_v12 = vpop.f32.mrb[106].mxu0  ;;  %v8953_v39 = vpack.c.bf16 %v5287_v2, %v5286_v0  ;;  %v5317_v16 = vld [vmem:[%s11805_s3 + $0x418] sm:$0xff] }
 0x2f6   :  { %8902 = vmatprep.subr.bf16.mxu1 %v8901_v25  ;;  %v10803_v28 = vpop.f32.mrb[107].mxu0 }
 0x2f8   :  { %7459 = vmatmul.mubr.f32.gmra.mrb[26].mxu1 %v10705_v43  ;;  %v5288_v43 = vld [vmem:[%s11805_s3 + $0x3b0] sm:$0xff] }
 0x2f9   :  { %8904 = vmatpush3.bf16.msra.mxu1 %v8901_v25  ;;  %7461 = vmatprep.mubr.f32.mxu1 %v10719_v8  ;;  %v10813_v33 = vpop.f32.mrb[108].mxu0  ;;  %v8957_v45 = vpack.c.bf16 %v5289_v27, %v5288_v43  ;;  %v5319_v25 = vld [vmem:[%s11805_s3 + $0x428] sm:$0xff] }
 0x2fa   :  { %8906 = vmatprep.subr.bf16.mxu1 %v8905_v13  ;;  %v10815_v42 = vpop.f32.mrb[109].mxu0 }
 0x2fc   :  { %7462 = vmatmul.mubr.f32.gmra.mrb[28].mxu1 %v10717_v46  ;;  %v5290_v46 = vld [vmem:[%s11805_s3 + $0x3c0] sm:$0xff] }
 0x2fd   :  { %8908 = vmatpush3.bf16.msra.mxu1 %v8905_v13  ;;  %7464 = vmatprep.mubr.f32.mxu1 %v10731_v26  ;;  %v10825_v14 = vpop.f32.mrb[110].mxu0  ;;  %v8961_v18 = vpack.c.bf16 %v5291_v35, %v5290_v46  ;;  %v5321_v13 = vld [vmem:[%s11805_s3 + $0x438] sm:$0xff]  ;;  %v9612_v46 = vmov 0.0  }
 0x2fe   :  { %8910 = vmatprep.subr.bf16.mxu1 %v8909_v44  ;;  %v10827_v56 = vpop.f32.mrb[111].mxu0  ;;  %7835 = vmatprep.mubr.msk.f32.mxu0 %vm9611_vm0, %v9612_v46 }
 0x300   :  { %7465 = vmatmul.mubr.f32.gmra.mrb[30].mxu1 %v10729_v15  ;;  %v5292_v15 = vld [vmem:[%s11805_s3 + $0x3d0] sm:$0xff] }
 0x301   :  { %8912 = vmatpush3.bf16.msra.mxu1 %v8909_v44  ;;  %7555 = vmatprep.mubr.f32.mxu1 %v10743_v32  ;;  %v10837_v20 = vpop.f32.mrb[112].mxu0  ;;  %v8965_v24 = vpack.c.bf16 %v5293_v41, %v5292_v15  ;;  %v5323_v44 = vld [vmem:[%s11805_s3 + $0x448] sm:$0xff] }
 0x302   :  { %8946 = vmatprep.subr.bf16.mxu1 %v8945_v48  ;;  %v10839_v38 = vpop.f32.mrb[113].mxu0 }
 0x304   :  { %7556 = vmatmul.mubr.f32.vlgmr.msra.gmra.mrb[16].mxu1 %v10741_v34  ;;  %v5294_v34 = vld [vmem:[%s11805_s3 + $0x3e0] sm:$0xff] }
 0x305   :  { %8948 = vmatpush3.bf16.msra.mxu1 %v8945_v48  ;;  %7558 = vmatprep.mubr.f32.mxu1 %v10755_v52  ;;  %v10849_v29 = vpop.f32.mrb[114].mxu0  ;;  %v8969_v50 = vpack.c.bf16 %v5295_v3, %v5294_v34  ;;  %v5325_v48 = vld [vmem:[%s11805_s3 + $0x458] sm:$0xff] }
 0x306   :  { %8950 = vmatprep.subr.bf16.mxu1 %v8949_v54  ;;  %v10851_v62 = vpop.f32.mrb[115].mxu0 }
 0x308   :  { %7559 = vmatmul.mubr.f32.gmra.mrb[18].mxu1 %v10753_v51  ;;  %v5296_v51 = vld [vmem:[%s11805_s3 + $0x3f0] sm:$0xff] }
 0x309   :  { %8952 = vmatpush3.bf16.msra.mxu1 %v8949_v54  ;;  %7561 = vmatprep.mubr.f32.mxu1 %v10767_v60  ;;  %v10861_v36 = vpop.f32.mrb[116].mxu0  ;;  %v8973_v55 = vpack.c.bf16 %v5297_v9, %v5296_v51  ;;  %v5327_v54 = vld [vmem:[%s11805_s3 + $0x468] sm:$0xff] }
 0x30a   :  { %8954 = vmatprep.subr.bf16.mxu1 %v8953_v39  ;;  %v10863_v6 = vpop.f32.mrb[117].mxu0 }
 0x30c   :  { %7562 = vmatmul.mubr.f32.gmra.mrb[20].mxu1 %v10765_v58  ;;  %v5314_v58 = vld [vmem:[%s11805_s3 + $0x400] sm:$0xff] }
 0x30d   :  { %8956 = vmatpush3.bf16.msra.mxu1 %v8953_v39  ;;  %7564 = vmatprep.mubr.f32.mxu1 %v10779_v11  ;;  %v10873_v8 = vpop.f32.mrb[118].mxu0  ;;  %v9009_v61 = vpack.c.bf16 %v5315_v10, %v5314_v58  ;;  %v5329_v39 = vld [vmem:[%s11805_s3 + $0x478] sm:$0xff] }
 0x30e   :  { %8958 = vmatprep.subr.bf16.mxu1 %v8957_v45  ;;  %v10875_v47 = vpop.f32.mrb[119].mxu0 }
 0x310   :  { %7565 = vmatmul.mubr.f32.gmra.mrb[22].mxu1 %v10777_v1  ;;  %v5316_v1 = vld [vmem:[%s11805_s3 + $0x410] sm:$0xff] }
 0x311   :  { %8960 = vmatpush3.bf16.msra.mxu1 %v8957_v45  ;;  %7567 = vmatprep.mubr.f32.mxu1 %v10791_v22  ;;  %v10885_v26 = vpop.f32.mrb[120].mxu0  ;;  %v9013_v17 = vpack.c.bf16 %v5317_v16, %v5316_v1 }
 0x312   :  { %8962 = vmatprep.subr.bf16.mxu1 %v8961_v18  ;;  %v10887_v4 = vpop.f32.mrb[121].mxu0 }
 0x314   :  { %7568 = vmatmul.mubr.f32.gmra.mrb[24].mxu1 %v10789_v21  ;;  %v5318_v21 = vld [vmem:[%s11805_s3 + $0x420] sm:$0xff] }
 0x315   :  { %8964 = vmatpush3.bf16.msra.mxu1 %v8961_v18  ;;  %7570 = vmatprep.mubr.f32.mxu1 %v10803_v28  ;;  %v10897_v32 = vpop.f32.mrb[122].mxu0  ;;  %v9017_v23 = vpack.c.bf16 %v5319_v25, %v5318_v21 }
 0x316   :  { %8966 = vmatprep.subr.bf16.mxu1 %v8965_v24  ;;  %v10899_v5 = vpop.f32.mrb[123].mxu0 }
 0x318   :  { %7571 = vmatmul.mubr.f32.gmra.mrb[26].mxu1 %v10801_v12  ;;  %v5320_v12 = vld [vmem:[%s11805_s3 + $0x430] sm:$0xff] }
 0x319   :  { %8968 = vmatpush3.bf16.msra.mxu1 %v8965_v24  ;;  %7573 = vmatprep.mubr.f32.mxu1 %v10815_v42  ;;  %v10909_v52 = vpop.f32.mrb[124].mxu0  ;;  %v9021_v30 = vpack.c.bf16 %v5321_v13, %v5320_v12 }
 0x31a   :  { %8970 = vmatprep.subr.bf16.mxu1 %v8969_v50  ;;  %v10911_v57 = vpop.f32.mrb[125].mxu0 }
 0x31c   :  { %7574 = vmatmul.mubr.f32.gmra.mrb[28].mxu1 %v10813_v33  ;;  %v5322_v33 = vld [vmem:[%s11805_s3 + $0x440] sm:$0xff] }
 0x31d   :  { %8972 = vmatpush3.bf16.msra.mxu1 %v8969_v50  ;;  %7576 = vmatprep.mubr.f32.mxu1 %v10827_v56  ;;  %v10921_v60 = vpop.f32.mrb[126].mxu0  ;;  %v9025_v59 = vpack.c.bf16 %v5323_v44, %v5322_v33 }
 0x31e   :  { %8974 = vmatprep.subr.bf16.mxu1 %v8973_v55  ;;  %v10923_v63 = vpop.f32.mrb[127].mxu0 }
 0x320   :  { %7577 = vmatmul.mubr.f32.gmra.mrb[30].mxu1 %v10825_v14  ;;  %v5324_v14 = vld [vmem:[%s11805_s3 + $0x450] sm:$0xff] }
 0x321   :  { %8976 = vmatpush3.bf16.msra.mxu1 %v8973_v55  ;;  %7667 = vmatprep.mubr.f32.mxu1 %v10839_v38  ;;  %v10933_v11 = vpop.f32.mrb[128].mxu0  ;;  %v9029_v37 = vpack.c.bf16 %v5325_v48, %v5324_v14 }
 0x322   :  { %9010 = vmatprep.subr.bf16.mxu1 %v9009_v61  ;;  %v3244_v19 = vpop.f32.mrb[129].mxu0 }
 0x324   :  { %7668 = vmatmul.mubr.f32.vlgmr.msra.gmra.mrb[16].mxu1 %v10837_v20  ;;  %v5326_v20 = vld [vmem:[%s11805_s3 + $0x460] sm:$0xff] }
 0x325   :  { %9012 = vmatpush3.bf16.msra.mxu1 %v9009_v61  ;;  %7670 = vmatprep.mubr.f32.mxu1 %v10851_v62  ;;  %v7728_v22 = vpop.f32.mrb[130].mxu0  ;;  %v9033_v0 = vpack.c.bf16 %v5327_v54, %v5326_v20 }
 0x326   :  { %9014 = vmatprep.subr.bf16.mxu1 %v9013_v17  ;;  %v3254_v40 = vpop.f32.mrb[131].mxu0 }
 0x328   :  { %7671 = vmatmul.mubr.f32.gmra.mrb[18].mxu1 %v10849_v29  ;;  %v5328_v29 = vld [vmem:[%s11805_s3 + $0x470] sm:$0xff] }
 0x329   :  { %9016 = vmatpush3.bf16.msra.mxu1 %v9013_v17  ;;  %7673 = vmatprep.mubr.f32.mxu1 %v10863_v6  ;;  %v7731_v28 = vpop.f32.mrb[132].mxu0  ;;  %v9037_v43 = vpack.c.bf16 %v5329_v39, %v5328_v29  ;;  %v9610_v6 = vmov 0.0|0.0  }
 0x32a   :  { %9018 = vmatprep.subr.bf16.mxu1 %v9017_v23  ;;  %v3264_v31 = vpop.f32.mrb[133].mxu0  ;;  %9041 = vmatprep.subr.bf16.mxu0 %v9610_v6 }
 0x32c   :  { %7674 = vmatmul.mubr.f32.gmra.mrb[20].mxu1 %v10861_v36 }
 0x32d   :  { %9020 = vmatpush3.bf16.msra.mxu1 %v9017_v23  ;;  %7676 = vmatprep.mubr.f32.mxu1 %v10875_v47  ;;  %v7734_v42 = vpop.f32.mrb[134].mxu0 }
 0x32e   :  { %9022 = vmatprep.subr.bf16.mxu1 %v9021_v30  ;;  %v3274_v49 = vpop.f32.mrb[135].mxu0 }
 0x330   :  { %7677 = vmatmul.mubr.f32.gmra.mrb[22].mxu1 %v10873_v8 }
 0x331   :  { %9024 = vmatpush3.bf16.msra.mxu1 %v9021_v30  ;;  %7679 = vmatprep.mubr.f32.mxu1 %v10887_v4  ;;  %v7737_v56 = vpop.f32.mrb[136].mxu0 }
 0x332   :  { %9026 = vmatprep.subr.bf16.mxu1 %v9025_v59  ;;  %v3284_v53 = vpop.f32.mrb[137].mxu0 }
 0x334   :  { %7680 = vmatmul.mubr.f32.gmra.mrb[24].mxu1 %v10885_v26 }
 0x335   :  { %9028 = vmatpush3.bf16.msra.mxu1 %v9025_v59  ;;  %7682 = vmatprep.mubr.f32.mxu1 %v10899_v5  ;;  %v7740_v38 = vpop.f32.mrb[138].mxu0 }
 0x336   :  { %9030 = vmatprep.subr.bf16.mxu1 %v9029_v37  ;;  %v3294_v2 = vpop.f32.mrb[139].mxu0 }
 0x338   :  { %7683 = vmatmul.mubr.f32.gmra.mrb[26].mxu1 %v10897_v32 }
 0x339   :  { %9032 = vmatpush3.bf16.msra.mxu1 %v9029_v37  ;;  %7685 = vmatprep.mubr.f32.mxu1 %v10911_v57  ;;  %v7743_v62 = vpop.f32.mrb[140].mxu0 }
 0x33a   :  { %9034 = vmatprep.subr.bf16.mxu1 %v9033_v0  ;;  %v3304_v27 = vpop.f32.mrb[141].mxu0 }
 0x33c   :  { %7686 = vmatmul.mubr.f32.gmra.mrb[28].mxu1 %v10909_v52 }
 0x33d   :  { %9036 = vmatpush3.bf16.msra.mxu1 %v9033_v0  ;;  %7688 = vmatprep.mubr.f32.mxu1 %v10923_v63  ;;  %v7746_v36 = vpop.f32.mrb[142].mxu0 }
 0x33e   :  { %9038 = vmatprep.subr.bf16.mxu1 %v9037_v43  ;;  %v3314_v45 = vpop.f32.mrb[143].mxu0 }
 0x340   :  { %7689 = vmatmul.mubr.f32.gmra.mrb[30].mxu1 %v10921_v60 }
 0x341   :  { %9040 = vmatpush3.bf16.msra.mxu1 %v9037_v43  ;;  %7779 = vmatprep.mubr.f32.mxu1 %v3244_v19 }
 0x342   :  { %9089 = vmatprep.subr.bf16.mxu1 %v9610_v6 }
 0x344   :  { %7780 = vmatmul.mubr.f32.vlgmr.msra.gmra.mrb[16].mxu1 %v10933_v11 }
 0x345   :  { %7782 = vmatprep.mubr.f32.mxu1 %v3254_v40 }
 0x348   :  { %7783 = vmatmul.mubr.f32.gmra.mrb[18].mxu1 %v7728_v22 }
 0x349   :  { %7785 = vmatprep.mubr.f32.mxu1 %v3264_v31 }
 0x34c   :  { %7786 = vmatmul.mubr.f32.gmra.mrb[20].mxu1 %v7731_v28 }
 0x34d   :  { %7788 = vmatprep.mubr.f32.mxu1 %v3274_v49 }
 0x350   :  { %7789 = vmatmul.mubr.f32.gmra.mrb[22].mxu1 %v7734_v42 }
 0x351   :  { %7791 = vmatprep.mubr.f32.mxu1 %v3284_v53 }
 0x354   :  { %7792 = vmatmul.mubr.f32.gmra.mrb[24].mxu1 %v7737_v56 }
 0x355   :  { %7794 = vmatprep.mubr.f32.mxu1 %v3294_v2 }
 0x358   :  { %7795 = vmatmul.mubr.f32.gmra.mrb[26].mxu1 %v7740_v38 }
 0x359   :  { %7797 = vmatprep.mubr.f32.mxu1 %v3304_v27 }
 0x35c   :  { %7798 = vmatmul.mubr.f32.gmra.mrb[28].mxu1 %v7743_v62 }
 0x35d   :  { %7800 = vmatprep.mubr.f32.mxu1 %v3314_v45 }
 0x360   :  { %7801 = vmatmul.mubr.f32.gmra.mrb[30].mxu1 %v7746_v36 }
 0x361   :  { %7905 = vmatprep.mubr.msk.f32.mxu1 %vm9611_vm0, %v9612_v46 }
 0x417   :  { %v10993_v35 = vpop.f32.mrb[16].mxu1 }
 0x418   :  { %v3524_v8 = vmul.f32 %v10993_v35, %v10993_v35  ;;  %v10997_v18 = vpop.f32.mrb[17].mxu1 }
 0x419   :  { %v3501_v47 = vadd.f32 %v10993_v35, %v10997_v18  ;;  %v3523_v15 = vmul.f32 %v10997_v18, %v10997_v18 }
 0x41b   :  { %v3539_v41 = vadd.f32 %v3524_v8, %v3523_v15  ;;  %v11003_v26 = vpop.f32.mrb[18].mxu1 }
 0x41c   :  { %v11005_v24 = vpop.f32.mrb[19].mxu1  ;;  %v3526_v3 = vmul.f32 %v11003_v26, %v11003_v26 }
 0x41d   :  { %v3502_v4 = vadd.f32 %v3501_v47, %v11005_v24  ;;  %v3525_v34 = vmul.f32 %v11005_v24, %v11005_v24 }
 0x41f   :  { %v3540_v32 = vadd.f32 %v3539_v41, %v3525_v34  ;;  %v11012_v50 = vpop.f32.mrb[20].mxu1  ;;  %v3503_v5 = vadd.f32 %v11003_v26, %v3502_v4 }
 0x420   :  { %v11015_v51 = vpop.f32.mrb[21].mxu1  ;;  %v3528_v57 = vmul.f32 %v11012_v50, %v11012_v50 }
 0x421   :  { %v3504_v9 = vadd.f32 %v3503_v5, %v11015_v51  ;;  %v3527_v52 = vmul.f32 %v11015_v51, %v11015_v51  ;;  %v3541_v55 = vadd.f32 %v3540_v32, %v3526_v3 }
 0x423   :  { %v3542_v58 = vadd.f32 %v3541_v55, %v3527_v52  ;;  %v11022_v10 = vpop.f32.mrb[22].mxu1  ;;  %v3505_v60 = vadd.f32 %v11012_v50, %v3504_v9 }
 0x424   :  { %v11025_v61 = vpop.f32.mrb[23].mxu1  ;;  %v3530_v11 = vmul.f32 %v11022_v10, %v11022_v10 }
 0x425   :  { %v3506_v63 = vadd.f32 %v3505_v60, %v11025_v61  ;;  %v3529_v1 = vmul.f32 %v11025_v61, %v11025_v61  ;;  %v3543_v16 = vadd.f32 %v3542_v58, %v3528_v57 }
 0x427   :  { %v3544_v17 = vadd.f32 %v3543_v16, %v3529_v1  ;;  %v11032_v19 = vpop.f32.mrb[24].mxu1  ;;  %v3507_v21 = vadd.f32 %v11022_v10, %v3506_v63 }
 0x428   :  { %v11035_v25 = vpop.f32.mrb[25].mxu1  ;;  %v3532_v12 = vmul.f32 %v11032_v19, %v11032_v19 }
 0x429   :  { %v3508_v22 = vadd.f32 %v3507_v21, %v11035_v25  ;;  %v3531_v23 = vmul.f32 %v11035_v25, %v11035_v25  ;;  %v3545_v40 = vadd.f32 %v3544_v17, %v3530_v11  ;;  %v3574_v17 = vsub.s32 2, %v9821_v7 }
 0x42b   :  { %v3546_v13 = vadd.f32 %v3545_v40, %v3531_v23  ;;  %v11042_v28 = vpop.f32.mrb[26].mxu1  ;;  %v3509_v30 = vadd.f32 %v11032_v19, %v3508_v22  ;;  %v9608_v22 = vld [vmem:[%s11804_s6] sm:$0xff] }
 0x42c   :  { %v11045_v31 = vpop.f32.mrb[27].mxu1  ;;  %v3534_v59 = vmul.f32 %v11042_v28, %v11042_v28 }
 0x42d   :  { %v3510_v33 = vadd.f32 %v3509_v30, %v11045_v31  ;;  %v3533_v44 = vmul.f32 %v11045_v31, %v11045_v31  ;;  %v3547_v42 = vadd.f32 %v3546_v13, %v3532_v12  ;;  %v3594_v13 = vsub.s32 3, %v9821_v7 }
 0x42f   :  { %v3548_v49 = vadd.f32 %v3547_v42, %v3533_v44  ;;  %v7799_v14 = vpop.f32.mrb[28].mxu1  ;;  %v3511_v48 = vadd.f32 %v11042_v28, %v3510_v33 }
 0x430   :  { %v3466_v56 = vpop.f32.mrb[29].mxu1  ;;  %v3536_v54 = vmul.f32 %v7799_v14, %v7799_v14 }
 0x431   :  { %v3512_v37 = vadd.f32 %v3511_v48, %v3466_v56  ;;  %v3535_v53 = vmul.f32 %v3466_v56, %v3466_v56  ;;  %v3549_v20 = vadd.f32 %v3548_v49, %v3534_v59 }
 0x433   :  { %v3550_v38 = vadd.f32 %v3549_v20, %v3535_v53  ;;  %v7802_v0 = vpop.f32.mrb[30].mxu1  ;;  %v3513_v2 = vadd.f32 %v7799_v14, %v3512_v37 }
 0x434   :  { %v3476_v29 = vpop.f32.mrb[31].mxu1  ;;  %v3538_v27 = vmul.f32 %v7802_v0, %v7802_v0 }
 0x435   :  { %v3514_v39 = vadd.f32 %v3513_v2, %v3476_v29  ;;  %v3537_v62 = vmul.f32 %v3476_v29, %v3476_v29  ;;  %v3551_v43 = vadd.f32 %v3550_v38, %v3536_v54 }
 0x437   :  { %v3515_v36 = vadd.f32 %v7802_v0, %v3514_v39  ;;  %v3552_v45 = vadd.f32 %v3551_v43, %v3537_v62 }
 0x439   :  { %v3516_v8 = vrot.slane %v3515_v36, 4  ;;  %v3553_v47 = vadd.f32 %v3552_v45, %v3538_v27 }
 0x43b   :  { %v3517_v15 = vadd.f32 %v3516_v8, %v3515_v36  ;;  %v3554_v41 = vrot.slane %v3553_v47, 4 }
 0x43d   :  { %v3518_v4 = vrot.slane %v3517_v15, 2  ;;  %v3555_v34 = vadd.f32 %v3554_v41, %v3553_v47 }
 0x43f   :  { %v3519_v3 = vadd.f32 %v3518_v4, %v3517_v15  ;;  %v3556_v32 = vrot.slane %v3555_v34, 2 }
 0x441   :  { %v3520_v5 = vrot.slane %v3519_v3, 1  ;;  %v3557_v9 = vadd.f32 %v3556_v32, %v3555_v34 }
 0x443   :  { %v3521_v52 = vadd.f32 %v3520_v5, %v3519_v3  ;;  %v3558_v55 = vrot.slane %v3557_v9, 1 }
 0x445   :  { %v3522_v57 = vmul.f32 0.055555556, %v3521_v52  ;;  %v3559_v58 = vadd.f32 %v3558_v55, %v3557_v9 }
 0x447   :  { %v3560_v60 = vmul.f32 0.055555556, %v3559_v58  ;;  %v3561_v63 = vmul.f32 %v3522_v57, %v3522_v57 }
 0x449   :  { %v3562_v1 = vsub.f32 %v3560_v60, %v3561_v63 }
 0x44b   :  { %v3563_v16 = vmax.f32 %v3562_v1, 0.0 }
 0x44d   :  { %v3564_v11 = vadd.f32 1e-05, %v3563_v16 }
 0x44f   :  { %9606 = vrsqrt.f32 %v3564_v11 }
 0x459   :  { %v9607_v21 = vpop.eup %9606 }
 0x45a   :  { %v3566_v23 = vmul.f32 %v9608_v22, %v9607_v21 }
 0x45c   :  { %v3567_v40 = vmul.f32 %v3566_v23, %v3522_v57  ;;  %v3575_v12 = vrot.slane %v3566_v23, %v3574_v17 }
 0x45e   :  { %v3569_v30 = vrot.slane %v3567_v40, 7  ;;  %v3590_v33 = vmul.f32 %v3575_v12, %v3476_v29  ;;  %v3591_v44 = vmul.f32 %v7802_v0, %v3575_v12  ;;  %v3576_v42 = vmul.f32 %v3575_v12, %v10997_v18 }
 0x45f   :  { %v3577_v59 = vmul.f32 %v10993_v35, %v3575_v12  ;;  %v3578_v49 = vmul.f32 %v3575_v12, %v11005_v24  ;;  %v3579_v48 = vmul.f32 %v11003_v26, %v3575_v12  ;;  %v3580_v37 = vmul.f32 %v3575_v12, %v11015_v51 }
 0x460   :  { %v3571_v53 = vsub.f32 %v9608_v22, %v3569_v30  ;;  %v3581_v20 = vmul.f32 %v11012_v50, %v3575_v12  ;;  %v3582_v54 = vmul.f32 %v3575_v12, %v11025_v61  ;;  %v3583_v38 = vmul.f32 %v11022_v10, %v3575_v12  ;;  %v3700_v30 = vld [vmem:[%s11807_s5 + $0x8] sm:$0xff] }
 0x461   :  { %v3584_v2 = vmul.f32 %v3575_v12, %v11035_v25  ;;  %v3585_v0 = vmul.f32 %v11032_v19, %v3575_v12  ;;  %v3586_v18 = vmul.f32 %v3575_v12, %v11045_v31  ;;  %v3587_v35 = vmul.f32 %v11042_v28, %v3575_v12 }
 0x462   :  { %v3595_v24 = vrot.slane %v3571_v53, %v3594_v13  ;;  %v3588_v29 = vmul.f32 %v3575_v12, %v3466_v56  ;;  %v3589_v26 = vmul.f32 %v7799_v14, %v3575_v12  ;;  %v3628_v12 = vld [vmem:[%s11806_s4] sm:$0xff] }
 0x463   :  { %v3699_v13 = vld [vmem:[%s11807_s5] sm:$0xff] }
 0x464   :  { %v3610_v39 = vadd.f32 %v3595_v24, %v3590_v33  ;;  %v3611_v51 = vadd.f32 %v3595_v24, %v3591_v44  ;;  %v3596_v62 = vadd.f32 %v3595_v24, %v3576_v42  ;;  %v3597_v43 = vadd.f32 %v3595_v24, %v3577_v59  ;;  %v5330_v33 = vld [vmem:[%s11806_s4 + $0x8] sm:$0xff]  ;;  %v3701_v42 = vld [vmem:[%s11807_s5 + $0x10] sm:$0xff]  ;;  %v3702_v59 = vld [vmem:[%s11807_s5 + $0x18] sm:$0xff] }
 0x465   :  { %v3598_v50 = vadd.f32 %v3595_v24, %v3578_v49  ;;  %v3599_v27 = vadd.f32 %v3595_v24, %v3579_v48  ;;  %v3600_v61 = vadd.f32 %v3595_v24, %v3580_v37  ;;  %v3601_v36 = vadd.f32 %v3595_v24, %v3581_v20  ;;  %v3703_v48 = vld [vmem:[%s11807_s5 + $0x20] sm:$0xff]  ;;  %v3704_v37 = vld [vmem:[%s11807_s5 + $0x28] sm:$0xff]  ;;  %v3705_v20 = vld [vmem:[%s11807_s5 + $0x30] sm:$0xff] }
 0x466   :  { %v3626_v10 = vmax.f32 %v3610_v39, 0.0  ;;  %v3627_v45 = vmax.f32 %v3611_v51, 0.0  ;;  %v3612_v25 = vmax.f32 %v3596_v62, 0.0  ;;  %v3613_v8 = vmax.f32 %v3597_v43, 0.0  ;;  %v3712_v39 = vld [vmem:[%s11807_s5 + $0x68] sm:$0xff]  ;;  %v3713_v62 = vld [vmem:[%s11807_s5 + $0x70] sm:$0xff] }
 0x467   :  { %v3614_v19 = vmax.f32 %v3598_v50, 0.0  ;;  %v3615_v47 = vmax.f32 %v3599_v27, 0.0  ;;  %v3616_v31 = vmax.f32 %v3600_v61, 0.0  ;;  %v3617_v15 = vmax.f32 %v3601_v36, 0.0  ;;  %v3714_v43 = vld [vmem:[%s11807_s5 + $0x78] sm:$0xff]  ;;  %v5331_v27 = vld [vmem:[%s11807_s5 + $0x80] sm:$0xff] }
 0x468   :  { %v11070_v28 = vpack.c.bf16 %v3627_v45, %v3626_v10  ;;  %v11072_v56 = vpack.c.bf16 %v3613_v8, %v3612_v25  ;;  %v3602_v14 = vadd.f32 %v3595_v24, %v3582_v54  ;;  %v3603_v41 = vadd.f32 %v3595_v24, %v3583_v38  ;;  %v3706_v54 = vld [vmem:[%s11807_s5 + $0x38] sm:$0xff]  ;;  %v5332_v61 = vld [vmem:[%s11807_s5 + $0x88] sm:$0xff]  ;;  %v5333_v10 = vld [vmem:[%s11807_s5 + $0x90] sm:$0xff] }
 0x469   :  { %v11074_v4 = vpack.c.bf16 %v3615_v47, %v3614_v19  ;;  %v11076_v34 = vpack.c.bf16 %v3617_v15, %v3616_v31  ;;  %v3604_v3 = vadd.f32 %v3595_v24, %v3584_v2  ;;  %v3605_v32 = vadd.f32 %v3595_v24, %v3585_v0  ;;  %v3707_v2 = vld [vmem:[%s11807_s5 + $0x40] sm:$0xff]  ;;  %v3708_v0 = vld [vmem:[%s11807_s5 + $0x48] sm:$0xff]  ;;  %v5334_v45 = vld [vmem:[%s11807_s5 + $0x98] sm:$0xff] }
 0x46a   :  { %9043 = vmatpush3.bf16.msra.mxu0 %v11072_v56  ;;  %v3618_v5 = vmax.f32 %v3602_v14, 0.0  ;;  %v3619_v9 = vmax.f32 %v3603_v41, 0.0  ;;  %v3606_v52 = vadd.f32 %v3595_v24, %v3586_v18  ;;  %v3607_v55 = vadd.f32 %v3595_v24, %v3587_v35  ;;  %v3709_v35 = vld [vmem:[%s11807_s5 + $0x50] sm:$0xff]  ;;  %v5335_v8 = vld [vmem:[%s11807_s5 + $0xa0] sm:$0xff]  ;;  %v5336_v19 = vld [vmem:[%s11807_s5 + $0xa8] sm:$0xff] }
 0x46b   :  { %9044 = vmatprep.subr.bf16.mxu0 %v9610_v6  ;;  %v3620_v57 = vmax.f32 %v3604_v3, 0.0  ;;  %v3621_v58 = vmax.f32 %v3605_v32, 0.0  ;;  %v3608_v60 = vadd.f32 %v3595_v24, %v3588_v29  ;;  %v3609_v63 = vadd.f32 %v3595_v24, %v3589_v26  ;;  %v3710_v24 = vld [vmem:[%s11807_s5 + $0x58] sm:$0xff]  ;;  %v3711_v26 = vld [vmem:[%s11807_s5 + $0x60] sm:$0xff]  ;;  %v5337_v31 = vld [vmem:[%s11807_s5 + $0xb0] sm:$0xff] }
 0x46c   :  { %v11080_v1 = vpack.c.bf16 %v3619_v9, %v3618_v5  ;;  %v3622_v16 = vmax.f32 %v3606_v52, 0.0  ;;  %v3623_v11 = vmax.f32 %v3607_v55, 0.0  ;;  %v9114_v44 = vpack.c.bf16 %v3700_v30, %v3699_v13  ;;  %v5338_v15 = vld [vmem:[%s11807_s5 + $0xb8] sm:$0xff]  ;;  %v5339_v41 = vld [vmem:[%s11807_s5 + $0xc0] sm:$0xff]  ;;  %v5340_v3 = vld [vmem:[%s11807_s5 + $0xc8] sm:$0xff] }
 0x46d   :  { %v11082_v17 = vpack.c.bf16 %v3621_v58, %v3620_v57  ;;  %v3624_v21 = vmax.f32 %v3608_v60, 0.0  ;;  %v3625_v22 = vmax.f32 %v3609_v63, 0.0  ;;  %v9117_v49 = vpack.c.bf16 %v3702_v59, %v3701_v42  ;;  %v5341_v5 = vld [vmem:[%s11807_s5 + $0xd0] sm:$0xff]  ;;  %v5342_v9 = vld [vmem:[%s11807_s5 + $0xd8] sm:$0xff]  ;;  %v5343_v55 = vld [vmem:[%s11807_s5 + $0xe0] sm:$0xff] }
 0x46e   :  { %9046 = vmatpush3.bf16.msra.mxu0 %v11074_v4  ;;  %v11085_v23 = vpack.c.bf16 %v3623_v11, %v3622_v16  ;;  %v9120_v53 = vpack.c.bf16 %v3704_v37, %v3703_v48  ;;  %v9123_v38 = vpack.c.bf16 %v3706_v54, %v3705_v20  ;;  %v9126_v18 = vpack.c.bf16 %v3708_v0, %v3707_v2  ;;  %v5344_v57 = vld [vmem:[%s11807_s5 + $0xe8] sm:$0xff]  ;;  %v5345_v60 = vld [vmem:[%s11807_s5 + $0xf0] sm:$0xff]  ;;  %v5346_v63 = vld [vmem:[%s11807_s5 + $0xf8] sm:$0xff] }
 0x46f   :  { %9047 = vmatprep.subr.bf16.mxu0 %v9610_v6  ;;  %v11088_v40 = vpack.c.bf16 %v3625_v22, %v3624_v21  ;;  %v9129_v29 = vpack.c.bf16 %v3710_v24, %v3709_v35  ;;  %v9132_v51 = vpack.c.bf16 %v3712_v39, %v3711_v26  ;;  %v9135_v50 = vpack.c.bf16 %v3714_v43, %v3713_v62  ;;  %v5347_v13 = vld [vmem:[%s11806_s4 + $0x10] sm:$0xff]  ;;  %v5364_v30 = vld [vmem:[%s11806_s4 + $0x18] sm:$0xff]  ;;  %v5352_v37 = vld [vmem:[%s11807_s5 + $0x120] sm:$0xff] }
 0x470   :  { %v9090_v36 = vpack.c.bf16 %v5332_v61, %v5331_v27  ;;  %v9093_v25 = vpack.c.bf16 %v5334_v45, %v5333_v10  ;;  %v9096_v47 = vpack.c.bf16 %v5336_v19, %v5335_v8  ;;  %v9099_v14 = vpack.c.bf16 %v5338_v15, %v5337_v31  ;;  %v5350_v59 = vld [vmem:[%s11807_s5 + $0x110] sm:$0xff]  ;;  %v5381_v54 = vld [vmem:[%s11806_s4 + $0x20] sm:$0xff]  ;;  %v5355_v2 = vld [vmem:[%s11807_s5 + $0x138] sm:$0xff] }
 0x471   :  { %v9102_v32 = vpack.c.bf16 %v5340_v3, %v5339_v41  ;;  %v9105_v52 = vpack.c.bf16 %v5342_v9, %v5341_v5  ;;  %v9108_v58 = vpack.c.bf16 %v5344_v57, %v5343_v55  ;;  %v9111_v16 = vpack.c.bf16 %v5346_v63, %v5345_v60  ;;  %v5356_v0 = vld [vmem:[%s11807_s5 + $0x140] sm:$0xff]  ;;  %v5357_v35 = vld [vmem:[%s11807_s5 + $0x148] sm:$0xff]  ;;  %v5359_v26 = vld [vmem:[%s11807_s5 + $0x158] sm:$0xff] }
 0x472   :  { %9049 = vmatpush3.bf16.msra.mxu0 %v11076_v34  ;;  %9091 = vmatpush3.bf16.msra.mxu1 %v9090_v36  ;;  %v9174_v24 = vpack.c.bf16 %v5357_v35, %v5356_v0  ;;  %v5361_v62 = vld [vmem:[%s11807_s5 + $0x168] sm:$0xff]  ;;  %v5363_v27 = vld [vmem:[%s11807_s5 + $0x178] sm:$0xff]  ;;  %v5415_v10 = vld [vmem:[%s11806_s4 + $0x30] sm:$0xff] }
 0x473   :  { %9050 = vmatprep.subr.bf16.mxu0 %v9610_v6  ;;  %9092 = vmatprep.subr.bf16.mxu1 %v9610_v6  ;;  %v5398_v36 = vld [vmem:[%s11806_s4 + $0x28] sm:$0xff]  ;;  %v5432_v8 = vld [vmem:[%s11806_s4 + $0x38] sm:$0xff] }
 0x474   :  { %v5370_v41 = vld [vmem:[%s11807_s5 + $0x1a8] sm:$0xff]  ;;  %v5372_v5 = vld [vmem:[%s11807_s5 + $0x1b8] sm:$0xff] }
 0x475   :  { %v5374_v55 = vld [vmem:[%s11807_s5 + $0x1c8] sm:$0xff]  ;;  %v5376_v60 = vld [vmem:[%s11807_s5 + $0x1d8] sm:$0xff] }
 0x476   :  { %9052 = vmatpush3.bf16.msra.mxu0 %v11080_v1  ;;  %9094 = vmatpush3.bf16.msra.mxu1 %v9093_v25  ;;  %v5391_v35 = vld [vmem:[%s11807_s5 + $0x248] sm:$0xff] }
 0x477   :  { %9053 = vmatprep.subr.bf16.mxu0 %v9610_v6  ;;  %9095 = vmatprep.subr.bf16.mxu1 %v9610_v6 }
 0x47a   :  { %9055 = vmatpush3.bf16.msra.mxu0 %v11082_v17  ;;  %9097 = vmatpush3.bf16.msra.mxu1 %v9096_v47 }
 0x47b   :  { %9056 = vmatprep.subr.bf16.mxu0 %v9610_v6  ;;  %9098 = vmatprep.subr.bf16.mxu1 %v9610_v6 }
 0x47e   :  { %9058 = vmatpush3.bf16.msra.mxu0 %v11085_v23  ;;  %9100 = vmatpush3.bf16.msra.mxu1 %v9099_v14  ;;  %v5369_v14 = vld [vmem:[%s11807_s5 + $0x1a0] sm:$0xff] }
 0x47f   :  { %9059 = vmatprep.subr.bf16.mxu0 %v9610_v6  ;;  %9101 = vmatprep.subr.bf16.mxu1 %v9610_v6  ;;  %v9216_v3 = vpack.c.bf16 %v5370_v41, %v5369_v14  ;;  %v5409_v41 = vld [vmem:[%s11807_s5 + $0x2d0] sm:$0xff] }
 0x482   :  { %9061 = vmatpush3.bf16.msra.mxu0 %v11088_v40  ;;  %9103 = vmatpush3.bf16.msra.mxu1 %v9102_v32  ;;  %v5371_v32 = vld [vmem:[%s11807_s5 + $0x1b0] sm:$0xff] }
 0x483   :  { %9062 = vmatprep.subr.bf16.mxu0 %v9610_v6  ;;  %9104 = vmatprep.subr.bf16.mxu1 %v9610_v6  ;;  %v9219_v9 = vpack.c.bf16 %v5372_v5, %v5371_v32  ;;  %v5411_v5 = vld [vmem:[%s11807_s5 + $0x2e0] sm:$0xff] }
 0x486   :  { %9064 = vmatpush3.bf16.msra.mxu0 %v11070_v28  ;;  %9106 = vmatpush3.bf16.msra.mxu1 %v9105_v52  ;;  %v5373_v52 = vld [vmem:[%s11807_s5 + $0x1c0] sm:$0xff] }
 0x487   :  { %9065 = vmatprep.subr.bf16.mxu0 %v9610_v6  ;;  %9107 = vmatprep.subr.bf16.mxu1 %v9610_v6  ;;  %v9222_v57 = vpack.c.bf16 %v5374_v55, %v5373_v52  ;;  %v5413_v55 = vld [vmem:[%s11807_s5 + $0x2f0] sm:$0xff] }
 0x489   :  { %7836 = vmatmul.mubr.f32.vlgmr.msra.gmra.mrb[144].mxu0 %v3628_v12 }
 0x48a   :  { %9067 = vmatpush3.bf16.msra.mxu0 %v11072_v56  ;;  %7870 = vmatprep.mubr.msk.f32.mxu0 %vm9611_vm0, %v9612_v46 }
 0x48b   :  { %9068 = vmatprep.subr.bf16.mxu0 %v9610_v6  ;;  %9109 = vmatpush3.bf16.msra.mxu1 %v9108_v58  ;;  %v5375_v58 = vld [vmem:[%s11807_s5 + $0x1d0] sm:$0xff] }
 0x48c   :  { %9110 = vmatprep.subr.bf16.mxu1 %v9610_v6  ;;  %v9225_v63 = vpack.c.bf16 %v5376_v60, %v5375_v58  ;;  %v5416_v60 = vld [vmem:[%s11807_s5 + $0x300] sm:$0xff] }
 0x48e   :  { %9070 = vmatpush3.bf16.msra.mxu0 %v11074_v4 }
 0x48f   :  { %9071 = vmatprep.subr.bf16.mxu0 %v9610_v6  ;;  %9112 = vmatpush3.bf16.msra.mxu1 %v9111_v16  ;;  %v5377_v16 = vld [vmem:[%s11807_s5 + $0x1e0] sm:$0xff] }
 0x490   :  { %9137 = vmatprep.subr.bf16.mxu1 %v9610_v6 }
 0x492   :  { %9073 = vmatpush3.bf16.msra.mxu0 %v11076_v34 }
 0x493   :  { %9074 = vmatprep.subr.bf16.mxu0 %v9610_v6 }
 0x496   :  { %9076 = vmatpush3.bf16.msra.mxu0 %v11080_v1 }
 0x497   :  { %9077 = vmatprep.subr.bf16.mxu0 %v9610_v6 }
 0x49a   :  { %9079 = vmatpush3.bf16.msra.mxu0 %v11082_v17 }
 0x49b   :  { %9080 = vmatprep.subr.bf16.mxu0 %v9610_v6 }
 0x49e   :  { %9082 = vmatpush3.bf16.msra.mxu0 %v11085_v23 }
 0x49f   :  { %9083 = vmatprep.subr.bf16.mxu0 %v9610_v6 }
 0x4a2   :  { %9085 = vmatpush3.bf16.msra.mxu0 %v11088_v40 }
 0x4a3   :  { %9086 = vmatprep.subr.bf16.mxu0 %v9610_v6 }
 0x4a6   :  { %9088 = vmatpush3.bf16.msra.mxu0 %v11070_v28 }
 0x4a7   :  { %9113 = vmatprep.subr.bf16.mxu0 %v9610_v6 }
 0x4a9   :  { %7871 = vmatmul.mubr.f32.vlgmr.msra.gmra.mrb[146].mxu0 %v5330_v33  ;;  %v5348_v33 = vld [vmem:[%s11807_s5 + $0x100] sm:$0xff] }
 0x4aa   :  { %9115 = vmatpush3.bf16.msra.mxu0 %v9114_v44  ;;  %7940 = vmatprep.mubr.msk.f32.mxu0 %vm9611_vm0, %v9612_v46  ;;  %v5349_v44 = vld [vmem:[%s11807_s5 + $0x108] sm:$0xff] }
 0x4ab   :  { %9116 = vmatprep.subr.bf16.mxu0 %v9610_v6  ;;  %v9162_v42 = vpack.c.bf16 %v5349_v44, %v5348_v33  ;;  %v5383_v33 = vld [vmem:[%s11807_s5 + $0x208] sm:$0xff] }
 0x4ae   :  { %9118 = vmatpush3.bf16.msra.mxu0 %v9117_v49  ;;  %v5351_v49 = vld [vmem:[%s11807_s5 + $0x118] sm:$0xff] }
 0x4af   :  { %9119 = vmatprep.subr.bf16.mxu0 %v9610_v6  ;;  %v9165_v48 = vpack.c.bf16 %v5351_v49, %v5350_v59  ;;  %v5385_v59 = vld [vmem:[%s11807_s5 + $0x218] sm:$0xff] }
 0x4b2   :  { %9121 = vmatpush3.bf16.msra.mxu0 %v9120_v53  ;;  %v5353_v53 = vld [vmem:[%s11807_s5 + $0x128] sm:$0xff] }
 0x4b3   :  { %9122 = vmatprep.subr.bf16.mxu0 %v9610_v6  ;;  %v9168_v20 = vpack.c.bf16 %v5353_v53, %v5352_v37  ;;  %v5386_v53 = vld [vmem:[%s11807_s5 + $0x220] sm:$0xff] }
 0x4b6   :  { %9124 = vmatpush3.bf16.msra.mxu0 %v9123_v38  ;;  %v5354_v38 = vld [vmem:[%s11807_s5 + $0x130] sm:$0xff] }
 0x4b7   :  { %9125 = vmatprep.subr.bf16.mxu0 %v9610_v6 }
 0x4ba   :  { %9127 = vmatpush3.bf16.msra.mxu0 %v9126_v18  ;;  %v9171_v18 = vpack.c.bf16 %v5355_v2, %v5354_v38  ;;  %v5388_v38 = vld [vmem:[%s11807_s5 + $0x230] sm:$0xff]  ;;  %v5389_v2 = vld [vmem:[%s11807_s5 + $0x238] sm:$0xff] }
 0x4bb   :  { %9128 = vmatprep.subr.bf16.mxu0 %v9610_v6  ;;  %v9267_v0 = vpack.c.bf16 %v5389_v2, %v5388_v38  ;;  %v5428_v2 = vld [vmem:[%s11807_s5 + $0x360] sm:$0xff] }
 0x4be   :  { %9130 = vmatpush3.bf16.msra.mxu0 %v9129_v29  ;;  %v5358_v29 = vld [vmem:[%s11807_s5 + $0x150] sm:$0xff] }
 0x4bf   :  { %9131 = vmatprep.subr.bf16.mxu0 %v9610_v6  ;;  %v9177_v39 = vpack.c.bf16 %v5359_v26, %v5358_v29  ;;  %v5392_v29 = vld [vmem:[%s11807_s5 + $0x250] sm:$0xff]  ;;  %v5393_v26 = vld [vmem:[%s11807_s5 + $0x258] sm:$0xff] }
 0x4c2   :  { %9133 = vmatpush3.bf16.msra.mxu0 %v9132_v51  ;;  %v5360_v51 = vld [vmem:[%s11807_s5 + $0x160] sm:$0xff] }
 0x4c3   :  { %9134 = vmatprep.subr.bf16.mxu0 %v9610_v6  ;;  %v9180_v43 = vpack.c.bf16 %v5361_v62, %v5360_v51  ;;  %v5394_v51 = vld [vmem:[%s11807_s5 + $0x260] sm:$0xff]  ;;  %v5395_v62 = vld [vmem:[%s11807_s5 + $0x268] sm:$0xff] }
 0x4c6   :  { %9136 = vmatpush3.bf16.msra.mxu0 %v9135_v50  ;;  %v5362_v50 = vld [vmem:[%s11807_s5 + $0x170] sm:$0xff] }
 0x4c7   :  { %9161 = vmatprep.subr.bf16.mxu0 %v9610_v6  ;;  %v9183_v61 = vpack.c.bf16 %v5363_v27, %v5362_v50  ;;  %v5396_v50 = vld [vmem:[%s11807_s5 + $0x270] sm:$0xff]  ;;  %v5397_v27 = vld [vmem:[%s11807_s5 + $0x278] sm:$0xff] }
 0x55c   :  { %v3695_v11 = vpop.f32.mrb[144].mxu0 }
 0x55d   :  { %v7837_v21 = vpop.f32.mrb[145].mxu0  ;;  %7941 = vmatmul.mubr.f32.vlgmr.msra.gmra.mrb[148].mxu0 %v3695_v11  ;;  %v5378_v11 = vld [vmem:[%s11807_s5 + $0x1e8] sm:$0xff] }
 0x55e   :  { %8010 = vmatprep.mubr.msk.f32.mxu0 %vm9611_vm0, %v9612_v46  ;;  %9163 = vmatpush3.bf16.msra.mxu0 %v9162_v42  ;;  %v9228_v21 = vpack.c.bf16 %v5378_v11, %v5377_v16  ;;  %v5384_v42 = vld [vmem:[%s11807_s5 + $0x210] sm:$0xff] }
 0x55f   :  { %9164 = vmatprep.subr.bf16.mxu0 %v9610_v6  ;;  %v9261_v37 = vpack.c.bf16 %v5385_v59, %v5384_v42  ;;  %v5418_v11 = vld [vmem:[%s11807_s5 + $0x310] sm:$0xff]  ;;  %v5423_v59 = vld [vmem:[%s11807_s5 + $0x338] sm:$0xff] }
 0x560   :  { %v5422_v42 = vld [vmem:[%s11807_s5 + $0x330] sm:$0xff] }
 0x562   :  { %9166 = vmatpush3.bf16.msra.mxu0 %v9165_v48 }
 0x563   :  { %9167 = vmatprep.subr.bf16.mxu0 %v9610_v6 }
 0x566   :  { %9169 = vmatpush3.bf16.msra.mxu0 %v9168_v20  ;;  %v5387_v20 = vld [vmem:[%s11807_s5 + $0x228] sm:$0xff] }
 0x567   :  { %9170 = vmatprep.subr.bf16.mxu0 %v9610_v6 }
 0x56a   :  { %9172 = vmatpush3.bf16.msra.mxu0 %v9171_v18  ;;  %v5390_v18 = vld [vmem:[%s11807_s5 + $0x240] sm:$0xff] }
 0x56b   :  { %9173 = vmatprep.subr.bf16.mxu0 %v9610_v6 }
 0x56e   :  { %9175 = vmatpush3.bf16.msra.mxu0 %v9174_v24  ;;  %v9270_v24 = vpack.c.bf16 %v5391_v35, %v5390_v18  ;;  %v5430_v35 = vld [vmem:[%s11807_s5 + $0x370] sm:$0xff] }
 0x56f   :  { %9176 = vmatprep.subr.bf16.mxu0 %v9610_v6 }
 0x572   :  { %9178 = vmatpush3.bf16.msra.mxu0 %v9177_v39  ;;  %v9273_v39 = vpack.c.bf16 %v5393_v26, %v5392_v29  ;;  %v5433_v26 = vld [vmem:[%s11807_s5 + $0x380] sm:$0xff] }
 0x573   :  { %9179 = vmatprep.subr.bf16.mxu0 %v9610_v6 }
 0x576   :  { %9181 = vmatpush3.bf16.msra.mxu0 %v9180_v43  ;;  %v9276_v43 = vpack.c.bf16 %v5395_v62, %v5394_v51  ;;  %v5435_v62 = vld [vmem:[%s11807_s5 + $0x390] sm:$0xff] }
 0x577   :  { %9182 = vmatprep.subr.bf16.mxu0 %v9610_v6 }
 0x57a   :  { %9184 = vmatpush3.bf16.msra.mxu0 %v9183_v61  ;;  %v9279_v61 = vpack.c.bf16 %v5397_v27, %v5396_v50 }
 0x57b   :  { %9209 = vmatprep.subr.bf16.mxu0 %v9610_v6 }
 0x57c   :  { %v3783_v22 = vpop.f32.mrb[146].mxu0 }
 0x57d   :  { %v7872_v12 = vpop.f32.mrb[147].mxu0  ;;  %7906 = vmatmul.mubr.f32.vlgmr.msra.gmra.mrb[32].mxu1 %v3783_v22  ;;  %v5379_v22 = vld [vmem:[%s11807_s5 + $0x1f0] sm:$0xff] }
 0x57e   :  { %9139 = vmatpush3.bf16.msra.mxu1 %v11072_v56  ;;  %7975 = vmatprep.mubr.msk.f32.mxu1 %vm9611_vm0, %v9612_v46  ;;  %v5380_v12 = vld [vmem:[%s11807_s5 + $0x1f8] sm:$0xff] }
 0x57f   :  { %9140 = vmatprep.subr.bf16.mxu1 %v9610_v6 }
 0x582   :  { %9142 = vmatpush3.bf16.msra.mxu1 %v11074_v4 }
 0x583   :  { %9143 = vmatprep.subr.bf16.mxu1 %v9610_v6 }
 0x586   :  { %9145 = vmatpush3.bf16.msra.mxu1 %v11076_v34 }
 0x587   :  { %9146 = vmatprep.subr.bf16.mxu1 %v9610_v6 }
 0x58a   :  { %9148 = vmatpush3.bf16.msra.mxu1 %v11080_v1 }
 0x58b   :  { %9149 = vmatprep.subr.bf16.mxu1 %v9610_v6 }
 0x58e   :  { %9151 = vmatpush3.bf16.msra.mxu1 %v11082_v17 }
 0x58f   :  { %9152 = vmatprep.subr.bf16.mxu1 %v9610_v6 }
 0x592   :  { %9154 = vmatpush3.bf16.msra.mxu1 %v11085_v23 }
 0x593   :  { %9155 = vmatprep.subr.bf16.mxu1 %v9610_v6 }
 0x596   :  { %9157 = vmatpush3.bf16.msra.mxu1 %v11088_v40 }
 0x597   :  { %9158 = vmatprep.subr.bf16.mxu1 %v9610_v6 }
 0x59a   :  { %9160 = vmatpush3.bf16.msra.mxu1 %v11070_v28 }
 0x59b   :  { %9185 = vmatprep.subr.bf16.mxu1 %v9610_v6 }
 0x59d   :  { %7976 = vmatmul.mubr.f32.vlgmr.msra.gmra.mrb[34].mxu1 %v5347_v13  ;;  %v9231_v13 = vpack.c.bf16 %v5380_v12, %v5379_v22 }
 0x59e   :  { %9187 = vmatpush3.bf16.msra.mxu1 %v11072_v56  ;;  %8045 = vmatprep.mubr.msk.f32.mxu1 %vm9611_vm0, %v9612_v46 }
 0x59f   :  { %9188 = vmatprep.subr.bf16.mxu1 %v9610_v6 }
 0x5a2   :  { %9190 = vmatpush3.bf16.msra.mxu1 %v11074_v4 }
 0x5a3   :  { %9191 = vmatprep.subr.bf16.mxu1 %v9610_v6 }
 0x5a6   :  { %9193 = vmatpush3.bf16.msra.mxu1 %v11076_v34 }
 0x5a7   :  { %9194 = vmatprep.subr.bf16.mxu1 %v9610_v6 }
 0x5aa   :  { %9196 = vmatpush3.bf16.msra.mxu1 %v11080_v1 }
 0x5ab   :  { %9197 = vmatprep.subr.bf16.mxu1 %v9610_v6 }
 0x5ae   :  { %9199 = vmatpush3.bf16.msra.mxu1 %v11082_v17 }
 0x5af   :  { %9200 = vmatprep.subr.bf16.mxu1 %v9610_v6 }
 0x5b2   :  { %9202 = vmatpush3.bf16.msra.mxu1 %v11085_v23 }
 0x5b3   :  { %9203 = vmatprep.subr.bf16.mxu1 %v9610_v6 }
 0x5b6   :  { %9205 = vmatpush3.bf16.msra.mxu1 %v11088_v40 }
 0x5b7   :  { %9206 = vmatprep.subr.bf16.mxu1 %v9610_v6 }
 0x5ba   :  { %9208 = vmatpush3.bf16.msra.mxu1 %v11070_v28 }
 0x5bb   :  { %9233 = vmatprep.subr.bf16.mxu1 %v9610_v6 }
 0x5bd   :  { %8046 = vmatmul.mubr.f32.vlgmr.msra.gmra.mrb[36].mxu1 %v5364_v30  ;;  %v5382_v30 = vld [vmem:[%s11807_s5 + $0x200] sm:$0xff] }
 0x5be   :  { %9235 = vmatpush3.bf16.msra.mxu1 %v11072_v56  ;;  %8115 = vmatprep.mubr.msk.f32.mxu1 %vm9611_vm0, %v9612_v46  ;;  %v9258_v44 = vpack.c.bf16 %v5383_v33, %v5382_v30  ;;  %v5420_v30 = vld [vmem:[%s11807_s5 + $0x320] sm:$0xff]  ;;  %v5421_v33 = vld [vmem:[%s11807_s5 + $0x328] sm:$0xff] }
 0x5bf   :  { %9236 = vmatprep.subr.bf16.mxu1 %v9610_v6 }
 0x5c2   :  { %9238 = vmatpush3.bf16.msra.mxu1 %v11074_v4 }
 0x5c3   :  { %9239 = vmatprep.subr.bf16.mxu1 %v9610_v6 }
 0x5c6   :  { %9241 = vmatpush3.bf16.msra.mxu1 %v11076_v34 }
 0x5c7   :  { %9242 = vmatprep.subr.bf16.mxu1 %v9610_v6 }
 0x5ca   :  { %9244 = vmatpush3.bf16.msra.mxu1 %v11080_v1 }
 0x5cb   :  { %9245 = vmatprep.subr.bf16.mxu1 %v9610_v6 }
 0x5ce   :  { %9247 = vmatpush3.bf16.msra.mxu1 %v11082_v17 }
 0x5cf   :  { %9248 = vmatprep.subr.bf16.mxu1 %v9610_v6 }
 0x5d2   :  { %9250 = vmatpush3.bf16.msra.mxu1 %v11085_v23 }
 0x5d3   :  { %9251 = vmatprep.subr.bf16.mxu1 %v9610_v6 }
 0x5d6   :  { %9253 = vmatpush3.bf16.msra.mxu1 %v11088_v40 }
 0x5d7   :  { %9254 = vmatprep.subr.bf16.mxu1 %v9610_v6 }
 0x5da   :  { %9256 = vmatpush3.bf16.msra.mxu1 %v11070_v28 }
 0x5db   :  { %9281 = vmatprep.subr.bf16.mxu1 %v9610_v6 }
 0x5dd   :  { %8116 = vmatmul.mubr.f32.vlgmr.msra.gmra.mrb[38].mxu1 %v5381_v54  ;;  %v9264_v54 = vpack.c.bf16 %v5387_v20, %v5386_v53  ;;  %v5426_v20 = vld [vmem:[%s11807_s5 + $0x350] sm:$0xff] }
 0x5de   :  { %9283 = vmatpush3.bf16.msra.mxu1 %v11072_v56  ;;  %8185 = vmatprep.mubr.msk.f32.mxu1 %vm9611_vm0, %v9612_v46 }
 0x5df   :  { %9284 = vmatprep.subr.bf16.mxu1 %v9610_v6 }
 0x5e2   :  { %9286 = vmatpush3.bf16.msra.mxu1 %v11074_v4 }
 0x5e3   :  { %9287 = vmatprep.subr.bf16.mxu1 %v9610_v6 }
 0x5e6   :  { %9289 = vmatpush3.bf16.msra.mxu1 %v11076_v34 }
 0x5e7   :  { %9290 = vmatprep.subr.bf16.mxu1 %v9610_v6 }
 0x5ea   :  { %9292 = vmatpush3.bf16.msra.mxu1 %v11080_v1 }
 0x5eb   :  { %9293 = vmatprep.subr.bf16.mxu1 %v9610_v6 }
 0x5ee   :  { %9295 = vmatpush3.bf16.msra.mxu1 %v11082_v17 }
 0x5ef   :  { %9296 = vmatprep.subr.bf16.mxu1 %v9610_v6 }
 0x5f2   :  { %9298 = vmatpush3.bf16.msra.mxu1 %v11085_v23 }
 0x5f3   :  { %9299 = vmatprep.subr.bf16.mxu1 %v9610_v6 }
 0x5f6   :  { %9301 = vmatpush3.bf16.msra.mxu1 %v11088_v40 }
 0x5f7   :  { %9302 = vmatprep.subr.bf16.mxu1 %v9610_v6 }
 0x5fa   :  { %9304 = vmatpush3.bf16.msra.mxu1 %v11070_v28 }
 0x5fb   :  { %9329 = vmatprep.subr.bf16.mxu1 %v9610_v6 }
 0x5fd   :  { %8186 = vmatmul.mubr.f32.vlgmr.msra.gmra.mrb[40].mxu1 %v5398_v36  ;;  %v5399_v36 = vld [vmem:[%s11807_s5 + $0x280] sm:$0xff] }
 0x5fe   :  { %9331 = vmatpush3.bf16.msra.mxu1 %v11072_v56  ;;  %8255 = vmatprep.mubr.msk.f32.mxu1 %vm9611_vm0, %v9612_v46 }
 0x5ff   :  { %9332 = vmatprep.subr.bf16.mxu1 %v9610_v6 }
 0x602   :  { %9334 = vmatpush3.bf16.msra.mxu1 %v11074_v4 }
 0x603   :  { %9335 = vmatprep.subr.bf16.mxu1 %v9610_v6 }
 0x606   :  { %9337 = vmatpush3.bf16.msra.mxu1 %v11076_v34 }
 0x607   :  { %9338 = vmatprep.subr.bf16.mxu1 %v9610_v6 }
 0x60a   :  { %9340 = vmatpush3.bf16.msra.mxu1 %v11080_v1 }
 0x60b   :  { %9341 = vmatprep.subr.bf16.mxu1 %v9610_v6 }
 0x60e   :  { %9343 = vmatpush3.bf16.msra.mxu1 %v11082_v17 }
 0x60f   :  { %9344 = vmatprep.subr.bf16.mxu1 %v9610_v6 }
 0x612   :  { %9346 = vmatpush3.bf16.msra.mxu1 %v11085_v23 }
 0x613   :  { %9347 = vmatprep.subr.bf16.mxu1 %v9610_v6 }
 0x616   :  { %9349 = vmatpush3.bf16.msra.mxu1 %v11088_v40 }
 0x617   :  { %9350 = vmatprep.subr.bf16.mxu1 %v9610_v6 }
 0x61a   :  { %9352 = vmatpush3.bf16.msra.mxu1 %v11070_v28 }
 0x61b   :  { %9377 = vmatprep.subr.bf16.mxu1 %v9610_v6 }
 0x61d   :  { %8256 = vmatmul.mubr.f32.vlgmr.msra.gmra.mrb[42].mxu1 %v5415_v10  ;;  %v5400_v10 = vld [vmem:[%s11807_s5 + $0x288] sm:$0xff] }
 0x61e   :  { %9379 = vmatpush3.bf16.msra.mxu1 %v11072_v56  ;;  %8325 = vmatprep.mubr.msk.f32.mxu1 %vm9611_vm0, %v9612_v46 }
 0x61f   :  { %9380 = vmatprep.subr.bf16.mxu1 %v9610_v6 }
 0x622   :  { %9382 = vmatpush3.bf16.msra.mxu1 %v11074_v4 }
 0x623   :  { %9383 = vmatprep.subr.bf16.mxu1 %v9610_v6 }
 0x626   :  { %9385 = vmatpush3.bf16.msra.mxu1 %v11076_v34 }
 0x627   :  { %9386 = vmatprep.subr.bf16.mxu1 %v9610_v6 }
 0x62a   :  { %9388 = vmatpush3.bf16.msra.mxu1 %v11080_v1 }
 0x62b   :  { %9389 = vmatprep.subr.bf16.mxu1 %v9610_v6 }
 0x62e   :  { %9391 = vmatpush3.bf16.msra.mxu1 %v11082_v17 }
 0x62f   :  { %9392 = vmatprep.subr.bf16.mxu1 %v9610_v6 }
 0x630   :  { %v3940_v45 = vpop.f32.mrb[148].mxu0 }
 0x631   :  { %v7942_v25 = vpop.f32.mrb[149].mxu0 }
 0x632   :  { %9394 = vmatpush3.bf16.msra.mxu1 %v11085_v23  ;;  %v5401_v25 = vld [vmem:[%s11807_s5 + $0x290] sm:$0xff] }
 0x633   :  { %9395 = vmatprep.subr.bf16.mxu1 %v9610_v6 }
 0x636   :  { %9397 = vmatpush3.bf16.msra.mxu1 %v11088_v40 }
 0x637   :  { %9398 = vmatprep.subr.bf16.mxu1 %v9610_v6 }
 0x63a   :  { %9400 = vmatpush3.bf16.msra.mxu1 %v11070_v28 }
 0x63b   :  { %9425 = vmatprep.subr.bf16.mxu1 %v9610_v6 }
 0x63d   :  { %8326 = vmatmul.mubr.f32.vlgmr.msra.gmra.mrb[44].mxu1 %v5432_v8  ;;  %v5402_v8 = vld [vmem:[%s11807_s5 + $0x298] sm:$0xff] }
 0x63e   :  { %9427 = vmatpush3.bf16.msra.mxu1 %v11072_v56  ;;  %8395 = vmatprep.mubr.msk.f32.mxu1 %vm9611_vm0, %v9612_v46 }
 0x63f   :  { %9428 = vmatprep.subr.bf16.mxu1 %v9610_v6 }
 0x642   :  { %9430 = vmatpush3.bf16.msra.mxu1 %v11074_v4  ;;  %v5449_v4 = vld [vmem:[%s11806_s4 + $0x40] sm:$0xff] }
 0x643   :  { %9431 = vmatprep.subr.bf16.mxu1 %v9610_v6 }
 0x646   :  { %9433 = vmatpush3.bf16.msra.mxu1 %v11076_v34  ;;  %v5365_v34 = vld [vmem:[%s11807_s5 + $0x180] sm:$0xff] }
 0x647   :  { %9434 = vmatprep.subr.bf16.mxu1 %v9610_v6 }
 0x64a   :  { %9436 = vmatpush3.bf16.msra.mxu1 %v11080_v1  ;;  %v5366_v1 = vld [vmem:[%s11807_s5 + $0x188] sm:$0xff] }
 0x64b   :  { %9437 = vmatprep.subr.bf16.mxu1 %v9610_v6 }
 0x64e   :  { %9439 = vmatpush3.bf16.msra.mxu1 %v11082_v17  ;;  %v9210_v17 = vpack.c.bf16 %v5366_v1, %v5365_v34  ;;  %v5403_v34 = vld [vmem:[%s11807_s5 + $0x2a0] sm:$0xff]  ;;  %v5404_v1 = vld [vmem:[%s11807_s5 + $0x2a8] sm:$0xff] }
 0x64f   :  { %9440 = vmatprep.subr.bf16.mxu1 %v9610_v6 }
 0x650   :  { %v3870_v56 = vpop.f32.mrb[32].mxu1 }
 0x651   :  { %v11436_v19 = vadd.f32 %v3940_v45, %v3870_v56  ;;  %v7907_v47 = vpop.f32.mrb[33].mxu1  ;;  %v9306_v45 = vpack.c.bf16 %v5400_v10, %v5399_v36  ;;  %v5437_v36 = vld [vmem:[%s11807_s5 + $0x3a0] sm:$0xff]  ;;  %v5438_v10 = vld [vmem:[%s11807_s5 + $0x3a8] sm:$0xff] }
 0x652   :  { %9442 = vmatpush3.bf16.msra.mxu1 %v11085_v23  ;;  %v5367_v23 = vld [vmem:[%s11807_s5 + $0x190] sm:$0xff] }
 0x653   :  { %9443 = vmatprep.subr.bf16.mxu1 %v9610_v6 }
 0x656   :  { %9445 = vmatpush3.bf16.msra.mxu1 %v11088_v40 }
 0x657   :  { %9446 = vmatprep.subr.bf16.mxu1 %v9610_v6 }
 0x65a   :  { %9448 = vmatpush3.bf16.msra.mxu1 %v11070_v28  ;;  %v5368_v28 = vld [vmem:[%s11807_s5 + $0x198] sm:$0xff] }
 0x65b   :  { %v9213_v15 = vpack.c.bf16 %v5368_v28, %v5367_v23  ;;  %v5405_v23 = vld [vmem:[%s11807_s5 + $0x2b0] sm:$0xff]  ;;  %v5406_v28 = vld [vmem:[%s11807_s5 + $0x2b8] sm:$0xff] }
 0x65d   :  { %8396 = vmatmul.mubr.f32.vlgmr.msra.gmra.mrb[46].mxu1 %v5449_v4  ;;  %v9309_v4 = vpack.c.bf16 %v5402_v8, %v5401_v25  ;;  %v5439_v25 = vld [vmem:[%s11807_s5 + $0x3b0] sm:$0xff]  ;;  %v5440_v8 = vld [vmem:[%s11807_s5 + $0x3b8] sm:$0xff] }
 0x670   :  { %v4012_v40 = vpop.f32.mrb[34].mxu1 }
 0x671   :  { %8011 = vmatmul.mubr.f32.vlgmr.msra.gmra.mrb[150].mxu0 %v4012_v40  ;;  %v7977_v31 = vpop.f32.mrb[35].mxu1  ;;  %v9315_v40 = vpack.c.bf16 %v5406_v28, %v5405_v23  ;;  %v5445_v28 = vld [vmem:[%s11807_s5 + $0x3e0] sm:$0xff] }
 0x672   :  { %9211 = vmatpush3.bf16.msra.mxu0 %v9210_v17  ;;  %8080 = vmatprep.mubr.msk.f32.mxu0 %vm9611_vm0, %v9612_v46  ;;  %v9312_v17 = vpack.c.bf16 %v5404_v1, %v5403_v34  ;;  %v5407_v31 = vld [vmem:[%s11807_s5 + $0x2c0] sm:$0xff]  ;;  %v5443_v1 = vld [vmem:[%s11807_s5 + $0x3d0] sm:$0xff] }
 0x673   :  { %9212 = vmatprep.subr.bf16.mxu0 %v9610_v6 }
 0x676   :  { %9214 = vmatpush3.bf16.msra.mxu0 %v9213_v15  ;;  %v5408_v15 = vld [vmem:[%s11807_s5 + $0x2c8] sm:$0xff] }
 0x677   :  { %9215 = vmatprep.subr.bf16.mxu0 %v9610_v6  ;;  %v9318_v14 = vpack.c.bf16 %v5408_v15, %v5407_v31  ;;  %v5447_v15 = vld [vmem:[%s11807_s5 + $0x3f0] sm:$0xff] }
 0x67a   :  { %9217 = vmatpush3.bf16.msra.mxu0 %v9216_v3  ;;  %v5410_v3 = vld [vmem:[%s11807_s5 + $0x2d8] sm:$0xff] }
 0x67b   :  { %9218 = vmatprep.subr.bf16.mxu0 %v9610_v6  ;;  %v9321_v32 = vpack.c.bf16 %v5410_v3, %v5409_v41  ;;  %v5450_v3 = vld [vmem:[%s11807_s5 + $0x400] sm:$0xff] }
 0x67e   :  { %9220 = vmatpush3.bf16.msra.mxu0 %v9219_v9  ;;  %v5412_v9 = vld [vmem:[%s11807_s5 + $0x2e8] sm:$0xff] }
 0x67f   :  { %9221 = vmatprep.subr.bf16.mxu0 %v9610_v6  ;;  %v9324_v52 = vpack.c.bf16 %v5412_v9, %v5411_v5  ;;  %v5452_v9 = vld [vmem:[%s11807_s5 + $0x410] sm:$0xff] }
 0x682   :  { %9223 = vmatpush3.bf16.msra.mxu0 %v9222_v57  ;;  %v5414_v57 = vld [vmem:[%s11807_s5 + $0x2f8] sm:$0xff] }
 0x683   :  { %9224 = vmatprep.subr.bf16.mxu0 %v9610_v6  ;;  %v9327_v58 = vpack.c.bf16 %v5414_v57, %v5413_v55 }
 0x686   :  { %9226 = vmatpush3.bf16.msra.mxu0 %v9225_v63  ;;  %v5417_v63 = vld [vmem:[%s11807_s5 + $0x308] sm:$0xff] }
 0x687   :  { %9227 = vmatprep.subr.bf16.mxu0 %v9610_v6  ;;  %v9354_v16 = vpack.c.bf16 %v5417_v63, %v5416_v60  ;;  %v5454_v60 = vld [vmem:[%s11807_s5 + $0x420] sm:$0xff]  ;;  %v5455_v63 = vld [vmem:[%s11807_s5 + $0x428] sm:$0xff] }
 0x68a   :  { %9229 = vmatpush3.bf16.msra.mxu0 %v9228_v21  ;;  %v5419_v21 = vld [vmem:[%s11807_s5 + $0x318] sm:$0xff] }
 0x68b   :  { %9230 = vmatprep.subr.bf16.mxu0 %v9610_v6 }
 0x68e   :  { %9232 = vmatpush3.bf16.msra.mxu0 %v9231_v13  ;;  %v9357_v13 = vpack.c.bf16 %v5419_v21, %v5418_v11  ;;  %v5456_v11 = vld [vmem:[%s11807_s5 + $0x430] sm:$0xff] }
 0x68f   :  { %9257 = vmatprep.subr.bf16.mxu0 %v9610_v6 }
 0x690   :  { %v4172_v49 = vpop.f32.mrb[36].mxu1 }
 0x691   :  { %8081 = vmatmul.mubr.f32.vlgmr.msra.gmra.mrb[152].mxu0 %v4172_v49  ;;  %v8047_v48 = vpop.f32.mrb[37].mxu1  ;;  %v9363_v49 = vpack.c.bf16 %v5423_v59, %v5422_v42  ;;  %v5462_v42 = vld [vmem:[%s11807_s5 + $0x460] sm:$0xff]  ;;  %v5463_v59 = vld [vmem:[%s11807_s5 + $0x468] sm:$0xff] }
 0x692   :  { %9259 = vmatpush3.bf16.msra.mxu0 %v9258_v44  ;;  %8150 = vmatprep.mubr.msk.f32.mxu0 %vm9611_vm0, %v9612_v46  ;;  %v9360_v44 = vpack.c.bf16 %v5421_v33, %v5420_v30  ;;  %v5424_v48 = vld [vmem:[%s11807_s5 + $0x340] sm:$0xff]  ;;  %v5460_v30 = vld [vmem:[%s11807_s5 + $0x450] sm:$0xff]  ;;  %v5461_v33 = vld [vmem:[%s11807_s5 + $0x458] sm:$0xff] }
 0x693   :  { %9260 = vmatprep.subr.bf16.mxu0 %v9610_v6 }
 0x696   :  { %9262 = vmatpush3.bf16.msra.mxu0 %v9261_v37  ;;  %v5425_v37 = vld [vmem:[%s11807_s5 + $0x348] sm:$0xff] }
 0x697   :  { %9263 = vmatprep.subr.bf16.mxu0 %v9610_v6  ;;  %v9366_v53 = vpack.c.bf16 %v5425_v37, %v5424_v48  ;;  %v5464_v48 = vld [vmem:[%s11807_s5 + $0x470] sm:$0xff]  ;;  %v5465_v37 = vld [vmem:[%s11807_s5 + $0x478] sm:$0xff] }
 0x69a   :  { %9265 = vmatpush3.bf16.msra.mxu0 %v9264_v54  ;;  %v5427_v54 = vld [vmem:[%s11807_s5 + $0x358] sm:$0xff] }
 0x69b   :  { %9266 = vmatprep.subr.bf16.mxu0 %v9610_v6  ;;  %v9369_v38 = vpack.c.bf16 %v5427_v54, %v5426_v20 }
 0x69e   :  { %9268 = vmatpush3.bf16.msra.mxu0 %v9267_v0  ;;  %v5429_v0 = vld [vmem:[%s11807_s5 + $0x368] sm:$0xff] }
 0x69f   :  { %9269 = vmatprep.subr.bf16.mxu0 %v9610_v6  ;;  %v9372_v18 = vpack.c.bf16 %v5429_v0, %v5428_v2 }
 0x6a2   :  { %9271 = vmatpush3.bf16.msra.mxu0 %v9270_v24  ;;  %v5431_v24 = vld [vmem:[%s11807_s5 + $0x378] sm:$0xff] }
 0x6a3   :  { %9272 = vmatprep.subr.bf16.mxu0 %v9610_v6  ;;  %v9375_v29 = vpack.c.bf16 %v5431_v24, %v5430_v35 }
 0x6a6   :  { %9274 = vmatpush3.bf16.msra.mxu0 %v9273_v39  ;;  %v5434_v39 = vld [vmem:[%s11807_s5 + $0x388] sm:$0xff] }
 0x6a7   :  { %9275 = vmatprep.subr.bf16.mxu0 %v9610_v6  ;;  %v9402_v51 = vpack.c.bf16 %v5434_v39, %v5433_v26 }
 0x6aa   :  { %9277 = vmatpush3.bf16.msra.mxu0 %v9276_v43  ;;  %v5436_v43 = vld [vmem:[%s11807_s5 + $0x398] sm:$0xff] }
 0x6ab   :  { %9278 = vmatprep.subr.bf16.mxu0 %v9610_v6 }
 0x6ae   :  { %9280 = vmatpush3.bf16.msra.mxu0 %v9279_v61  ;;  %v9405_v61 = vpack.c.bf16 %v5436_v43, %v5435_v62 }
 0x6af   :  { %9305 = vmatprep.subr.bf16.mxu0 %v9610_v6 }
 0x6b0   :  { %v4332_v56 = vpop.f32.mrb[38].mxu1 }
 0x6b1   :  { %8151 = vmatmul.mubr.f32.vlgmr.msra.gmra.mrb[154].mxu0 %v4332_v56  ;;  %v8117_v47 = vpop.f32.mrb[39].mxu1  ;;  %v9411_v56 = vpack.c.bf16 %v5440_v8, %v5439_v25 }
 0x6b2   :  { %9307 = vmatpush3.bf16.msra.mxu0 %v9306_v45  ;;  %8220 = vmatprep.mubr.msk.f32.mxu0 %vm9611_vm0, %v9612_v46  ;;  %v9408_v45 = vpack.c.bf16 %v5438_v10, %v5437_v36  ;;  %v5441_v47 = vld [vmem:[%s11807_s5 + $0x3c0] sm:$0xff] }
 0x6b3   :  { %9308 = vmatprep.subr.bf16.mxu0 %v9610_v6 }
 0x6b6   :  { %9310 = vmatpush3.bf16.msra.mxu0 %v9309_v4  ;;  %v5442_v4 = vld [vmem:[%s11807_s5 + $0x3c8] sm:$0xff] }
 0x6b7   :  { %9311 = vmatprep.subr.bf16.mxu0 %v9610_v6  ;;  %v9414_v34 = vpack.c.bf16 %v5442_v4, %v5441_v47 }
 0x6ba   :  { %9313 = vmatpush3.bf16.msra.mxu0 %v9312_v17  ;;  %v5444_v17 = vld [vmem:[%s11807_s5 + $0x3d8] sm:$0xff] }
 0x6bb   :  { %9314 = vmatprep.subr.bf16.mxu0 %v9610_v6  ;;  %v9417_v23 = vpack.c.bf16 %v5444_v17, %v5443_v1 }
 0x6be   :  { %9316 = vmatpush3.bf16.msra.mxu0 %v9315_v40  ;;  %v5446_v40 = vld [vmem:[%s11807_s5 + $0x3e8] sm:$0xff] }
 0x6bf   :  { %9317 = vmatprep.subr.bf16.mxu0 %v9610_v6  ;;  %v9420_v31 = vpack.c.bf16 %v5446_v40, %v5445_v28 }
 0x6c2   :  { %9319 = vmatpush3.bf16.msra.mxu0 %v9318_v14  ;;  %v5448_v14 = vld [vmem:[%s11807_s5 + $0x3f8] sm:$0xff] }
 0x6c3   :  { %9320 = vmatprep.subr.bf16.mxu0 %v9610_v6  ;;  %v9423_v41 = vpack.c.bf16 %v5448_v14, %v5447_v15 }
 0x6c6   :  { %9322 = vmatpush3.bf16.msra.mxu0 %v9321_v32  ;;  %v5451_v32 = vld [vmem:[%s11807_s5 + $0x408] sm:$0xff] }
 0x6c7   :  { %9323 = vmatprep.subr.bf16.mxu0 %v9610_v6  ;;  %v9450_v5 = vpack.c.bf16 %v5451_v32, %v5450_v3 }
 0x6ca   :  { %9325 = vmatpush3.bf16.msra.mxu0 %v9324_v52  ;;  %v5453_v52 = vld [vmem:[%s11807_s5 + $0x418] sm:$0xff] }
 0x6cb   :  { %9326 = vmatprep.subr.bf16.mxu0 %v9610_v6 }
 0x6ce   :  { %9328 = vmatpush3.bf16.msra.mxu0 %v9327_v58  ;;  %v9453_v58 = vpack.c.bf16 %v5453_v52, %v5452_v9 }
 0x6cf   :  { %9353 = vmatprep.subr.bf16.mxu0 %v9610_v6 }
 0x6d0   :  { %v4492_v22 = vpop.f32.mrb[40].mxu1 }
 0x6d1   :  { %8221 = vmatmul.mubr.f32.vlgmr.msra.gmra.mrb[156].mxu0 %v4492_v22  ;;  %v8187_v12 = vpop.f32.mrb[41].mxu1  ;;  %v5458_v22 = vld [vmem:[%s11807_s5 + $0x440] sm:$0xff] }
 0x6d2   :  { %9355 = vmatpush3.bf16.msra.mxu0 %v9354_v16  ;;  %8290 = vmatprep.mubr.msk.f32.mxu0 %vm9611_vm0, %v9612_v46  ;;  %v9456_v16 = vpack.c.bf16 %v5455_v63, %v5454_v60  ;;  %v5459_v12 = vld [vmem:[%s11807_s5 + $0x448] sm:$0xff] }
 0x6d3   :  { %9356 = vmatprep.subr.bf16.mxu0 %v9610_v6 }
 0x6d6   :  { %9358 = vmatpush3.bf16.msra.mxu0 %v9357_v13  ;;  %v9462_v13 = vpack.c.bf16 %v5459_v12, %v5458_v22 }
 0x6d7   :  { %9359 = vmatprep.subr.bf16.mxu0 %v9610_v6 }
 0x6da   :  { %9361 = vmatpush3.bf16.msra.mxu0 %v9360_v44  ;;  %v9465_v44 = vpack.c.bf16 %v5461_v33, %v5460_v30 }
 0x6db   :  { %9362 = vmatprep.subr.bf16.mxu0 %v9610_v6 }
 0x6de   :  { %9364 = vmatpush3.bf16.msra.mxu0 %v9363_v49  ;;  %v9468_v49 = vpack.c.bf16 %v5463_v59, %v5462_v42 }
 0x6df   :  { %9365 = vmatprep.subr.bf16.mxu0 %v9610_v6 }
 0x6e2   :  { %9367 = vmatpush3.bf16.msra.mxu0 %v9366_v53  ;;  %v9471_v53 = vpack.c.bf16 %v5465_v37, %v5464_v48 }
 0x6e3   :  { %9368 = vmatprep.subr.bf16.mxu0 %v9610_v6 }
 0x6e6   :  { %9370 = vmatpush3.bf16.msra.mxu0 %v9369_v38 }
 0x6e7   :  { %9371 = vmatprep.subr.bf16.mxu0 %v9610_v6 }
 0x6ea   :  { %9373 = vmatpush3.bf16.msra.mxu0 %v9372_v18 }
 0x6eb   :  { %9374 = vmatprep.subr.bf16.mxu0 %v9610_v6 }
 0x6ee   :  { %9376 = vmatpush3.bf16.msra.mxu0 %v9375_v29 }
 0x6ef   :  { %9401 = vmatprep.subr.bf16.mxu0 %v9610_v6 }
 0x6f0   :  { %v4652_v50 = vpop.f32.mrb[42].mxu1 }
 0x6f1   :  { %8291 = vmatmul.mubr.f32.vlgmr.msra.gmra.mrb[158].mxu0 %v4652_v50  ;;  %v8257_v27 = vpop.f32.mrb[43].mxu1 }
 0x6f2   :  { %9403 = vmatpush3.bf16.msra.mxu0 %v9402_v51  ;;  %8360 = vmatprep.mubr.msk.f32.mxu0 %vm9611_vm0, %v9612_v46 }
 0x6f3   :  { %9404 = vmatprep.subr.bf16.mxu0 %v9610_v6 }
 0x6f6   :  { %9406 = vmatpush3.bf16.msra.mxu0 %v9405_v61 }
 0x6f7   :  { %9407 = vmatprep.subr.bf16.mxu0 %v9610_v6 }
 0x6fa   :  { %9409 = vmatpush3.bf16.msra.mxu0 %v9408_v45  ;;  %v5066_v45 = vsub.s32 4, %v9821_v7 }
 0x6fb   :  { %9410 = vmatprep.subr.bf16.mxu0 %v9610_v6 }
 0x6fe   :  { %9412 = vmatpush3.bf16.msra.mxu0 %v9411_v56 }
 0x6ff   :  { %9413 = vmatprep.subr.bf16.mxu0 %v9610_v6 }
 0x702   :  { %9415 = vmatpush3.bf16.msra.mxu0 %v9414_v34 }
 0x703   :  { %9416 = vmatprep.subr.bf16.mxu0 %v9610_v6 }
 0x706   :  { %9418 = vmatpush3.bf16.msra.mxu0 %v9417_v23 }
 0x707   :  { %9419 = vmatprep.subr.bf16.mxu0 %v9610_v6 }
 0x70a   :  { %9421 = vmatpush3.bf16.msra.mxu0 %v9420_v31 }
 0x70b   :  { %9422 = vmatprep.subr.bf16.mxu0 %v9610_v6 }
 0x70e   :  { %9424 = vmatpush3.bf16.msra.mxu0 %v9423_v41 }
 0x70f   :  { %9449 = vmatprep.subr.bf16.mxu0 %v9610_v6 }
 0x710   :  { %v4812_v55 = vpop.f32.mrb[44].mxu1 }
 0x711   :  { %8361 = vmatmul.mubr.f32.vlgmr.msra.gmra.mrb[160].mxu0 %v4812_v55  ;;  %v8327_v57 = vpop.f32.mrb[45].mxu1 }
 0x712   :  { %9451 = vmatpush3.bf16.msra.mxu0 %v9450_v5  ;;  %8430 = vmatprep.mubr.msk.f32.mxu0 %vm9611_vm0, %v9612_v46  ;;  %v5457_v46 = vld [vmem:[%s11807_s5 + $0x438] sm:$0xff] }
 0x713   :  { %9452 = vmatprep.subr.bf16.mxu0 %v9610_v6  ;;  %v9459_v21 = vpack.c.bf16 %v5457_v46, %v5456_v11 }
 0x716   :  { %9454 = vmatpush3.bf16.msra.mxu0 %v9453_v58 }
 0x717   :  { %9455 = vmatprep.subr.bf16.mxu0 %v9610_v6 }
 0x71a   :  { %9457 = vmatpush3.bf16.msra.mxu0 %v9456_v16 }
 0x71b   :  { %9458 = vmatprep.subr.bf16.mxu0 %v9610_v6 }
 0x71e   :  { %9460 = vmatpush3.bf16.msra.mxu0 %v9459_v21 }
 0x71f   :  { %9461 = vmatprep.subr.bf16.mxu0 %v9610_v6 }
 0x722   :  { %9463 = vmatpush3.bf16.msra.mxu0 %v9462_v13 }
 0x723   :  { %9464 = vmatprep.subr.bf16.mxu0 %v9610_v6 }
 0x726   :  { %9466 = vmatpush3.bf16.msra.mxu0 %v9465_v44 }
 0x727   :  { %9467 = vmatprep.subr.bf16.mxu0 %v9610_v6 }
 0x72a   :  { %9469 = vmatpush3.bf16.msra.mxu0 %v9468_v49 }
 0x72b   :  { %9470 = vmatprep.subr.bf16.mxu0 %v9610_v6 }
 0x72e   :  { %9472 = vmatpush3.bf16.msra.mxu0 %v9471_v53 }
 0x730   :  { %v4972_v20 = vpop.f32.mrb[46].mxu1 }
 0x731   :  { %v8397_v54 = vpop.f32.mrb[47].mxu1  ;;  %8431 = vmatmul.mubr.f32.vlgmr.msra.gmra.mrb[162].mxu0 %v4972_v20 }
 0x744   :  { %v4099_v38 = vpop.f32.mrb[150].mxu0 }
 0x745   :  { %v4103_v2 = vadd.f32 %v4099_v38, %v11436_v19  ;;  %v8012_v0 = vpop.f32.mrb[151].mxu0  ;;  %v9609_v19 = vld [vmem:[%s11804_s6] sm:$0xff] }
 0x746   :  { %v5067_v25 = vrot.slane %v9609_v19, %v5066_v45 }
 0x764   :  { %v4259_v18 = vpop.f32.mrb[152].mxu0 }
 0x765   :  { %v4263_v35 = vadd.f32 %v4259_v18, %v4103_v2  ;;  %v8082_v24 = vpop.f32.mrb[153].mxu0 }
 0x784   :  { %v4419_v29 = vpop.f32.mrb[154].mxu0 }
 0x785   :  { %v4423_v26 = vadd.f32 %v4419_v29, %v4263_v35  ;;  %v8152_v39 = vpop.f32.mrb[155].mxu0 }
 0x7a4   :  { %v4579_v51 = vpop.f32.mrb[156].mxu0 }
 0x7a5   :  { %v4583_v62 = vadd.f32 %v4579_v51, %v4423_v26  ;;  %v8222_v43 = vpop.f32.mrb[157].mxu0 }
 0x7c4   :  { %v4739_v50 = vpop.f32.mrb[158].mxu0 }
 0x7c5   :  { %v4743_v27 = vadd.f32 %v4739_v50, %v4583_v62  ;;  %v8292_v6 = vpop.f32.mrb[159].mxu0 }
 0x7e4   :  { %v4899_v61 = vpop.f32.mrb[160].mxu0 }
 0x7e5   :  { %v4903_v36 = vadd.f32 %v4899_v61, %v4743_v27  ;;  %v8362_v10 = vpop.f32.mrb[161].mxu0 }
 0x804   :  { %v5059_v8 = vpop.f32.mrb[162].mxu0 }
 0x805   :  { %v5063_v56 = vadd.f32 %v5059_v8, %v4903_v36  ;;  %v8432_v47 = vpop.f32.mrb[163].mxu0 }
 0x807   :  { %v5068_v4 = vadd.f32 %v5067_v25, %v5063_v56 }
 0x809   :  { %5069 = vst [vmem:[%s11808_s7] sm:$0xff] %v5068_v4 }

</bundles_post_ra>
